<compile_context>
chip_gen: v7x
topology: tpu7x:2x2x1
jax: 0.10.0
libtpu: 0.0.40
codegen_flags: <defaults>
</compile_context>

<pallas_src>
import jax
import jax.numpy as jnp
import numpy as np
from jax.experimental import pallas as pl
from jax.experimental.pallas import tpu as pltpu

_NEG_SLOPE = 0.2
_BN_EPS = 1e-5
_KSIZE = 4
_KK = _KSIZE * _KSIZE


def _round_up(x, m):
    return (x + m - 1) // m * m


# ---------------------------------------------------------------------------
# Wrapper-side helpers (run once / tiny XLA glue on the external input only)
# ---------------------------------------------------------------------------
def _im2col(x_nhwc, ksize, stride, pad):
    """im2col for the external input image only (intermediates stay in VMEM)."""
    B, H, W, C = x_nhwc.shape
    xp = jnp.pad(x_nhwc, ((0, 0), (pad, pad), (pad, pad), (0, 0)))
    OH = (H + 2 * pad - ksize) // stride + 1
    OW = (W + 2 * pad - ksize) // stride + 1
    cols = []
    for kh in range(ksize):
        for kw in range(ksize):
            cols.append(xp[:, kh:kh + stride * OH:stride,
                           kw:kw + stride * OW:stride, :])
    p = jnp.stack(cols, axis=3)                       # (B, OH, OW, KK, C)
    return p.reshape(B * OH * OW, ksize * ksize * C), (B, OH, OW)


def _selection_matrix(h_in, w_in, ksize=4, stride=2, pad=1):
    """0/1 matrix S so that (S @ y)[k*S_out + s, c] = window value (or 0 = pad)."""
    oh = (h_in + 2 * pad - ksize) // stride + 1
    ow = (w_in + 2 * pad - ksize) // stride + 1
    sel = np.zeros((ksize * ksize, oh * ow, h_in * w_in), np.float32)
    for kh in range(ksize):
        for kw in range(ksize):
            k = kh * ksize + kw
            for o_h in range(oh):
                ih = o_h * stride + kh - pad
                if ih < 0 or ih >= h_in:
                    continue
                for o_w in range(ow):
                    iw = o_w * stride + kw - pad
                    if 0 <= iw < w_in:
                        sel[k, o_h * ow + o_w, ih * w_in + iw] = 1.0
    return sel.reshape(ksize * ksize * oh * ow, h_in * w_in)


# ---------------------------------------------------------------------------
# The single fused Pallas kernel (built per static shape configuration)
# ---------------------------------------------------------------------------
def _build_kernel(batch, s0, bn_dims):
    """bn_dims: list of (s_in, s_out, c_in, c_out) for the BatchNorm ConvBlocks."""
    n_bn = len(bn_dims)

    def kernel(*refs):
        p0_ref, w0_ref = refs[0], refs[1]
        wf_ref = refs[2 + 4 * n_bn]
        bf_ref = refs[3 + 4 * n_bn]
        out_ref = refs[4 + 4 * n_bn]

        # ---- Block0: conv(4x4,s2,p1,no bias) + LeakyReLU(0.2), no BN. One matmul.
        y0 = jnp.dot(p0_ref[...], w0_ref[...], preferred_element_type=jnp.float32)
        y0 = jnp.where(y0 >= 0.0, y0, _NEG_SLOPE * y0)
        # Keep the activation as per-sample f32 slabs (rows = spatial raster order).
        acts = [y0[b * s0:(b + 1) * s0, :] for b in range(batch)]

        # ---- ConvBlocks with BatchNorm, fully in VMEM.
        for bi, (_, s_out, _, c_out) in enumerate(bn_dims):
            sel_ref = refs[2 + 4 * bi]      # (KK*s_out, s_in)  bf16 0/1 selection
            wk_ref = refs[3 + 4 * bi]       # (KK, c_in, c_out) bf16 per-tap weights
            gma_ref = refs[4 + 4 * bi]      # (1, c_out) f32
            bta_ref = refs[5 + 4 * bi]      # (1, c_out) f32

            sel = sel_ref[...]
            convs = []
            for b in range(batch):
                yb = acts[b].astype(jnp.bfloat16)                      # (s_in, c_in)
                # In-VMEM im2col: one matmul gathers all 16 windows (zero rows = pad).
                patches = jnp.dot(sel, yb,
                                  preferred_element_type=jnp.float32)  # (KK*s_out, c_in)
                patches = patches.astype(jnp.bfloat16)
                acc = jnp.zeros((s_out, c_out), jnp.float32)
                for k in range(_KK):
                    acc = acc + jnp.dot(patches[k * s_out:(k + 1) * s_out, :],
                                        wk_ref[k],
                                        preferred_element_type=jnp.float32)
                # LeakyReLU BEFORE BatchNorm (matches the reference ConvBlock).
                convs.append(jnp.where(acc >= 0.0, acc, _NEG_SLOPE * acc))

            # Training-mode BN over (batch, spatial); biased variance; two-pass.
            m = float(batch * s_out)
            tot = jnp.zeros((1, c_out), jnp.float32)
            for cb in convs:
                tot = tot + jnp.sum(cb, axis=0, keepdims=True)
            mean = tot / m
            sq = jnp.zeros((1, c_out), jnp.float32)
            for cb in convs:
                d = cb - mean
                sq = sq + jnp.sum(d * d, axis=0, keepdims=True)
            var = sq / m
            scale = gma_ref[...] * jax.lax.rsqrt(var + _BN_EPS)
            shift = bta_ref[...] - mean * scale
            acts = [cb * scale + shift for cb in convs]

        # ---- conv_final (4x4, stride 1, pad 0, bias=True) + Sigmoid epilogue.
        wf = wf_ref[...]                    # (s_final, c_final) f32
        bias = bf_ref[...]                  # (1, 1) f32
        for b in range(batch):
            v = jnp.sum(acts[b] * wf, axis=0, keepdims=True)   # (1, c_final)
            v = jnp.sum(v, axis=1, keepdims=True) + bias       # (1, 1)
            out_ref[b:b + 1, :] = jax.nn.sigmoid(jnp.broadcast_to(v, (1, 128)))

    return kernel


# ---------------------------------------------------------------------------
# Parameter preparation (once) and forward pass
# ---------------------------------------------------------------------------
def prepare_params(params, im_size=32):
    n_blocks = 3 + (im_size > 32) + (im_size > 64) + (im_size > 128) + (im_size > 256)

    w0 = params["w0"]
    c0, cin = w0.shape[0], w0.shape[1]
    cin_pad = _round_up(cin, 8)                       # K = 16*8 = 128 lane-dense
    w0m = jnp.transpose(w0, (2, 3, 1, 0))             # (KH, KW, Cin, Cout)
    w0m = jnp.pad(w0m, ((0, 0), (0, 0), (0, cin_pad - cin), (0, 0)))
    w0m = w0m.reshape(_KK * cin_pad, c0).astype(jnp.bfloat16)

    sels, wks, gammas, betas = [], [], [], []
    for i in range(1, n_blocks):
        w = params[f"w{i}"]
        c_out, c_in = w.shape[0], w.shape[1]
        h_in = im_size >> i
        sels.append(jnp.asarray(_selection_matrix(h_in, h_in), jnp.bfloat16))
        wks.append(jnp.transpose(w, (2, 3, 1, 0)).reshape(_KK, c_in, c_out)
                   .astype(jnp.bfloat16))
        gammas.append(params[f"g{i}"].reshape(1, c_out).astype(jnp.float32))
        betas.append(params[f"b{i}"].reshape(1, c_out).astype(jnp.float32))

    wf = params["wf"]
    c_final = wf.shape[1]
    wfm = jnp.transpose(wf, (0, 2, 3, 1)).reshape(_KK, c_final).astype(jnp.float32)
    bfm = params["bf"].reshape(1, 1).astype(jnp.float32)

    return {"w0": w0m, "sel": sels, "wk": wks, "gamma": gammas, "beta": betas,
            "wf": wfm, "bf": bfm}


def discriminator_forward(x_nchw, prep):
    batch = x_nchw.shape[0]
    x = jnp.transpose(x_nchw, (0, 2, 3, 1)).astype(jnp.float32)     # NCHW -> NHWC
    cin = x.shape[-1]
    cin_pad = prep["w0"].shape[0] // _KK
    if cin_pad > cin:
        x = jnp.pad(x, ((0, 0), (0, 0), (0, 0), (0, cin_pad - cin)))

    patches0, (_, oh0, ow0) = _im2col(x, _KSIZE, 2, 1)              # external input only
    patches0 = patches0.astype(jnp.bfloat16)
    s0 = oh0 * ow0
    c0 = prep["w0"].shape[1]

    bn_dims = []
    for sel, wk in zip(prep["sel"], prep["wk"]):
        bn_dims.append((sel.shape[1], sel.shape[0] // _KK, wk.shape[1], wk.shape[2]))
    s_final, c_final = prep["wf"].shape

    args = [patches0, prep["w0"]]
    for sel, wk, g, b in zip(prep["sel"], prep["wk"], prep["gamma"], prep["beta"]):
        args += [sel, wk, g, b]
    args += [prep["wf"], prep["bf"]]

    kernel = _build_kernel(batch, s0, bn_dims)

    flops = 2 * patches0.shape[0] * patches0.shape[1] * c0
    for (s_in, s_out, c_in, c_out) in bn_dims:
        flops += 2 * batch * (_KK * s_out * s_in * c_in + _KK * s_out * c_in * c_out)
    flops += 2 * batch * s_final * c_final
    bytes_accessed = sum(int(np.prod(a.shape)) * a.dtype.itemsize for a in args)
    bytes_accessed += batch * 128 * 4

    out = pl.pallas_call(
        kernel,
        out_shape=jax.ShapeDtypeStruct((batch, 128), jnp.float32),
        compiler_params=pltpu.CompilerParams(vmem_limit_bytes=32 * 1024 * 1024),
        cost_estimate=pl.CostEstimate(flops=flops,
                                      transcendentals=batch * 128,
                                      bytes_accessed=bytes_accessed),
    )(*args)
    return out[:, :1].reshape(batch, 1, 1, 1)


# ---------------------------------------------------------------------------
# Pure-JAX reference (f32) for a correctness check
# ---------------------------------------------------------------------------
def _reference_forward(x_nchw, params, im_size=32):
    n_blocks = 3 + (im_size > 32) + (im_size > 64) + (im_size > 128) + (im_size > 256)

    def conv(x, w, stride, pad):
        return jax.lax.conv_general_dilated(
            x, w, (stride, stride), ((pad, pad), (pad, pad)),
            dimension_numbers=("NCHW", "OIHW", "NCHW"))

    h = x_nchw.astype(jnp.float32)
    for i in range(n_blocks):
        h = conv(h, params[f"w{i}"], 2, 1)
        h = jnp.where(h >= 0.0, h, _NEG_SLOPE * h)
        if i != 0:
            mean = jnp.mean(h, axis=(0, 2, 3), keepdims=True)
            var = jnp.mean((h - mean) ** 2, axis=(0, 2, 3), keepdims=True)
            g = params[f"g{i}"].reshape(1, -1, 1, 1)
            b = params[f"b{i}"].reshape(1, -1, 1, 1)
            h = (h - mean) * jax.lax.rsqrt(var + _BN_EPS) * g + b
    h = conv(h, params["wf"], 1, 0) + params["bf"].reshape(1, -1, 1, 1)
    return jax.nn.sigmoid(h)


def init_params(key, nc, ndf):
    chans = [(nc, ndf), (ndf, ndf * 2), (ndf * 2, ndf * 8)] + \
            [(ndf * 8, ndf * 8)] * 4
    keys = jax.random.split(key, 3 * len(chans) + 1)
    params = {}
    for i, (ci, co) in enumerate(chans):
        params[f"w{i}"] = 0.02 * jax.random.normal(
            keys[3 * i], (co, ci, 4, 4), jnp.float32)
        params[f"g{i}"] = 1.0 + 0.1 * jax.random.normal(
            keys[3 * i + 1], (co,), jnp.float32)
        params[f"b{i}"] = 0.1 * jax.random.normal(
            keys[3 * i + 2], (co,), jnp.float32)
    params["wf"] = 0.02 * jax.random.normal(
        keys[-1], (1, ndf * 8, 4, 4), jnp.float32)
    params["bf"] = jnp.zeros((1,), jnp.float32)
    return params


# ---------------------------------------------------------------------------
if __name__ == "__main__":
    nc, ndf, im_size, batch = 3, 8, 32, 2
    key = jax.random.PRNGKey(0)
    kx, kp = jax.random.split(key)
    x = jax.random.normal(kx, (batch, nc, im_size, im_size), jnp.float32)
    params = init_params(kp, nc, ndf)
    prep = prepare_params(params, im_size=im_size)

    fwd = jax.jit(discriminator_forward)
    out = jax.block_until_ready(fwd(x, prep))

    assert out.shape == (batch, 1, 1, 1), out.shape
    assert bool(jnp.all((out >= 0.0) & (out <= 1.0)))

    ref = _reference_forward(x, params, im_size)
    err = float(jnp.max(jnp.abs(out - ref)))
    assert err < 5e-2, f"max abs err vs f32 reference: {err}"

    print("KERNEL_OK")
</pallas_src>

<mosaic_0001>
module attributes {stable_mosaic.version = 11 : i64} {
  func.func @kernel(%arg0: memref<512x128xbf16, #tpu.memory_space<vmem>>, %arg1: memref<128x8xbf16, #tpu.memory_space<vmem>>, %arg2: memref<1024x256xbf16, #tpu.memory_space<vmem>>, %arg3: memref<16x8x16xbf16, #tpu.memory_space<vmem>>, %arg4: memref<1x16xf32, #tpu.memory_space<vmem>>, %arg5: memref<1x16xf32, #tpu.memory_space<vmem>>, %arg6: memref<256x64xbf16, #tpu.memory_space<vmem>>, %arg7: memref<16x16x64xbf16, #tpu.memory_space<vmem>>, %arg8: memref<1x64xf32, #tpu.memory_space<vmem>>, %arg9: memref<1x64xf32, #tpu.memory_space<vmem>>, %arg10: memref<16x64xf32, #tpu.memory_space<vmem>>, %arg11: memref<1x1xf32, #tpu.memory_space<vmem>>, %arg12: memref<2x128xf32, #tpu.memory_space<vmem>>) attributes {dimension_semantics = [], scalar_prefetch = 0 : i64, scratch_operands = 0 : i64, tpu.core_type = #tpu.core_type<tc>} {
    %c0 = arith.constant 0 : index
    %c0_0 = arith.constant 0 : index
    %0 = vector.load %arg0[%c0, %c0_0] : memref<512x128xbf16, #tpu.memory_space<vmem>>, vector<512x128xbf16>
    %c0_1 = arith.constant 0 : index
    %c0_2 = arith.constant 0 : index
    %1 = vector.load %arg1[%c0_1, %c0_2] : memref<128x8xbf16, #tpu.memory_space<vmem>>, vector<128x8xbf16>
    %cst = arith.constant dense<0.000000e+00> : vector<512x8xf32>
    %2 = tpu.matmul %0, %1, %cst {dimension_numbers = #tpu.dot_dimension_numbers<[1], [0], [0], [1], [0, 0, 1, 1], [], []>} : vector<512x128xbf16>, vector<128x8xbf16>, vector<512x8xf32> -> vector<512x8xf32>
    %cst_3 = arith.constant 0.000000e+00 : f32
    %3 = vector.broadcast %cst_3 : f32 to vector<512x8xf32>
    %4 = arith.cmpf oge, %2, %3 : vector<512x8xf32>
    %cst_4 = arith.constant 2.000000e-01 : f32
    %5 = vector.broadcast %cst_4 : f32 to vector<512x8xf32>
    %6 = arith.mulf %5, %2 : vector<512x8xf32>
    %7 = arith.select %4, %2, %6 : vector<512x8xi1>, vector<512x8xf32>
    %8 = vector.extract_strided_slice %7 {offsets = [0, 0], sizes = [256, 8], strides = [1, 1]} : vector<512x8xf32> to vector<256x8xf32>
    %9 = vector.extract_strided_slice %7 {offsets = [256, 0], sizes = [256, 8], strides = [1, 1]} : vector<512x8xf32> to vector<256x8xf32>
    %c0_5 = arith.constant 0 : index
    %c0_6 = arith.constant 0 : index
    %10 = vector.load %arg2[%c0_5, %c0_6] : memref<1024x256xbf16, #tpu.memory_space<vmem>>, vector<1024x256xbf16>
    %11 = arith.truncf %8 : vector<256x8xf32> to vector<256x8xbf16>
    %cst_7 = arith.constant dense<0.000000e+00> : vector<1024x8xf32>
    %12 = tpu.matmul %10, %11, %cst_7 {dimension_numbers = #tpu.dot_dimension_numbers<[1], [0], [0], [1], [0, 0, 1, 1], [], []>} : vector<1024x256xbf16>, vector<256x8xbf16>, vector<1024x8xf32> -> vector<1024x8xf32>
    %13 = arith.truncf %12 : vector<1024x8xf32> to vector<1024x8xbf16>
    %cst_8 = arith.constant 0.000000e+00 : f32
    %14 = vector.broadcast %cst_8 : f32 to vector<64x16xf32>
    %15 = vector.extract_strided_slice %13 {offsets = [0, 0], sizes = [64, 8], strides = [1, 1]} : vector<1024x8xbf16> to vector<64x8xbf16>
    %c0_9 = arith.constant 0 : index
    %c0_10 = arith.constant 0 : index
    %c0_11 = arith.constant 0 : index
    %16 = vector.load %arg3[%c0_9, %c0_10, %c0_11] : memref<16x8x16xbf16, #tpu.memory_space<vmem>>, vector<1x8x16xbf16>
    %17 = vector.shape_cast %16 : vector<1x8x16xbf16> to vector<8x16xbf16>
    %cst_12 = arith.constant dense<0.000000e+00> : vector<64x16xf32>
    %18 = tpu.matmul %15, %17, %cst_12 {dimension_numbers = #tpu.dot_dimension_numbers<[1], [0], [0], [1], [0, 0, 1, 1], [], []>} : vector<64x8xbf16>, vector<8x16xbf16>, vector<64x16xf32> -> vector<64x16xf32>
    %19 = arith.addf %14, %18 : vector<64x16xf32>
    %20 = vector.extract_strided_slice %13 {offsets = [64, 0], sizes = [64, 8], strides = [1, 1]} : vector<1024x8xbf16> to vector<64x8xbf16>
    %c1 = arith.constant 1 : index
    %c0_13 = arith.constant 0 : index
    %c0_14 = arith.constant 0 : index
    %21 = vector.load %arg3[%c1, %c0_13, %c0_14] : memref<16x8x16xbf16, #tpu.memory_space<vmem>>, vector<1x8x16xbf16>
    %22 = vector.shape_cast %21 : vector<1x8x16xbf16> to vector<8x16xbf16>
    %cst_15 = arith.constant dense<0.000000e+00> : vector<64x16xf32>
    %23 = tpu.matmul %20, %22, %cst_15 {dimension_numbers = #tpu.dot_dimension_numbers<[1], [0], [0], [1], [0, 0, 1, 1], [], []>} : vector<64x8xbf16>, vector<8x16xbf16>, vector<64x16xf32> -> vector<64x16xf32>
    %24 = arith.addf %19, %23 : vector<64x16xf32>
    %25 = vector.extract_strided_slice %13 {offsets = [128, 0], sizes = [64, 8], strides = [1, 1]} : vector<1024x8xbf16> to vector<64x8xbf16>
    %c2 = arith.constant 2 : index
    %c0_16 = arith.constant 0 : index
    %c0_17 = arith.constant 0 : index
    %26 = vector.load %arg3[%c2, %c0_16, %c0_17] : memref<16x8x16xbf16, #tpu.memory_space<vmem>>, vector<1x8x16xbf16>
    %27 = vector.shape_cast %26 : vector<1x8x16xbf16> to vector<8x16xbf16>
    %cst_18 = arith.constant dense<0.000000e+00> : vector<64x16xf32>
    %28 = tpu.matmul %25, %27, %cst_18 {dimension_numbers = #tpu.dot_dimension_numbers<[1], [0], [0], [1], [0, 0, 1, 1], [], []>} : vector<64x8xbf16>, vector<8x16xbf16>, vector<64x16xf32> -> vector<64x16xf32>
    %29 = arith.addf %24, %28 : vector<64x16xf32>
    %30 = vector.extract_strided_slice %13 {offsets = [192, 0], sizes = [64, 8], strides = [1, 1]} : vector<1024x8xbf16> to vector<64x8xbf16>
    %c3 = arith.constant 3 : index
    %c0_19 = arith.constant 0 : index
    %c0_20 = arith.constant 0 : index
    %31 = vector.load %arg3[%c3, %c0_19, %c0_20] : memref<16x8x16xbf16, #tpu.memory_space<vmem>>, vector<1x8x16xbf16>
    %32 = vector.shape_cast %31 : vector<1x8x16xbf16> to vector<8x16xbf16>
    %cst_21 = arith.constant dense<0.000000e+00> : vector<64x16xf32>
    %33 = tpu.matmul %30, %32, %cst_21 {dimension_numbers = #tpu.dot_dimension_numbers<[1], [0], [0], [1], [0, 0, 1, 1], [], []>} : vector<64x8xbf16>, vector<8x16xbf16>, vector<64x16xf32> -> vector<64x16xf32>
    %34 = arith.addf %29, %33 : vector<64x16xf32>
    %35 = vector.extract_strided_slice %13 {offsets = [256, 0], sizes = [64, 8], strides = [1, 1]} : vector<1024x8xbf16> to vector<64x8xbf16>
    %c4 = arith.constant 4 : index
    %c0_22 = arith.constant 0 : index
    %c0_23 = arith.constant 0 : index
    %36 = vector.load %arg3[%c4, %c0_22, %c0_23] : memref<16x8x16xbf16, #tpu.memory_space<vmem>>, vector<1x8x16xbf16>
    %37 = vector.shape_cast %36 : vector<1x8x16xbf16> to vector<8x16xbf16>
    %cst_24 = arith.constant dense<0.000000e+00> : vector<64x16xf32>
    %38 = tpu.matmul %35, %37, %cst_24 {dimension_numbers = #tpu.dot_dimension_numbers<[1], [0], [0], [1], [0, 0, 1, 1], [], []>} : vector<64x8xbf16>, vector<8x16xbf16>, vector<64x16xf32> -> vector<64x16xf32>
    %39 = arith.addf %34, %38 : vector<64x16xf32>
    %40 = vector.extract_strided_slice %13 {offsets = [320, 0], sizes = [64, 8], strides = [1, 1]} : vector<1024x8xbf16> to vector<64x8xbf16>
    %c5 = arith.constant 5 : index
    %c0_25 = arith.constant 0 : index
    %c0_26 = arith.constant 0 : index
    %41 = vector.load %arg3[%c5, %c0_25, %c0_26] : memref<16x8x16xbf16, #tpu.memory_space<vmem>>, vector<1x8x16xbf16>
    %42 = vector.shape_cast %41 : vector<1x8x16xbf16> to vector<8x16xbf16>
    %cst_27 = arith.constant dense<0.000000e+00> : vector<64x16xf32>
    %43 = tpu.matmul %40, %42, %cst_27 {dimension_numbers = #tpu.dot_dimension_numbers<[1], [0], [0], [1], [0, 0, 1, 1], [], []>} : vector<64x8xbf16>, vector<8x16xbf16>, vector<64x16xf32> -> vector<64x16xf32>
    %44 = arith.addf %39, %43 : vector<64x16xf32>
    %45 = vector.extract_strided_slice %13 {offsets = [384, 0], sizes = [64, 8], strides = [1, 1]} : vector<1024x8xbf16> to vector<64x8xbf16>
    %c6 = arith.constant 6 : index
    %c0_28 = arith.constant 0 : index
    %c0_29 = arith.constant 0 : index
    %46 = vector.load %arg3[%c6, %c0_28, %c0_29] : memref<16x8x16xbf16, #tpu.memory_space<vmem>>, vector<1x8x16xbf16>
    %47 = vector.shape_cast %46 : vector<1x8x16xbf16> to vector<8x16xbf16>
    %cst_30 = arith.constant dense<0.000000e+00> : vector<64x16xf32>
    %48 = tpu.matmul %45, %47, %cst_30 {dimension_numbers = #tpu.dot_dimension_numbers<[1], [0], [0], [1], [0, 0, 1, 1], [], []>} : vector<64x8xbf16>, vector<8x16xbf16>, vector<64x16xf32> -> vector<64x16xf32>
    %49 = arith.addf %44, %48 : vector<64x16xf32>
    %50 = vector.extract_strided_slice %13 {offsets = [448, 0], sizes = [64, 8], strides = [1, 1]} : vector<1024x8xbf16> to vector<64x8xbf16>
    %c7 = arith.constant 7 : index
    %c0_31 = arith.constant 0 : index
    %c0_32 = arith.constant 0 : index
    %51 = vector.load %arg3[%c7, %c0_31, %c0_32] : memref<16x8x16xbf16, #tpu.memory_space<vmem>>, vector<1x8x16xbf16>
    %52 = vector.shape_cast %51 : vector<1x8x16xbf16> to vector<8x16xbf16>
    %cst_33 = arith.constant dense<0.000000e+00> : vector<64x16xf32>
    %53 = tpu.matmul %50, %52, %cst_33 {dimension_numbers = #tpu.dot_dimension_numbers<[1], [0], [0], [1], [0, 0, 1, 1], [], []>} : vector<64x8xbf16>, vector<8x16xbf16>, vector<64x16xf32> -> vector<64x16xf32>
    %54 = arith.addf %49, %53 : vector<64x16xf32>
    %55 = vector.extract_strided_slice %13 {offsets = [512, 0], sizes = [64, 8], strides = [1, 1]} : vector<1024x8xbf16> to vector<64x8xbf16>
    %c8 = arith.constant 8 : index
    %c0_34 = arith.constant 0 : index
    %c0_35 = arith.constant 0 : index
    %56 = vector.load %arg3[%c8, %c0_34, %c0_35] : memref<16x8x16xbf16, #tpu.memory_space<vmem>>, vector<1x8x16xbf16>
    %57 = vector.shape_cast %56 : vector<1x8x16xbf16> to vector<8x16xbf16>
    %cst_36 = arith.constant dense<0.000000e+00> : vector<64x16xf32>
    %58 = tpu.matmul %55, %57, %cst_36 {dimension_numbers = #tpu.dot_dimension_numbers<[1], [0], [0], [1], [0, 0, 1, 1], [], []>} : vector<64x8xbf16>, vector<8x16xbf16>, vector<64x16xf32> -> vector<64x16xf32>
    %59 = arith.addf %54, %58 : vector<64x16xf32>
    %60 = vector.extract_strided_slice %13 {offsets = [576, 0], sizes = [64, 8], strides = [1, 1]} : vector<1024x8xbf16> to vector<64x8xbf16>
    %c9 = arith.constant 9 : index
    %c0_37 = arith.constant 0 : index
    %c0_38 = arith.constant 0 : index
    %61 = vector.load %arg3[%c9, %c0_37, %c0_38] : memref<16x8x16xbf16, #tpu.memory_space<vmem>>, vector<1x8x16xbf16>
    %62 = vector.shape_cast %61 : vector<1x8x16xbf16> to vector<8x16xbf16>
    %cst_39 = arith.constant dense<0.000000e+00> : vector<64x16xf32>
    %63 = tpu.matmul %60, %62, %cst_39 {dimension_numbers = #tpu.dot_dimension_numbers<[1], [0], [0], [1], [0, 0, 1, 1], [], []>} : vector<64x8xbf16>, vector<8x16xbf16>, vector<64x16xf32> -> vector<64x16xf32>
    %64 = arith.addf %59, %63 : vector<64x16xf32>
    %65 = vector.extract_strided_slice %13 {offsets = [640, 0], sizes = [64, 8], strides = [1, 1]} : vector<1024x8xbf16> to vector<64x8xbf16>
    %c10 = arith.constant 10 : index
    %c0_40 = arith.constant 0 : index
    %c0_41 = arith.constant 0 : index
    %66 = vector.load %arg3[%c10, %c0_40, %c0_41] : memref<16x8x16xbf16, #tpu.memory_space<vmem>>, vector<1x8x16xbf16>
    %67 = vector.shape_cast %66 : vector<1x8x16xbf16> to vector<8x16xbf16>
    %cst_42 = arith.constant dense<0.000000e+00> : vector<64x16xf32>
    %68 = tpu.matmul %65, %67, %cst_42 {dimension_numbers = #tpu.dot_dimension_numbers<[1], [0], [0], [1], [0, 0, 1, 1], [], []>} : vector<64x8xbf16>, vector<8x16xbf16>, vector<64x16xf32> -> vector<64x16xf32>
    %69 = arith.addf %64, %68 : vector<64x16xf32>
    %70 = vector.extract_strided_slice %13 {offsets = [704, 0], sizes = [64, 8], strides = [1, 1]} : vector<1024x8xbf16> to vector<64x8xbf16>
    %c11 = arith.constant 11 : index
    %c0_43 = arith.constant 0 : index
    %c0_44 = arith.constant 0 : index
    %71 = vector.load %arg3[%c11, %c0_43, %c0_44] : memref<16x8x16xbf16, #tpu.memory_space<vmem>>, vector<1x8x16xbf16>
    %72 = vector.shape_cast %71 : vector<1x8x16xbf16> to vector<8x16xbf16>
    %cst_45 = arith.constant dense<0.000000e+00> : vector<64x16xf32>
    %73 = tpu.matmul %70, %72, %cst_45 {dimension_numbers = #tpu.dot_dimension_numbers<[1], [0], [0], [1], [0, 0, 1, 1], [], []>} : vector<64x8xbf16>, vector<8x16xbf16>, vector<64x16xf32> -> vector<64x16xf32>
    %74 = arith.addf %69, %73 : vector<64x16xf32>
    %75 = vector.extract_strided_slice %13 {offsets = [768, 0], sizes = [64, 8], strides = [1, 1]} : vector<1024x8xbf16> to vector<64x8xbf16>
    %c12 = arith.constant 12 : index
    %c0_46 = arith.constant 0 : index
    %c0_47 = arith.constant 0 : index
    %76 = vector.load %arg3[%c12, %c0_46, %c0_47] : memref<16x8x16xbf16, #tpu.memory_space<vmem>>, vector<1x8x16xbf16>
    %77 = vector.shape_cast %76 : vector<1x8x16xbf16> to vector<8x16xbf16>
    %cst_48 = arith.constant dense<0.000000e+00> : vector<64x16xf32>
    %78 = tpu.matmul %75, %77, %cst_48 {dimension_numbers = #tpu.dot_dimension_numbers<[1], [0], [0], [1], [0, 0, 1, 1], [], []>} : vector<64x8xbf16>, vector<8x16xbf16>, vector<64x16xf32> -> vector<64x16xf32>
    %79 = arith.addf %74, %78 : vector<64x16xf32>
    %80 = vector.extract_strided_slice %13 {offsets = [832, 0], sizes = [64, 8], strides = [1, 1]} : vector<1024x8xbf16> to vector<64x8xbf16>
    %c13 = arith.constant 13 : index
    %c0_49 = arith.constant 0 : index
    %c0_50 = arith.constant 0 : index
    %81 = vector.load %arg3[%c13, %c0_49, %c0_50] : memref<16x8x16xbf16, #tpu.memory_space<vmem>>, vector<1x8x16xbf16>
    %82 = vector.shape_cast %81 : vector<1x8x16xbf16> to vector<8x16xbf16>
    %cst_51 = arith.constant dense<0.000000e+00> : vector<64x16xf32>
    %83 = tpu.matmul %80, %82, %cst_51 {dimension_numbers = #tpu.dot_dimension_numbers<[1], [0], [0], [1], [0, 0, 1, 1], [], []>} : vector<64x8xbf16>, vector<8x16xbf16>, vector<64x16xf32> -> vector<64x16xf32>
    %84 = arith.addf %79, %83 : vector<64x16xf32>
    %85 = vector.extract_strided_slice %13 {offsets = [896, 0], sizes = [64, 8], strides = [1, 1]} : vector<1024x8xbf16> to vector<64x8xbf16>
    %c14 = arith.constant 14 : index
    %c0_52 = arith.constant 0 : index
    %c0_53 = arith.constant 0 : index
    %86 = vector.load %arg3[%c14, %c0_52, %c0_53] : memref<16x8x16xbf16, #tpu.memory_space<vmem>>, vector<1x8x16xbf16>
    %87 = vector.shape_cast %86 : vector<1x8x16xbf16> to vector<8x16xbf16>
    %cst_54 = arith.constant dense<0.000000e+00> : vector<64x16xf32>
    %88 = tpu.matmul %85, %87, %cst_54 {dimension_numbers = #tpu.dot_dimension_numbers<[1], [0], [0], [1], [0, 0, 1, 1], [], []>} : vector<64x8xbf16>, vector<8x16xbf16>, vector<64x16xf32> -> vector<64x16xf32>
    %89 = arith.addf %84, %88 : vector<64x16xf32>
    %90 = vector.extract_strided_slice %13 {offsets = [960, 0], sizes = [64, 8], strides = [1, 1]} : vector<1024x8xbf16> to vector<64x8xbf16>
    %c15 = arith.constant 15 : index
    %c0_55 = arith.constant 0 : index
    %c0_56 = arith.constant 0 : index
    %91 = vector.load %arg3[%c15, %c0_55, %c0_56] : memref<16x8x16xbf16, #tpu.memory_space<vmem>>, vector<1x8x16xbf16>
    %92 = vector.shape_cast %91 : vector<1x8x16xbf16> to vector<8x16xbf16>
    %cst_57 = arith.constant dense<0.000000e+00> : vector<64x16xf32>
    %93 = tpu.matmul %90, %92, %cst_57 {dimension_numbers = #tpu.dot_dimension_numbers<[1], [0], [0], [1], [0, 0, 1, 1], [], []>} : vector<64x8xbf16>, vector<8x16xbf16>, vector<64x16xf32> -> vector<64x16xf32>
    %94 = arith.addf %89, %93 : vector<64x16xf32>
    %cst_58 = arith.constant 0.000000e+00 : f32
    %95 = vector.broadcast %cst_58 : f32 to vector<64x16xf32>
    %96 = arith.cmpf oge, %94, %95 : vector<64x16xf32>
    %cst_59 = arith.constant 2.000000e-01 : f32
    %97 = vector.broadcast %cst_59 : f32 to vector<64x16xf32>
    %98 = arith.mulf %97, %94 : vector<64x16xf32>
    %99 = arith.select %96, %94, %98 : vector<64x16xi1>, vector<64x16xf32>
    %100 = arith.truncf %9 : vector<256x8xf32> to vector<256x8xbf16>
    %cst_60 = arith.constant dense<0.000000e+00> : vector<1024x8xf32>
    %101 = tpu.matmul %10, %100, %cst_60 {dimension_numbers = #tpu.dot_dimension_numbers<[1], [0], [0], [1], [0, 0, 1, 1], [], []>} : vector<1024x256xbf16>, vector<256x8xbf16>, vector<1024x8xf32> -> vector<1024x8xf32>
    %102 = arith.truncf %101 : vector<1024x8xf32> to vector<1024x8xbf16>
    %cst_61 = arith.constant 0.000000e+00 : f32
    %103 = vector.broadcast %cst_61 : f32 to vector<64x16xf32>
    %104 = vector.extract_strided_slice %102 {offsets = [0, 0], sizes = [64, 8], strides = [1, 1]} : vector<1024x8xbf16> to vector<64x8xbf16>
    %c0_62 = arith.constant 0 : index
    %c0_63 = arith.constant 0 : index
    %c0_64 = arith.constant 0 : index
    %105 = vector.load %arg3[%c0_62, %c0_63, %c0_64] : memref<16x8x16xbf16, #tpu.memory_space<vmem>>, vector<1x8x16xbf16>
    %106 = vector.shape_cast %105 : vector<1x8x16xbf16> to vector<8x16xbf16>
    %cst_65 = arith.constant dense<0.000000e+00> : vector<64x16xf32>
    %107 = tpu.matmul %104, %106, %cst_65 {dimension_numbers = #tpu.dot_dimension_numbers<[1], [0], [0], [1], [0, 0, 1, 1], [], []>} : vector<64x8xbf16>, vector<8x16xbf16>, vector<64x16xf32> -> vector<64x16xf32>
    %108 = arith.addf %103, %107 : vector<64x16xf32>
    %109 = vector.extract_strided_slice %102 {offsets = [64, 0], sizes = [64, 8], strides = [1, 1]} : vector<1024x8xbf16> to vector<64x8xbf16>
    %c1_66 = arith.constant 1 : index
    %c0_67 = arith.constant 0 : index
    %c0_68 = arith.constant 0 : index
    %110 = vector.load %arg3[%c1_66, %c0_67, %c0_68] : memref<16x8x16xbf16, #tpu.memory_space<vmem>>, vector<1x8x16xbf16>
    %111 = vector.shape_cast %110 : vector<1x8x16xbf16> to vector<8x16xbf16>
    %cst_69 = arith.constant dense<0.000000e+00> : vector<64x16xf32>
    %112 = tpu.matmul %109, %111, %cst_69 {dimension_numbers = #tpu.dot_dimension_numbers<[1], [0], [0], [1], [0, 0, 1, 1], [], []>} : vector<64x8xbf16>, vector<8x16xbf16>, vector<64x16xf32> -> vector<64x16xf32>
    %113 = arith.addf %108, %112 : vector<64x16xf32>
    %114 = vector.extract_strided_slice %102 {offsets = [128, 0], sizes = [64, 8], strides = [1, 1]} : vector<1024x8xbf16> to vector<64x8xbf16>
    %c2_70 = arith.constant 2 : index
    %c0_71 = arith.constant 0 : index
    %c0_72 = arith.constant 0 : index
    %115 = vector.load %arg3[%c2_70, %c0_71, %c0_72] : memref<16x8x16xbf16, #tpu.memory_space<vmem>>, vector<1x8x16xbf16>
    %116 = vector.shape_cast %115 : vector<1x8x16xbf16> to vector<8x16xbf16>
    %cst_73 = arith.constant dense<0.000000e+00> : vector<64x16xf32>
    %117 = tpu.matmul %114, %116, %cst_73 {dimension_numbers = #tpu.dot_dimension_numbers<[1], [0], [0], [1], [0, 0, 1, 1], [], []>} : vector<64x8xbf16>, vector<8x16xbf16>, vector<64x16xf32> -> vector<64x16xf32>
    %118 = arith.addf %113, %117 : vector<64x16xf32>
    %119 = vector.extract_strided_slice %102 {offsets = [192, 0], sizes = [64, 8], strides = [1, 1]} : vector<1024x8xbf16> to vector<64x8xbf16>
    %c3_74 = arith.constant 3 : index
    %c0_75 = arith.constant 0 : index
    %c0_76 = arith.constant 0 : index
    %120 = vector.load %arg3[%c3_74, %c0_75, %c0_76] : memref<16x8x16xbf16, #tpu.memory_space<vmem>>, vector<1x8x16xbf16>
    %121 = vector.shape_cast %120 : vector<1x8x16xbf16> to vector<8x16xbf16>
    %cst_77 = arith.constant dense<0.000000e+00> : vector<64x16xf32>
    %122 = tpu.matmul %119, %121, %cst_77 {dimension_numbers = #tpu.dot_dimension_numbers<[1], [0], [0], [1], [0, 0, 1, 1], [], []>} : vector<64x8xbf16>, vector<8x16xbf16>, vector<64x16xf32> -> vector<64x16xf32>
    %123 = arith.addf %118, %122 : vector<64x16xf32>
    %124 = vector.extract_strided_slice %102 {offsets = [256, 0], sizes = [64, 8], strides = [1, 1]} : vector<1024x8xbf16> to vector<64x8xbf16>
    %c4_78 = arith.constant 4 : index
    %c0_79 = arith.constant 0 : index
    %c0_80 = arith.constant 0 : index
    %125 = vector.load %arg3[%c4_78, %c0_79, %c0_80] : memref<16x8x16xbf16, #tpu.memory_space<vmem>>, vector<1x8x16xbf16>
    %126 = vector.shape_cast %125 : vector<1x8x16xbf16> to vector<8x16xbf16>
    %cst_81 = arith.constant dense<0.000000e+00> : vector<64x16xf32>
    %127 = tpu.matmul %124, %126, %cst_81 {dimension_numbers = #tpu.dot_dimension_numbers<[1], [0], [0], [1], [0, 0, 1, 1], [], []>} : vector<64x8xbf16>, vector<8x16xbf16>, vector<64x16xf32> -> vector<64x16xf32>
    %128 = arith.addf %123, %127 : vector<64x16xf32>
    %129 = vector.extract_strided_slice %102 {offsets = [320, 0], sizes = [64, 8], strides = [1, 1]} : vector<1024x8xbf16> to vector<64x8xbf16>
    %c5_82 = arith.constant 5 : index
    %c0_83 = arith.constant 0 : index
    %c0_84 = arith.constant 0 : index
    %130 = vector.load %arg3[%c5_82, %c0_83, %c0_84] : memref<16x8x16xbf16, #tpu.memory_space<vmem>>, vector<1x8x16xbf16>
    %131 = vector.shape_cast %130 : vector<1x8x16xbf16> to vector<8x16xbf16>
    %cst_85 = arith.constant dense<0.000000e+00> : vector<64x16xf32>
    %132 = tpu.matmul %129, %131, %cst_85 {dimension_numbers = #tpu.dot_dimension_numbers<[1], [0], [0], [1], [0, 0, 1, 1], [], []>} : vector<64x8xbf16>, vector<8x16xbf16>, vector<64x16xf32> -> vector<64x16xf32>
    %133 = arith.addf %128, %132 : vector<64x16xf32>
    %134 = vector.extract_strided_slice %102 {offsets = [384, 0], sizes = [64, 8], strides = [1, 1]} : vector<1024x8xbf16> to vector<64x8xbf16>
    %c6_86 = arith.constant 6 : index
    %c0_87 = arith.constant 0 : index
    %c0_88 = arith.constant 0 : index
    %135 = vector.load %arg3[%c6_86, %c0_87, %c0_88] : memref<16x8x16xbf16, #tpu.memory_space<vmem>>, vector<1x8x16xbf16>
    %136 = vector.shape_cast %135 : vector<1x8x16xbf16> to vector<8x16xbf16>
    %cst_89 = arith.constant dense<0.000000e+00> : vector<64x16xf32>
    %137 = tpu.matmul %134, %136, %cst_89 {dimension_numbers = #tpu.dot_dimension_numbers<[1], [0], [0], [1], [0, 0, 1, 1], [], []>} : vector<64x8xbf16>, vector<8x16xbf16>, vector<64x16xf32> -> vector<64x16xf32>
    %138 = arith.addf %133, %137 : vector<64x16xf32>
    %139 = vector.extract_strided_slice %102 {offsets = [448, 0], sizes = [64, 8], strides = [1, 1]} : vector<1024x8xbf16> to vector<64x8xbf16>
    %c7_90 = arith.constant 7 : index
    %c0_91 = arith.constant 0 : index
    %c0_92 = arith.constant 0 : index
    %140 = vector.load %arg3[%c7_90, %c0_91, %c0_92] : memref<16x8x16xbf16, #tpu.memory_space<vmem>>, vector<1x8x16xbf16>
    %141 = vector.shape_cast %140 : vector<1x8x16xbf16> to vector<8x16xbf16>
    %cst_93 = arith.constant dense<0.000000e+00> : vector<64x16xf32>
    %142 = tpu.matmul %139, %141, %cst_93 {dimension_numbers = #tpu.dot_dimension_numbers<[1], [0], [0], [1], [0, 0, 1, 1], [], []>} : vector<64x8xbf16>, vector<8x16xbf16>, vector<64x16xf32> -> vector<64x16xf32>
    %143 = arith.addf %138, %142 : vector<64x16xf32>
    %144 = vector.extract_strided_slice %102 {offsets = [512, 0], sizes = [64, 8], strides = [1, 1]} : vector<1024x8xbf16> to vector<64x8xbf16>
    %c8_94 = arith.constant 8 : index
    %c0_95 = arith.constant 0 : index
    %c0_96 = arith.constant 0 : index
    %145 = vector.load %arg3[%c8_94, %c0_95, %c0_96] : memref<16x8x16xbf16, #tpu.memory_space<vmem>>, vector<1x8x16xbf16>
    %146 = vector.shape_cast %145 : vector<1x8x16xbf16> to vector<8x16xbf16>
    %cst_97 = arith.constant dense<0.000000e+00> : vector<64x16xf32>
    %147 = tpu.matmul %144, %146, %cst_97 {dimension_numbers = #tpu.dot_dimension_numbers<[1], [0], [0], [1], [0, 0, 1, 1], [], []>} : vector<64x8xbf16>, vector<8x16xbf16>, vector<64x16xf32> -> vector<64x16xf32>
    %148 = arith.addf %143, %147 : vector<64x16xf32>
    %149 = vector.extract_strided_slice %102 {offsets = [576, 0], sizes = [64, 8], strides = [1, 1]} : vector<1024x8xbf16> to vector<64x8xbf16>
    %c9_98 = arith.constant 9 : index
    %c0_99 = arith.constant 0 : index
    %c0_100 = arith.constant 0 : index
    %150 = vector.load %arg3[%c9_98, %c0_99, %c0_100] : memref<16x8x16xbf16, #tpu.memory_space<vmem>>, vector<1x8x16xbf16>
    %151 = vector.shape_cast %150 : vector<1x8x16xbf16> to vector<8x16xbf16>
    %cst_101 = arith.constant dense<0.000000e+00> : vector<64x16xf32>
    %152 = tpu.matmul %149, %151, %cst_101 {dimension_numbers = #tpu.dot_dimension_numbers<[1], [0], [0], [1], [0, 0, 1, 1], [], []>} : vector<64x8xbf16>, vector<8x16xbf16>, vector<64x16xf32> -> vector<64x16xf32>
    %153 = arith.addf %148, %152 : vector<64x16xf32>
    %154 = vector.extract_strided_slice %102 {offsets = [640, 0], sizes = [64, 8], strides = [1, 1]} : vector<1024x8xbf16> to vector<64x8xbf16>
    %c10_102 = arith.constant 10 : index
    %c0_103 = arith.constant 0 : index
    %c0_104 = arith.constant 0 : index
    %155 = vector.load %arg3[%c10_102, %c0_103, %c0_104] : memref<16x8x16xbf16, #tpu.memory_space<vmem>>, vector<1x8x16xbf16>
    %156 = vector.shape_cast %155 : vector<1x8x16xbf16> to vector<8x16xbf16>
    %cst_105 = arith.constant dense<0.000000e+00> : vector<64x16xf32>
    %157 = tpu.matmul %154, %156, %cst_105 {dimension_numbers = #tpu.dot_dimension_numbers<[1], [0], [0], [1], [0, 0, 1, 1], [], []>} : vector<64x8xbf16>, vector<8x16xbf16>, vector<64x16xf32> -> vector<64x16xf32>
    %158 = arith.addf %153, %157 : vector<64x16xf32>
    %159 = vector.extract_strided_slice %102 {offsets = [704, 0], sizes = [64, 8], strides = [1, 1]} : vector<1024x8xbf16> to vector<64x8xbf16>
    %c11_106 = arith.constant 11 : index
    %c0_107 = arith.constant 0 : index
    %c0_108 = arith.constant 0 : index
    %160 = vector.load %arg3[%c11_106, %c0_107, %c0_108] : memref<16x8x16xbf16, #tpu.memory_space<vmem>>, vector<1x8x16xbf16>
    %161 = vector.shape_cast %160 : vector<1x8x16xbf16> to vector<8x16xbf16>
    %cst_109 = arith.constant dense<0.000000e+00> : vector<64x16xf32>
    %162 = tpu.matmul %159, %161, %cst_109 {dimension_numbers = #tpu.dot_dimension_numbers<[1], [0], [0], [1], [0, 0, 1, 1], [], []>} : vector<64x8xbf16>, vector<8x16xbf16>, vector<64x16xf32> -> vector<64x16xf32>
    %163 = arith.addf %158, %162 : vector<64x16xf32>
    %164 = vector.extract_strided_slice %102 {offsets = [768, 0], sizes = [64, 8], strides = [1, 1]} : vector<1024x8xbf16> to vector<64x8xbf16>
    %c12_110 = arith.constant 12 : index
    %c0_111 = arith.constant 0 : index
    %c0_112 = arith.constant 0 : index
    %165 = vector.load %arg3[%c12_110, %c0_111, %c0_112] : memref<16x8x16xbf16, #tpu.memory_space<vmem>>, vector<1x8x16xbf16>
    %166 = vector.shape_cast %165 : vector<1x8x16xbf16> to vector<8x16xbf16>
    %cst_113 = arith.constant dense<0.000000e+00> : vector<64x16xf32>
    %167 = tpu.matmul %164, %166, %cst_113 {dimension_numbers = #tpu.dot_dimension_numbers<[1], [0], [0], [1], [0, 0, 1, 1], [], []>} : vector<64x8xbf16>, vector<8x16xbf16>, vector<64x16xf32> -> vector<64x16xf32>
    %168 = arith.addf %163, %167 : vector<64x16xf32>
    %169 = vector.extract_strided_slice %102 {offsets = [832, 0], sizes = [64, 8], strides = [1, 1]} : vector<1024x8xbf16> to vector<64x8xbf16>
    %c13_114 = arith.constant 13 : index
    %c0_115 = arith.constant 0 : index
    %c0_116 = arith.constant 0 : index
    %170 = vector.load %arg3[%c13_114, %c0_115, %c0_116] : memref<16x8x16xbf16, #tpu.memory_space<vmem>>, vector<1x8x16xbf16>
    %171 = vector.shape_cast %170 : vector<1x8x16xbf16> to vector<8x16xbf16>
    %cst_117 = arith.constant dense<0.000000e+00> : vector<64x16xf32>
    %172 = tpu.matmul %169, %171, %cst_117 {dimension_numbers = #tpu.dot_dimension_numbers<[1], [0], [0], [1], [0, 0, 1, 1], [], []>} : vector<64x8xbf16>, vector<8x16xbf16>, vector<64x16xf32> -> vector<64x16xf32>
    %173 = arith.addf %168, %172 : vector<64x16xf32>
    %174 = vector.extract_strided_slice %102 {offsets = [896, 0], sizes = [64, 8], strides = [1, 1]} : vector<1024x8xbf16> to vector<64x8xbf16>
    %c14_118 = arith.constant 14 : index
    %c0_119 = arith.constant 0 : index
    %c0_120 = arith.constant 0 : index
    %175 = vector.load %arg3[%c14_118, %c0_119, %c0_120] : memref<16x8x16xbf16, #tpu.memory_space<vmem>>, vector<1x8x16xbf16>
    %176 = vector.shape_cast %175 : vector<1x8x16xbf16> to vector<8x16xbf16>
    %cst_121 = arith.constant dense<0.000000e+00> : vector<64x16xf32>
    %177 = tpu.matmul %174, %176, %cst_121 {dimension_numbers = #tpu.dot_dimension_numbers<[1], [0], [0], [1], [0, 0, 1, 1], [], []>} : vector<64x8xbf16>, vector<8x16xbf16>, vector<64x16xf32> -> vector<64x16xf32>
    %178 = arith.addf %173, %177 : vector<64x16xf32>
    %179 = vector.extract_strided_slice %102 {offsets = [960, 0], sizes = [64, 8], strides = [1, 1]} : vector<1024x8xbf16> to vector<64x8xbf16>
    %c15_122 = arith.constant 15 : index
    %c0_123 = arith.constant 0 : index
    %c0_124 = arith.constant 0 : index
    %180 = vector.load %arg3[%c15_122, %c0_123, %c0_124] : memref<16x8x16xbf16, #tpu.memory_space<vmem>>, vector<1x8x16xbf16>
    %181 = vector.shape_cast %180 : vector<1x8x16xbf16> to vector<8x16xbf16>
    %cst_125 = arith.constant dense<0.000000e+00> : vector<64x16xf32>
    %182 = tpu.matmul %179, %181, %cst_125 {dimension_numbers = #tpu.dot_dimension_numbers<[1], [0], [0], [1], [0, 0, 1, 1], [], []>} : vector<64x8xbf16>, vector<8x16xbf16>, vector<64x16xf32> -> vector<64x16xf32>
    %183 = arith.addf %178, %182 : vector<64x16xf32>
    %cst_126 = arith.constant 0.000000e+00 : f32
    %184 = vector.broadcast %cst_126 : f32 to vector<64x16xf32>
    %185 = arith.cmpf oge, %183, %184 : vector<64x16xf32>
    %cst_127 = arith.constant 2.000000e-01 : f32
    %186 = vector.broadcast %cst_127 : f32 to vector<64x16xf32>
    %187 = arith.mulf %186, %183 : vector<64x16xf32>
    %188 = arith.select %185, %183, %187 : vector<64x16xi1>, vector<64x16xf32>
    %cst_128 = arith.constant 0.000000e+00 : f32
    %189 = vector.broadcast %cst_128 : f32 to vector<1x16xf32>
    %cst_129 = arith.constant dense<0.000000e+00> : vector<16xf32>
    %190 = vector.multi_reduction <add>, %99, %cst_129 [0] : vector<64x16xf32> to vector<16xf32>
    %191 = vector.shape_cast %190 : vector<16xf32> to vector<1x16xf32>
    %192 = arith.addf %189, %191 : vector<1x16xf32>
    %cst_130 = arith.constant dense<0.000000e+00> : vector<16xf32>
    %193 = vector.multi_reduction <add>, %188, %cst_130 [0] : vector<64x16xf32> to vector<16xf32>
    %194 = vector.shape_cast %193 : vector<16xf32> to vector<1x16xf32>
    %195 = arith.addf %192, %194 : vector<1x16xf32>
    %cst_131 = arith.constant 1.280000e+02 : f32
    %196 = vector.broadcast %cst_131 : f32 to vector<1x16xf32>
    %197 = arith.divf %195, %196 : vector<1x16xf32>
    %cst_132 = arith.constant 0.000000e+00 : f32
    %198 = vector.broadcast %cst_132 : f32 to vector<1x16xf32>
    %199 = vector.broadcast %197 : vector<1x16xf32> to vector<64x16xf32>
    %200 = arith.subf %99, %199 : vector<64x16xf32>
    %201 = arith.mulf %200, %200 : vector<64x16xf32>
    %cst_133 = arith.constant dense<0.000000e+00> : vector<16xf32>
    %202 = vector.multi_reduction <add>, %201, %cst_133 [0] : vector<64x16xf32> to vector<16xf32>
    %203 = vector.shape_cast %202 : vector<16xf32> to vector<1x16xf32>
    %204 = arith.addf %198, %203 : vector<1x16xf32>
    %205 = vector.broadcast %197 : vector<1x16xf32> to vector<64x16xf32>
    %206 = arith.subf %188, %205 : vector<64x16xf32>
    %207 = arith.mulf %206, %206 : vector<64x16xf32>
    %cst_134 = arith.constant dense<0.000000e+00> : vector<16xf32>
    %208 = vector.multi_reduction <add>, %207, %cst_134 [0] : vector<64x16xf32> to vector<16xf32>
    %209 = vector.shape_cast %208 : vector<16xf32> to vector<1x16xf32>
    %210 = arith.addf %204, %209 : vector<1x16xf32>
    %cst_135 = arith.constant 1.280000e+02 : f32
    %211 = vector.broadcast %cst_135 : f32 to vector<1x16xf32>
    %212 = arith.divf %210, %211 : vector<1x16xf32>
    %c0_136 = arith.constant 0 : index
    %c0_137 = arith.constant 0 : index
    %213 = vector.load %arg4[%c0_136, %c0_137] : memref<1x16xf32, #tpu.memory_space<vmem>>, vector<1x16xf32>
    %cst_138 = arith.constant 9.99999974E-6 : f32
    %214 = vector.broadcast %cst_138 : f32 to vector<1x16xf32>
    %215 = arith.addf %212, %214 : vector<1x16xf32>
    %216 = math.rsqrt %215 : vector<1x16xf32>
    %217 = arith.mulf %213, %216 : vector<1x16xf32>
    %c0_139 = arith.constant 0 : index
    %c0_140 = arith.constant 0 : index
    %218 = vector.load %arg5[%c0_139, %c0_140] : memref<1x16xf32, #tpu.memory_space<vmem>>, vector<1x16xf32>
    %219 = arith.mulf %197, %217 : vector<1x16xf32>
    %220 = arith.subf %218, %219 : vector<1x16xf32>
    %221 = vector.broadcast %217 : vector<1x16xf32> to vector<64x16xf32>
    %222 = arith.mulf %99, %221 : vector<64x16xf32>
    %223 = vector.broadcast %220 : vector<1x16xf32> to vector<64x16xf32>
    %224 = arith.addf %222, %223 : vector<64x16xf32>
    %225 = vector.broadcast %217 : vector<1x16xf32> to vector<64x16xf32>
    %226 = arith.mulf %188, %225 : vector<64x16xf32>
    %227 = vector.broadcast %220 : vector<1x16xf32> to vector<64x16xf32>
    %228 = arith.addf %226, %227 : vector<64x16xf32>
    %c0_141 = arith.constant 0 : index
    %c0_142 = arith.constant 0 : index
    %229 = vector.load %arg6[%c0_141, %c0_142] : memref<256x64xbf16, #tpu.memory_space<vmem>>, vector<256x64xbf16>
    %230 = arith.truncf %224 : vector<64x16xf32> to vector<64x16xbf16>
    %cst_143 = arith.constant dense<0.000000e+00> : vector<256x16xf32>
    %231 = tpu.matmul %229, %230, %cst_143 {dimension_numbers = #tpu.dot_dimension_numbers<[1], [0], [0], [1], [0, 0, 1, 1], [], []>} : vector<256x64xbf16>, vector<64x16xbf16>, vector<256x16xf32> -> vector<256x16xf32>
    %232 = arith.truncf %231 : vector<256x16xf32> to vector<256x16xbf16>
    %cst_144 = arith.constant 0.000000e+00 : f32
    %233 = vector.broadcast %cst_144 : f32 to vector<16x64xf32>
    %234 = vector.extract_strided_slice %232 {offsets = [0, 0], sizes = [16, 16], strides = [1, 1]} : vector<256x16xbf16> to vector<16x16xbf16>
    %c0_145 = arith.constant 0 : index
    %c0_146 = arith.constant 0 : index
    %c0_147 = arith.constant 0 : index
    %235 = vector.load %arg7[%c0_145, %c0_146, %c0_147] : memref<16x16x64xbf16, #tpu.memory_space<vmem>>, vector<1x16x64xbf16>
    %236 = vector.shape_cast %235 : vector<1x16x64xbf16> to vector<16x64xbf16>
    %cst_148 = arith.constant dense<0.000000e+00> : vector<16x64xf32>
    %237 = tpu.matmul %234, %236, %cst_148 {dimension_numbers = #tpu.dot_dimension_numbers<[1], [0], [0], [1], [0, 0, 1, 1], [], []>} : vector<16x16xbf16>, vector<16x64xbf16>, vector<16x64xf32> -> vector<16x64xf32>
    %238 = arith.addf %233, %237 : vector<16x64xf32>
    %239 = vector.extract_strided_slice %232 {offsets = [16, 0], sizes = [16, 16], strides = [1, 1]} : vector<256x16xbf16> to vector<16x16xbf16>
    %c1_149 = arith.constant 1 : index
    %c0_150 = arith.constant 0 : index
    %c0_151 = arith.constant 0 : index
    %240 = vector.load %arg7[%c1_149, %c0_150, %c0_151] : memref<16x16x64xbf16, #tpu.memory_space<vmem>>, vector<1x16x64xbf16>
    %241 = vector.shape_cast %240 : vector<1x16x64xbf16> to vector<16x64xbf16>
    %cst_152 = arith.constant dense<0.000000e+00> : vector<16x64xf32>
    %242 = tpu.matmul %239, %241, %cst_152 {dimension_numbers = #tpu.dot_dimension_numbers<[1], [0], [0], [1], [0, 0, 1, 1], [], []>} : vector<16x16xbf16>, vector<16x64xbf16>, vector<16x64xf32> -> vector<16x64xf32>
    %243 = arith.addf %238, %242 : vector<16x64xf32>
    %244 = vector.extract_strided_slice %232 {offsets = [32, 0], sizes = [16, 16], strides = [1, 1]} : vector<256x16xbf16> to vector<16x16xbf16>
    %c2_153 = arith.constant 2 : index
    %c0_154 = arith.constant 0 : index
    %c0_155 = arith.constant 0 : index
    %245 = vector.load %arg7[%c2_153, %c0_154, %c0_155] : memref<16x16x64xbf16, #tpu.memory_space<vmem>>, vector<1x16x64xbf16>
    %246 = vector.shape_cast %245 : vector<1x16x64xbf16> to vector<16x64xbf16>
    %cst_156 = arith.constant dense<0.000000e+00> : vector<16x64xf32>
    %247 = tpu.matmul %244, %246, %cst_156 {dimension_numbers = #tpu.dot_dimension_numbers<[1], [0], [0], [1], [0, 0, 1, 1], [], []>} : vector<16x16xbf16>, vector<16x64xbf16>, vector<16x64xf32> -> vector<16x64xf32>
    %248 = arith.addf %243, %247 : vector<16x64xf32>
    %249 = vector.extract_strided_slice %232 {offsets = [48, 0], sizes = [16, 16], strides = [1, 1]} : vector<256x16xbf16> to vector<16x16xbf16>
    %c3_157 = arith.constant 3 : index
    %c0_158 = arith.constant 0 : index
    %c0_159 = arith.constant 0 : index
    %250 = vector.load %arg7[%c3_157, %c0_158, %c0_159] : memref<16x16x64xbf16, #tpu.memory_space<vmem>>, vector<1x16x64xbf16>
    %251 = vector.shape_cast %250 : vector<1x16x64xbf16> to vector<16x64xbf16>
    %cst_160 = arith.constant dense<0.000000e+00> : vector<16x64xf32>
    %252 = tpu.matmul %249, %251, %cst_160 {dimension_numbers = #tpu.dot_dimension_numbers<[1], [0], [0], [1], [0, 0, 1, 1], [], []>} : vector<16x16xbf16>, vector<16x64xbf16>, vector<16x64xf32> -> vector<16x64xf32>
    %253 = arith.addf %248, %252 : vector<16x64xf32>
    %254 = vector.extract_strided_slice %232 {offsets = [64, 0], sizes = [16, 16], strides = [1, 1]} : vector<256x16xbf16> to vector<16x16xbf16>
    %c4_161 = arith.constant 4 : index
    %c0_162 = arith.constant 0 : index
    %c0_163 = arith.constant 0 : index
    %255 = vector.load %arg7[%c4_161, %c0_162, %c0_163] : memref<16x16x64xbf16, #tpu.memory_space<vmem>>, vector<1x16x64xbf16>
    %256 = vector.shape_cast %255 : vector<1x16x64xbf16> to vector<16x64xbf16>
    %cst_164 = arith.constant dense<0.000000e+00> : vector<16x64xf32>
    %257 = tpu.matmul %254, %256, %cst_164 {dimension_numbers = #tpu.dot_dimension_numbers<[1], [0], [0], [1], [0, 0, 1, 1], [], []>} : vector<16x16xbf16>, vector<16x64xbf16>, vector<16x64xf32> -> vector<16x64xf32>
    %258 = arith.addf %253, %257 : vector<16x64xf32>
    %259 = vector.extract_strided_slice %232 {offsets = [80, 0], sizes = [16, 16], strides = [1, 1]} : vector<256x16xbf16> to vector<16x16xbf16>
    %c5_165 = arith.constant 5 : index
    %c0_166 = arith.constant 0 : index
    %c0_167 = arith.constant 0 : index
    %260 = vector.load %arg7[%c5_165, %c0_166, %c0_167] : memref<16x16x64xbf16, #tpu.memory_space<vmem>>, vector<1x16x64xbf16>
    %261 = vector.shape_cast %260 : vector<1x16x64xbf16> to vector<16x64xbf16>
    %cst_168 = arith.constant dense<0.000000e+00> : vector<16x64xf32>
    %262 = tpu.matmul %259, %261, %cst_168 {dimension_numbers = #tpu.dot_dimension_numbers<[1], [0], [0], [1], [0, 0, 1, 1], [], []>} : vector<16x16xbf16>, vector<16x64xbf16>, vector<16x64xf32> -> vector<16x64xf32>
    %263 = arith.addf %258, %262 : vector<16x64xf32>
    %264 = vector.extract_strided_slice %232 {offsets = [96, 0], sizes = [16, 16], strides = [1, 1]} : vector<256x16xbf16> to vector<16x16xbf16>
    %c6_169 = arith.constant 6 : index
    %c0_170 = arith.constant 0 : index
    %c0_171 = arith.constant 0 : index
    %265 = vector.load %arg7[%c6_169, %c0_170, %c0_171] : memref<16x16x64xbf16, #tpu.memory_space<vmem>>, vector<1x16x64xbf16>
    %266 = vector.shape_cast %265 : vector<1x16x64xbf16> to vector<16x64xbf16>
    %cst_172 = arith.constant dense<0.000000e+00> : vector<16x64xf32>
    %267 = tpu.matmul %264, %266, %cst_172 {dimension_numbers = #tpu.dot_dimension_numbers<[1], [0], [0], [1], [0, 0, 1, 1], [], []>} : vector<16x16xbf16>, vector<16x64xbf16>, vector<16x64xf32> -> vector<16x64xf32>
    %268 = arith.addf %263, %267 : vector<16x64xf32>
    %269 = vector.extract_strided_slice %232 {offsets = [112, 0], sizes = [16, 16], strides = [1, 1]} : vector<256x16xbf16> to vector<16x16xbf16>
    %c7_173 = arith.constant 7 : index
    %c0_174 = arith.constant 0 : index
    %c0_175 = arith.constant 0 : index
    %270 = vector.load %arg7[%c7_173, %c0_174, %c0_175] : memref<16x16x64xbf16, #tpu.memory_space<vmem>>, vector<1x16x64xbf16>
    %271 = vector.shape_cast %270 : vector<1x16x64xbf16> to vector<16x64xbf16>
    %cst_176 = arith.constant dense<0.000000e+00> : vector<16x64xf32>
    %272 = tpu.matmul %269, %271, %cst_176 {dimension_numbers = #tpu.dot_dimension_numbers<[1], [0], [0], [1], [0, 0, 1, 1], [], []>} : vector<16x16xbf16>, vector<16x64xbf16>, vector<16x64xf32> -> vector<16x64xf32>
    %273 = arith.addf %268, %272 : vector<16x64xf32>
    %274 = vector.extract_strided_slice %232 {offsets = [128, 0], sizes = [16, 16], strides = [1, 1]} : vector<256x16xbf16> to vector<16x16xbf16>
    %c8_177 = arith.constant 8 : index
    %c0_178 = arith.constant 0 : index
    %c0_179 = arith.constant 0 : index
    %275 = vector.load %arg7[%c8_177, %c0_178, %c0_179] : memref<16x16x64xbf16, #tpu.memory_space<vmem>>, vector<1x16x64xbf16>
    %276 = vector.shape_cast %275 : vector<1x16x64xbf16> to vector<16x64xbf16>
    %cst_180 = arith.constant dense<0.000000e+00> : vector<16x64xf32>
    %277 = tpu.matmul %274, %276, %cst_180 {dimension_numbers = #tpu.dot_dimension_numbers<[1], [0], [0], [1], [0, 0, 1, 1], [], []>} : vector<16x16xbf16>, vector<16x64xbf16>, vector<16x64xf32> -> vector<16x64xf32>
    %278 = arith.addf %273, %277 : vector<16x64xf32>
    %279 = vector.extract_strided_slice %232 {offsets = [144, 0], sizes = [16, 16], strides = [1, 1]} : vector<256x16xbf16> to vector<16x16xbf16>
    %c9_181 = arith.constant 9 : index
    %c0_182 = arith.constant 0 : index
    %c0_183 = arith.constant 0 : index
    %280 = vector.load %arg7[%c9_181, %c0_182, %c0_183] : memref<16x16x64xbf16, #tpu.memory_space<vmem>>, vector<1x16x64xbf16>
    %281 = vector.shape_cast %280 : vector<1x16x64xbf16> to vector<16x64xbf16>
    %cst_184 = arith.constant dense<0.000000e+00> : vector<16x64xf32>
    %282 = tpu.matmul %279, %281, %cst_184 {dimension_numbers = #tpu.dot_dimension_numbers<[1], [0], [0], [1], [0, 0, 1, 1], [], []>} : vector<16x16xbf16>, vector<16x64xbf16>, vector<16x64xf32> -> vector<16x64xf32>
    %283 = arith.addf %278, %282 : vector<16x64xf32>
    %284 = vector.extract_strided_slice %232 {offsets = [160, 0], sizes = [16, 16], strides = [1, 1]} : vector<256x16xbf16> to vector<16x16xbf16>
    %c10_185 = arith.constant 10 : index
    %c0_186 = arith.constant 0 : index
    %c0_187 = arith.constant 0 : index
    %285 = vector.load %arg7[%c10_185, %c0_186, %c0_187] : memref<16x16x64xbf16, #tpu.memory_space<vmem>>, vector<1x16x64xbf16>
    %286 = vector.shape_cast %285 : vector<1x16x64xbf16> to vector<16x64xbf16>
    %cst_188 = arith.constant dense<0.000000e+00> : vector<16x64xf32>
    %287 = tpu.matmul %284, %286, %cst_188 {dimension_numbers = #tpu.dot_dimension_numbers<[1], [0], [0], [1], [0, 0, 1, 1], [], []>} : vector<16x16xbf16>, vector<16x64xbf16>, vector<16x64xf32> -> vector<16x64xf32>
    %288 = arith.addf %283, %287 : vector<16x64xf32>
    %289 = vector.extract_strided_slice %232 {offsets = [176, 0], sizes = [16, 16], strides = [1, 1]} : vector<256x16xbf16> to vector<16x16xbf16>
    %c11_189 = arith.constant 11 : index
    %c0_190 = arith.constant 0 : index
    %c0_191 = arith.constant 0 : index
    %290 = vector.load %arg7[%c11_189, %c0_190, %c0_191] : memref<16x16x64xbf16, #tpu.memory_space<vmem>>, vector<1x16x64xbf16>
    %291 = vector.shape_cast %290 : vector<1x16x64xbf16> to vector<16x64xbf16>
    %cst_192 = arith.constant dense<0.000000e+00> : vector<16x64xf32>
    %292 = tpu.matmul %289, %291, %cst_192 {dimension_numbers = #tpu.dot_dimension_numbers<[1], [0], [0], [1], [0, 0, 1, 1], [], []>} : vector<16x16xbf16>, vector<16x64xbf16>, vector<16x64xf32> -> vector<16x64xf32>
    %293 = arith.addf %288, %292 : vector<16x64xf32>
    %294 = vector.extract_strided_slice %232 {offsets = [192, 0], sizes = [16, 16], strides = [1, 1]} : vector<256x16xbf16> to vector<16x16xbf16>
    %c12_193 = arith.constant 12 : index
    %c0_194 = arith.constant 0 : index
    %c0_195 = arith.constant 0 : index
    %295 = vector.load %arg7[%c12_193, %c0_194, %c0_195] : memref<16x16x64xbf16, #tpu.memory_space<vmem>>, vector<1x16x64xbf16>
    %296 = vector.shape_cast %295 : vector<1x16x64xbf16> to vector<16x64xbf16>
    %cst_196 = arith.constant dense<0.000000e+00> : vector<16x64xf32>
    %297 = tpu.matmul %294, %296, %cst_196 {dimension_numbers = #tpu.dot_dimension_numbers<[1], [0], [0], [1], [0, 0, 1, 1], [], []>} : vector<16x16xbf16>, vector<16x64xbf16>, vector<16x64xf32> -> vector<16x64xf32>
    %298 = arith.addf %293, %297 : vector<16x64xf32>
    %299 = vector.extract_strided_slice %232 {offsets = [208, 0], sizes = [16, 16], strides = [1, 1]} : vector<256x16xbf16> to vector<16x16xbf16>
    %c13_197 = arith.constant 13 : index
    %c0_198 = arith.constant 0 : index
    %c0_199 = arith.constant 0 : index
    %300 = vector.load %arg7[%c13_197, %c0_198, %c0_199] : memref<16x16x64xbf16, #tpu.memory_space<vmem>>, vector<1x16x64xbf16>
    %301 = vector.shape_cast %300 : vector<1x16x64xbf16> to vector<16x64xbf16>
    %cst_200 = arith.constant dense<0.000000e+00> : vector<16x64xf32>
    %302 = tpu.matmul %299, %301, %cst_200 {dimension_numbers = #tpu.dot_dimension_numbers<[1], [0], [0], [1], [0, 0, 1, 1], [], []>} : vector<16x16xbf16>, vector<16x64xbf16>, vector<16x64xf32> -> vector<16x64xf32>
    %303 = arith.addf %298, %302 : vector<16x64xf32>
    %304 = vector.extract_strided_slice %232 {offsets = [224, 0], sizes = [16, 16], strides = [1, 1]} : vector<256x16xbf16> to vector<16x16xbf16>
    %c14_201 = arith.constant 14 : index
    %c0_202 = arith.constant 0 : index
    %c0_203 = arith.constant 0 : index
    %305 = vector.load %arg7[%c14_201, %c0_202, %c0_203] : memref<16x16x64xbf16, #tpu.memory_space<vmem>>, vector<1x16x64xbf16>
    %306 = vector.shape_cast %305 : vector<1x16x64xbf16> to vector<16x64xbf16>
    %cst_204 = arith.constant dense<0.000000e+00> : vector<16x64xf32>
    %307 = tpu.matmul %304, %306, %cst_204 {dimension_numbers = #tpu.dot_dimension_numbers<[1], [0], [0], [1], [0, 0, 1, 1], [], []>} : vector<16x16xbf16>, vector<16x64xbf16>, vector<16x64xf32> -> vector<16x64xf32>
    %308 = arith.addf %303, %307 : vector<16x64xf32>
    %309 = vector.extract_strided_slice %232 {offsets = [240, 0], sizes = [16, 16], strides = [1, 1]} : vector<256x16xbf16> to vector<16x16xbf16>
    %c15_205 = arith.constant 15 : index
    %c0_206 = arith.constant 0 : index
    %c0_207 = arith.constant 0 : index
    %310 = vector.load %arg7[%c15_205, %c0_206, %c0_207] : memref<16x16x64xbf16, #tpu.memory_space<vmem>>, vector<1x16x64xbf16>
    %311 = vector.shape_cast %310 : vector<1x16x64xbf16> to vector<16x64xbf16>
    %cst_208 = arith.constant dense<0.000000e+00> : vector<16x64xf32>
    %312 = tpu.matmul %309, %311, %cst_208 {dimension_numbers = #tpu.dot_dimension_numbers<[1], [0], [0], [1], [0, 0, 1, 1], [], []>} : vector<16x16xbf16>, vector<16x64xbf16>, vector<16x64xf32> -> vector<16x64xf32>
    %313 = arith.addf %308, %312 : vector<16x64xf32>
    %cst_209 = arith.constant 0.000000e+00 : f32
    %314 = vector.broadcast %cst_209 : f32 to vector<16x64xf32>
    %315 = arith.cmpf oge, %313, %314 : vector<16x64xf32>
    %cst_210 = arith.constant 2.000000e-01 : f32
    %316 = vector.broadcast %cst_210 : f32 to vector<16x64xf32>
    %317 = arith.mulf %316, %313 : vector<16x64xf32>
    %318 = arith.select %315, %313, %317 : vector<16x64xi1>, vector<16x64xf32>
    %319 = arith.truncf %228 : vector<64x16xf32> to vector<64x16xbf16>
    %cst_211 = arith.constant dense<0.000000e+00> : vector<256x16xf32>
    %320 = tpu.matmul %229, %319, %cst_211 {dimension_numbers = #tpu.dot_dimension_numbers<[1], [0], [0], [1], [0, 0, 1, 1], [], []>} : vector<256x64xbf16>, vector<64x16xbf16>, vector<256x16xf32> -> vector<256x16xf32>
    %321 = arith.truncf %320 : vector<256x16xf32> to vector<256x16xbf16>
    %cst_212 = arith.constant 0.000000e+00 : f32
    %322 = vector.broadcast %cst_212 : f32 to vector<16x64xf32>
    %323 = vector.extract_strided_slice %321 {offsets = [0, 0], sizes = [16, 16], strides = [1, 1]} : vector<256x16xbf16> to vector<16x16xbf16>
    %c0_213 = arith.constant 0 : index
    %c0_214 = arith.constant 0 : index
    %c0_215 = arith.constant 0 : index
    %324 = vector.load %arg7[%c0_213, %c0_214, %c0_215] : memref<16x16x64xbf16, #tpu.memory_space<vmem>>, vector<1x16x64xbf16>
    %325 = vector.shape_cast %324 : vector<1x16x64xbf16> to vector<16x64xbf16>
    %cst_216 = arith.constant dense<0.000000e+00> : vector<16x64xf32>
    %326 = tpu.matmul %323, %325, %cst_216 {dimension_numbers = #tpu.dot_dimension_numbers<[1], [0], [0], [1], [0, 0, 1, 1], [], []>} : vector<16x16xbf16>, vector<16x64xbf16>, vector<16x64xf32> -> vector<16x64xf32>
    %327 = arith.addf %322, %326 : vector<16x64xf32>
    %328 = vector.extract_strided_slice %321 {offsets = [16, 0], sizes = [16, 16], strides = [1, 1]} : vector<256x16xbf16> to vector<16x16xbf16>
    %c1_217 = arith.constant 1 : index
    %c0_218 = arith.constant 0 : index
    %c0_219 = arith.constant 0 : index
    %329 = vector.load %arg7[%c1_217, %c0_218, %c0_219] : memref<16x16x64xbf16, #tpu.memory_space<vmem>>, vector<1x16x64xbf16>
    %330 = vector.shape_cast %329 : vector<1x16x64xbf16> to vector<16x64xbf16>
    %cst_220 = arith.constant dense<0.000000e+00> : vector<16x64xf32>
    %331 = tpu.matmul %328, %330, %cst_220 {dimension_numbers = #tpu.dot_dimension_numbers<[1], [0], [0], [1], [0, 0, 1, 1], [], []>} : vector<16x16xbf16>, vector<16x64xbf16>, vector<16x64xf32> -> vector<16x64xf32>
    %332 = arith.addf %327, %331 : vector<16x64xf32>
    %333 = vector.extract_strided_slice %321 {offsets = [32, 0], sizes = [16, 16], strides = [1, 1]} : vector<256x16xbf16> to vector<16x16xbf16>
    %c2_221 = arith.constant 2 : index
    %c0_222 = arith.constant 0 : index
    %c0_223 = arith.constant 0 : index
    %334 = vector.load %arg7[%c2_221, %c0_222, %c0_223] : memref<16x16x64xbf16, #tpu.memory_space<vmem>>, vector<1x16x64xbf16>
    %335 = vector.shape_cast %334 : vector<1x16x64xbf16> to vector<16x64xbf16>
    %cst_224 = arith.constant dense<0.000000e+00> : vector<16x64xf32>
    %336 = tpu.matmul %333, %335, %cst_224 {dimension_numbers = #tpu.dot_dimension_numbers<[1], [0], [0], [1], [0, 0, 1, 1], [], []>} : vector<16x16xbf16>, vector<16x64xbf16>, vector<16x64xf32> -> vector<16x64xf32>
    %337 = arith.addf %332, %336 : vector<16x64xf32>
    %338 = vector.extract_strided_slice %321 {offsets = [48, 0], sizes = [16, 16], strides = [1, 1]} : vector<256x16xbf16> to vector<16x16xbf16>
    %c3_225 = arith.constant 3 : index
    %c0_226 = arith.constant 0 : index
    %c0_227 = arith.constant 0 : index
    %339 = vector.load %arg7[%c3_225, %c0_226, %c0_227] : memref<16x16x64xbf16, #tpu.memory_space<vmem>>, vector<1x16x64xbf16>
    %340 = vector.shape_cast %339 : vector<1x16x64xbf16> to vector<16x64xbf16>
    %cst_228 = arith.constant dense<0.000000e+00> : vector<16x64xf32>
    %341 = tpu.matmul %338, %340, %cst_228 {dimension_numbers = #tpu.dot_dimension_numbers<[1], [0], [0], [1], [0, 0, 1, 1], [], []>} : vector<16x16xbf16>, vector<16x64xbf16>, vector<16x64xf32> -> vector<16x64xf32>
    %342 = arith.addf %337, %341 : vector<16x64xf32>
    %343 = vector.extract_strided_slice %321 {offsets = [64, 0], sizes = [16, 16], strides = [1, 1]} : vector<256x16xbf16> to vector<16x16xbf16>
    %c4_229 = arith.constant 4 : index
    %c0_230 = arith.constant 0 : index
    %c0_231 = arith.constant 0 : index
    %344 = vector.load %arg7[%c4_229, %c0_230, %c0_231] : memref<16x16x64xbf16, #tpu.memory_space<vmem>>, vector<1x16x64xbf16>
    %345 = vector.shape_cast %344 : vector<1x16x64xbf16> to vector<16x64xbf16>
    %cst_232 = arith.constant dense<0.000000e+00> : vector<16x64xf32>
    %346 = tpu.matmul %343, %345, %cst_232 {dimension_numbers = #tpu.dot_dimension_numbers<[1], [0], [0], [1], [0, 0, 1, 1], [], []>} : vector<16x16xbf16>, vector<16x64xbf16>, vector<16x64xf32> -> vector<16x64xf32>
    %347 = arith.addf %342, %346 : vector<16x64xf32>
    %348 = vector.extract_strided_slice %321 {offsets = [80, 0], sizes = [16, 16], strides = [1, 1]} : vector<256x16xbf16> to vector<16x16xbf16>
    %c5_233 = arith.constant 5 : index
    %c0_234 = arith.constant 0 : index
    %c0_235 = arith.constant 0 : index
    %349 = vector.load %arg7[%c5_233, %c0_234, %c0_235] : memref<16x16x64xbf16, #tpu.memory_space<vmem>>, vector<1x16x64xbf16>
    %350 = vector.shape_cast %349 : vector<1x16x64xbf16> to vector<16x64xbf16>
    %cst_236 = arith.constant dense<0.000000e+00> : vector<16x64xf32>
    %351 = tpu.matmul %348, %350, %cst_236 {dimension_numbers = #tpu.dot_dimension_numbers<[1], [0], [0], [1], [0, 0, 1, 1], [], []>} : vector<16x16xbf16>, vector<16x64xbf16>, vector<16x64xf32> -> vector<16x64xf32>
    %352 = arith.addf %347, %351 : vector<16x64xf32>
    %353 = vector.extract_strided_slice %321 {offsets = [96, 0], sizes = [16, 16], strides = [1, 1]} : vector<256x16xbf16> to vector<16x16xbf16>
    %c6_237 = arith.constant 6 : index
    %c0_238 = arith.constant 0 : index
    %c0_239 = arith.constant 0 : index
    %354 = vector.load %arg7[%c6_237, %c0_238, %c0_239] : memref<16x16x64xbf16, #tpu.memory_space<vmem>>, vector<1x16x64xbf16>
    %355 = vector.shape_cast %354 : vector<1x16x64xbf16> to vector<16x64xbf16>
    %cst_240 = arith.constant dense<0.000000e+00> : vector<16x64xf32>
    %356 = tpu.matmul %353, %355, %cst_240 {dimension_numbers = #tpu.dot_dimension_numbers<[1], [0], [0], [1], [0, 0, 1, 1], [], []>} : vector<16x16xbf16>, vector<16x64xbf16>, vector<16x64xf32> -> vector<16x64xf32>
    %357 = arith.addf %352, %356 : vector<16x64xf32>
    %358 = vector.extract_strided_slice %321 {offsets = [112, 0], sizes = [16, 16], strides = [1, 1]} : vector<256x16xbf16> to vector<16x16xbf16>
    %c7_241 = arith.constant 7 : index
    %c0_242 = arith.constant 0 : index
    %c0_243 = arith.constant 0 : index
    %359 = vector.load %arg7[%c7_241, %c0_242, %c0_243] : memref<16x16x64xbf16, #tpu.memory_space<vmem>>, vector<1x16x64xbf16>
    %360 = vector.shape_cast %359 : vector<1x16x64xbf16> to vector<16x64xbf16>
    %cst_244 = arith.constant dense<0.000000e+00> : vector<16x64xf32>
    %361 = tpu.matmul %358, %360, %cst_244 {dimension_numbers = #tpu.dot_dimension_numbers<[1], [0], [0], [1], [0, 0, 1, 1], [], []>} : vector<16x16xbf16>, vector<16x64xbf16>, vector<16x64xf32> -> vector<16x64xf32>
    %362 = arith.addf %357, %361 : vector<16x64xf32>
    %363 = vector.extract_strided_slice %321 {offsets = [128, 0], sizes = [16, 16], strides = [1, 1]} : vector<256x16xbf16> to vector<16x16xbf16>
    %c8_245 = arith.constant 8 : index
    %c0_246 = arith.constant 0 : index
    %c0_247 = arith.constant 0 : index
    %364 = vector.load %arg7[%c8_245, %c0_246, %c0_247] : memref<16x16x64xbf16, #tpu.memory_space<vmem>>, vector<1x16x64xbf16>
    %365 = vector.shape_cast %364 : vector<1x16x64xbf16> to vector<16x64xbf16>
    %cst_248 = arith.constant dense<0.000000e+00> : vector<16x64xf32>
    %366 = tpu.matmul %363, %365, %cst_248 {dimension_numbers = #tpu.dot_dimension_numbers<[1], [0], [0], [1], [0, 0, 1, 1], [], []>} : vector<16x16xbf16>, vector<16x64xbf16>, vector<16x64xf32> -> vector<16x64xf32>
    %367 = arith.addf %362, %366 : vector<16x64xf32>
    %368 = vector.extract_strided_slice %321 {offsets = [144, 0], sizes = [16, 16], strides = [1, 1]} : vector<256x16xbf16> to vector<16x16xbf16>
    %c9_249 = arith.constant 9 : index
    %c0_250 = arith.constant 0 : index
    %c0_251 = arith.constant 0 : index
    %369 = vector.load %arg7[%c9_249, %c0_250, %c0_251] : memref<16x16x64xbf16, #tpu.memory_space<vmem>>, vector<1x16x64xbf16>
    %370 = vector.shape_cast %369 : vector<1x16x64xbf16> to vector<16x64xbf16>
    %cst_252 = arith.constant dense<0.000000e+00> : vector<16x64xf32>
    %371 = tpu.matmul %368, %370, %cst_252 {dimension_numbers = #tpu.dot_dimension_numbers<[1], [0], [0], [1], [0, 0, 1, 1], [], []>} : vector<16x16xbf16>, vector<16x64xbf16>, vector<16x64xf32> -> vector<16x64xf32>
    %372 = arith.addf %367, %371 : vector<16x64xf32>
    %373 = vector.extract_strided_slice %321 {offsets = [160, 0], sizes = [16, 16], strides = [1, 1]} : vector<256x16xbf16> to vector<16x16xbf16>
    %c10_253 = arith.constant 10 : index
    %c0_254 = arith.constant 0 : index
    %c0_255 = arith.constant 0 : index
    %374 = vector.load %arg7[%c10_253, %c0_254, %c0_255] : memref<16x16x64xbf16, #tpu.memory_space<vmem>>, vector<1x16x64xbf16>
    %375 = vector.shape_cast %374 : vector<1x16x64xbf16> to vector<16x64xbf16>
    %cst_256 = arith.constant dense<0.000000e+00> : vector<16x64xf32>
    %376 = tpu.matmul %373, %375, %cst_256 {dimension_numbers = #tpu.dot_dimension_numbers<[1], [0], [0], [1], [0, 0, 1, 1], [], []>} : vector<16x16xbf16>, vector<16x64xbf16>, vector<16x64xf32> -> vector<16x64xf32>
    %377 = arith.addf %372, %376 : vector<16x64xf32>
    %378 = vector.extract_strided_slice %321 {offsets = [176, 0], sizes = [16, 16], strides = [1, 1]} : vector<256x16xbf16> to vector<16x16xbf16>
    %c11_257 = arith.constant 11 : index
    %c0_258 = arith.constant 0 : index
    %c0_259 = arith.constant 0 : index
    %379 = vector.load %arg7[%c11_257, %c0_258, %c0_259] : memref<16x16x64xbf16, #tpu.memory_space<vmem>>, vector<1x16x64xbf16>
    %380 = vector.shape_cast %379 : vector<1x16x64xbf16> to vector<16x64xbf16>
    %cst_260 = arith.constant dense<0.000000e+00> : vector<16x64xf32>
    %381 = tpu.matmul %378, %380, %cst_260 {dimension_numbers = #tpu.dot_dimension_numbers<[1], [0], [0], [1], [0, 0, 1, 1], [], []>} : vector<16x16xbf16>, vector<16x64xbf16>, vector<16x64xf32> -> vector<16x64xf32>
    %382 = arith.addf %377, %381 : vector<16x64xf32>
    %383 = vector.extract_strided_slice %321 {offsets = [192, 0], sizes = [16, 16], strides = [1, 1]} : vector<256x16xbf16> to vector<16x16xbf16>
    %c12_261 = arith.constant 12 : index
    %c0_262 = arith.constant 0 : index
    %c0_263 = arith.constant 0 : index
    %384 = vector.load %arg7[%c12_261, %c0_262, %c0_263] : memref<16x16x64xbf16, #tpu.memory_space<vmem>>, vector<1x16x64xbf16>
    %385 = vector.shape_cast %384 : vector<1x16x64xbf16> to vector<16x64xbf16>
    %cst_264 = arith.constant dense<0.000000e+00> : vector<16x64xf32>
    %386 = tpu.matmul %383, %385, %cst_264 {dimension_numbers = #tpu.dot_dimension_numbers<[1], [0], [0], [1], [0, 0, 1, 1], [], []>} : vector<16x16xbf16>, vector<16x64xbf16>, vector<16x64xf32> -> vector<16x64xf32>
    %387 = arith.addf %382, %386 : vector<16x64xf32>
    %388 = vector.extract_strided_slice %321 {offsets = [208, 0], sizes = [16, 16], strides = [1, 1]} : vector<256x16xbf16> to vector<16x16xbf16>
    %c13_265 = arith.constant 13 : index
    %c0_266 = arith.constant 0 : index
    %c0_267 = arith.constant 0 : index
    %389 = vector.load %arg7[%c13_265, %c0_266, %c0_267] : memref<16x16x64xbf16, #tpu.memory_space<vmem>>, vector<1x16x64xbf16>
    %390 = vector.shape_cast %389 : vector<1x16x64xbf16> to vector<16x64xbf16>
    %cst_268 = arith.constant dense<0.000000e+00> : vector<16x64xf32>
    %391 = tpu.matmul %388, %390, %cst_268 {dimension_numbers = #tpu.dot_dimension_numbers<[1], [0], [0], [1], [0, 0, 1, 1], [], []>} : vector<16x16xbf16>, vector<16x64xbf16>, vector<16x64xf32> -> vector<16x64xf32>
    %392 = arith.addf %387, %391 : vector<16x64xf32>
    %393 = vector.extract_strided_slice %321 {offsets = [224, 0], sizes = [16, 16], strides = [1, 1]} : vector<256x16xbf16> to vector<16x16xbf16>
    %c14_269 = arith.constant 14 : index
    %c0_270 = arith.constant 0 : index
    %c0_271 = arith.constant 0 : index
    %394 = vector.load %arg7[%c14_269, %c0_270, %c0_271] : memref<16x16x64xbf16, #tpu.memory_space<vmem>>, vector<1x16x64xbf16>
    %395 = vector.shape_cast %394 : vector<1x16x64xbf16> to vector<16x64xbf16>
    %cst_272 = arith.constant dense<0.000000e+00> : vector<16x64xf32>
    %396 = tpu.matmul %393, %395, %cst_272 {dimension_numbers = #tpu.dot_dimension_numbers<[1], [0], [0], [1], [0, 0, 1, 1], [], []>} : vector<16x16xbf16>, vector<16x64xbf16>, vector<16x64xf32> -> vector<16x64xf32>
    %397 = arith.addf %392, %396 : vector<16x64xf32>
    %398 = vector.extract_strided_slice %321 {offsets = [240, 0], sizes = [16, 16], strides = [1, 1]} : vector<256x16xbf16> to vector<16x16xbf16>
    %c15_273 = arith.constant 15 : index
    %c0_274 = arith.constant 0 : index
    %c0_275 = arith.constant 0 : index
    %399 = vector.load %arg7[%c15_273, %c0_274, %c0_275] : memref<16x16x64xbf16, #tpu.memory_space<vmem>>, vector<1x16x64xbf16>
    %400 = vector.shape_cast %399 : vector<1x16x64xbf16> to vector<16x64xbf16>
    %cst_276 = arith.constant dense<0.000000e+00> : vector<16x64xf32>
    %401 = tpu.matmul %398, %400, %cst_276 {dimension_numbers = #tpu.dot_dimension_numbers<[1], [0], [0], [1], [0, 0, 1, 1], [], []>} : vector<16x16xbf16>, vector<16x64xbf16>, vector<16x64xf32> -> vector<16x64xf32>
    %402 = arith.addf %397, %401 : vector<16x64xf32>
    %cst_277 = arith.constant 0.000000e+00 : f32
    %403 = vector.broadcast %cst_277 : f32 to vector<16x64xf32>
    %404 = arith.cmpf oge, %402, %403 : vector<16x64xf32>
    %cst_278 = arith.constant 2.000000e-01 : f32
    %405 = vector.broadcast %cst_278 : f32 to vector<16x64xf32>
    %406 = arith.mulf %405, %402 : vector<16x64xf32>
    %407 = arith.select %404, %402, %406 : vector<16x64xi1>, vector<16x64xf32>
    %cst_279 = arith.constant 0.000000e+00 : f32
    %408 = vector.broadcast %cst_279 : f32 to vector<1x64xf32>
    %cst_280 = arith.constant dense<0.000000e+00> : vector<64xf32>
    %409 = vector.multi_reduction <add>, %318, %cst_280 [0] : vector<16x64xf32> to vector<64xf32>
    %410 = vector.shape_cast %409 : vector<64xf32> to vector<1x64xf32>
    %411 = arith.addf %408, %410 : vector<1x64xf32>
    %cst_281 = arith.constant dense<0.000000e+00> : vector<64xf32>
    %412 = vector.multi_reduction <add>, %407, %cst_281 [0] : vector<16x64xf32> to vector<64xf32>
    %413 = vector.shape_cast %412 : vector<64xf32> to vector<1x64xf32>
    %414 = arith.addf %411, %413 : vector<1x64xf32>
    %cst_282 = arith.constant 3.200000e+01 : f32
    %415 = vector.broadcast %cst_282 : f32 to vector<1x64xf32>
    %416 = arith.divf %414, %415 : vector<1x64xf32>
    %cst_283 = arith.constant 0.000000e+00 : f32
    %417 = vector.broadcast %cst_283 : f32 to vector<1x64xf32>
    %418 = vector.broadcast %416 : vector<1x64xf32> to vector<16x64xf32>
    %419 = arith.subf %318, %418 : vector<16x64xf32>
    %420 = arith.mulf %419, %419 : vector<16x64xf32>
    %cst_284 = arith.constant dense<0.000000e+00> : vector<64xf32>
    %421 = vector.multi_reduction <add>, %420, %cst_284 [0] : vector<16x64xf32> to vector<64xf32>
    %422 = vector.shape_cast %421 : vector<64xf32> to vector<1x64xf32>
    %423 = arith.addf %417, %422 : vector<1x64xf32>
    %424 = vector.broadcast %416 : vector<1x64xf32> to vector<16x64xf32>
    %425 = arith.subf %407, %424 : vector<16x64xf32>
    %426 = arith.mulf %425, %425 : vector<16x64xf32>
    %cst_285 = arith.constant dense<0.000000e+00> : vector<64xf32>
    %427 = vector.multi_reduction <add>, %426, %cst_285 [0] : vector<16x64xf32> to vector<64xf32>
    %428 = vector.shape_cast %427 : vector<64xf32> to vector<1x64xf32>
    %429 = arith.addf %423, %428 : vector<1x64xf32>
    %cst_286 = arith.constant 3.200000e+01 : f32
    %430 = vector.broadcast %cst_286 : f32 to vector<1x64xf32>
    %431 = arith.divf %429, %430 : vector<1x64xf32>
    %c0_287 = arith.constant 0 : index
    %c0_288 = arith.constant 0 : index
    %432 = vector.load %arg8[%c0_287, %c0_288] : memref<1x64xf32, #tpu.memory_space<vmem>>, vector<1x64xf32>
    %cst_289 = arith.constant 9.99999974E-6 : f32
    %433 = vector.broadcast %cst_289 : f32 to vector<1x64xf32>
    %434 = arith.addf %431, %433 : vector<1x64xf32>
    %435 = math.rsqrt %434 : vector<1x64xf32>
    %436 = arith.mulf %432, %435 : vector<1x64xf32>
    %c0_290 = arith.constant 0 : index
    %c0_291 = arith.constant 0 : index
    %437 = vector.load %arg9[%c0_290, %c0_291] : memref<1x64xf32, #tpu.memory_space<vmem>>, vector<1x64xf32>
    %438 = arith.mulf %416, %436 : vector<1x64xf32>
    %439 = arith.subf %437, %438 : vector<1x64xf32>
    %440 = vector.broadcast %436 : vector<1x64xf32> to vector<16x64xf32>
    %441 = arith.mulf %318, %440 : vector<16x64xf32>
    %442 = vector.broadcast %439 : vector<1x64xf32> to vector<16x64xf32>
    %443 = arith.addf %441, %442 : vector<16x64xf32>
    %444 = vector.broadcast %436 : vector<1x64xf32> to vector<16x64xf32>
    %445 = arith.mulf %407, %444 : vector<16x64xf32>
    %446 = vector.broadcast %439 : vector<1x64xf32> to vector<16x64xf32>
    %447 = arith.addf %445, %446 : vector<16x64xf32>
    %c0_292 = arith.constant 0 : index
    %c0_293 = arith.constant 0 : index
    %448 = vector.load %arg10[%c0_292, %c0_293] : memref<16x64xf32, #tpu.memory_space<vmem>>, vector<16x64xf32>
    %c0_294 = arith.constant 0 : index
    %c0_295 = arith.constant 0 : index
    %449 = vector.load %arg11[%c0_294, %c0_295] : memref<1x1xf32, #tpu.memory_space<vmem>>, vector<1x1xf32>
    %450 = arith.mulf %443, %448 : vector<16x64xf32>
    %cst_296 = arith.constant dense<0.000000e+00> : vector<64xf32>
    %451 = vector.multi_reduction <add>, %450, %cst_296 [0] : vector<16x64xf32> to vector<64xf32>
    %452 = vector.shape_cast %451 : vector<64xf32> to vector<1x64xf32>
    %cst_297 = arith.constant dense<0.000000e+00> : vector<1xf32>
    %453 = vector.multi_reduction <add>, %452, %cst_297 [1] : vector<1x64xf32> to vector<1xf32>
    %454 = vector.shape_cast %453 : vector<1xf32> to vector<1x1xf32>
    %455 = arith.addf %454, %449 : vector<1x1xf32>
    %456 = vector.shape_cast %455 : vector<1x1xf32> to vector<1x1xf32>
    %457 = vector.broadcast %456 : vector<1x1xf32> to vector<1x128xf32>
    %458 = arith.negf %457 : vector<1x128xf32>
    %459 = math.exp %458 : vector<1x128xf32>
    %cst_298 = arith.constant 1.000000e+00 : f32
    %460 = vector.broadcast %cst_298 : f32 to vector<1x128xf32>
    %461 = arith.addf %460, %459 : vector<1x128xf32>
    %462 = arith.divf %460, %461 : vector<1x128xf32>
    %c0_299 = arith.constant 0 : index
    %c0_300 = arith.constant 0 : index
    %463 = vector.load %arg12[%c0_299, %c0_300] : memref<2x128xf32, #tpu.memory_space<vmem>>, vector<1x128xf32>
    tpu.vector_store %arg12[%c0_299, %c0_300], %462 {strides = array<i32>} : memref<2x128xf32, #tpu.memory_space<vmem>>, vector<1x128xf32>,
    %464 = arith.mulf %447, %448 : vector<16x64xf32>
    %cst_301 = arith.constant dense<0.000000e+00> : vector<64xf32>
    %465 = vector.multi_reduction <add>, %464, %cst_301 [0] : vector<16x64xf32> to vector<64xf32>
    %466 = vector.shape_cast %465 : vector<64xf32> to vector<1x64xf32>
    %cst_302 = arith.constant dense<0.000000e+00> : vector<1xf32>
    %467 = vector.multi_reduction <add>, %466, %cst_302 [1] : vector<1x64xf32> to vector<1xf32>
    %468 = vector.shape_cast %467 : vector<1xf32> to vector<1x1xf32>
    %469 = arith.addf %468, %449 : vector<1x1xf32>
    %470 = vector.shape_cast %469 : vector<1x1xf32> to vector<1x1xf32>
    %471 = vector.broadcast %470 : vector<1x1xf32> to vector<1x128xf32>
    %472 = arith.negf %471 : vector<1x128xf32>
    %473 = math.exp %472 : vector<1x128xf32>
    %cst_303 = arith.constant 1.000000e+00 : f32
    %474 = vector.broadcast %cst_303 : f32 to vector<1x128xf32>
    %475 = arith.addf %474, %473 : vector<1x128xf32>
    %476 = arith.divf %474, %475 : vector<1x128xf32>
    %c1_304 = arith.constant 1 : index
    %c0_305 = arith.constant 0 : index
    %477 = vector.load %arg12[%c1_304, %c0_305] : memref<2x128xf32, #tpu.memory_space<vmem>>, vector<1x128xf32>
    tpu.vector_store %arg12[%c1_304, %c0_305], %476 {strides = array<i32>} : memref<2x128xf32, #tpu.memory_space<vmem>>, vector<1x128xf32>,
    return
  }
}

</mosaic_0001>

<bundles_post_ra>
// kernel: discriminator_forward.1
= control target key start
LH: loop header
LB: loop body
LE: loop exit
PB: predicated region body
PF: predicated region fallthrough
CT: control target
= control target key end

     0   :  { %v12924_v26 = vmov 0   ;;  %s12911_s1 = inlined_call_operand.vmem [shape: bf16[128,8], index: 1, kind: input, shape index: {}]   ;;  %s12912_s0 = inlined_call_operand.vmem [shape: bf16[512,128], index: 0, kind: input, shape index: {}]   ;;  %s12913_s2 = inlined_call_operand.vmem [shape: bf16[1024,256], index: 2, kind: input, shape index: {}]   ;;  %s12914_s3 = inlined_call_operand.vmem [shape: bf16[16,8,16], index: 3, kind: input, shape index: {}]   ;;  %s12915_s6 = inlined_call_operand.vmem [shape: bf16[256,64], index: 6, kind: input, shape index: {}]   ;;  %s12916_s4 = inlined_call_operand.vmem [shape: f32[1,16], index: 4, kind: input, shape index: {}]   ;;  %s12917_s5 = inlined_call_operand.vmem [shape: f32[1,16], index: 5, kind: input, shape index: {}]   ;;  %s12918_s7 = inlined_call_operand.vmem [shape: bf16[16,16,64], index: 7, kind: input, shape index: {}]   ;;  %s12919_s11 = inlined_call_operand.<no memory space> [shape: f32[1,1], index: 11, kind: input, shape index: {}]   ;;  %s12920_s8 = inlined_call_operand.vmem [shape: f32[1,64], index: 8, kind: input, shape index: {}]   ;;  %s12921_s9 = inlined_call_operand.vmem [shape: f32[1,64], index: 9, kind: input, shape index: {}]   ;;  %s12922_s10 = inlined_call_operand.vmem [shape: f32[16,64], index: 10, kind: input, shape index: {}]   ;;  %s12923_s12 = inlined_call_operand.vmem [shape: f32[2,128], index: 12, kind: output, shape index: {}]  }
   0x1   :  { %v9988_v0 = vld [vmem:[%s12911_s1] sm:$0xff]   ;;  %v9989_v1 = vld [vmem:[%s12911_s1 + $0x8] sm:$0xff]   ;;  %v9990_v2 = vld [vmem:[%s12911_s1 + $0x10] sm:$0xff]   ;;  %9559 = vmatprep.subr.bf16.mxu1 %v12924_v26  ;;  %9986 = vset.pattern.permute.xlu1 %v12924_v26 }
   0x2   :  { %8887 = vmatprep.subr.bf16.mxu0 %v9988_v0  ;;  %v9991_v3 = vld [vmem:[%s12911_s1 + $0x18] sm:$0xff]   ;;  %v9996_v4 = vld [vmem:[%s12912_s0] sm:$0xff]   ;;  %v9993_v6 = vld [vmem:[%s12911_s1 + $0x28] sm:$0xff]   ;;  %9987 = vset.pattern.permute.xlu0 %v12924_v26 }
   0x3   :  { %8888 = vmatpush3.bf16.msra.mxu0 %v9988_v0  ;;  %8903 = vmatprep.mubr.bf16.mxu0 %v9996_v4  ;;  %v9992_v5 = vld [vmem:[%s12911_s1 + $0x20] sm:$0xff]   ;;  %v9994_v7 = vld [vmem:[%s12911_s1 + $0x30] sm:$0xff]   ;;  %v9995_v8 = vld [vmem:[%s12911_s1 + $0x38] sm:$0xff]  }
   0x4   :  { %8889 = vmatprep.subr.bf16.mxu0 %v9989_v1  ;;  %v9997_v9 = vld [vmem:[%s12912_s0 + $0x8] sm:$0xff]   ;;  %v9998_v10 = vld [vmem:[%s12912_s0 + $0x10] sm:$0xff]   ;;  %v9999_v11 = vld [vmem:[%s12912_s0 + $0x18] sm:$0xff]  }
   0x5   :  { %v10000_v12 = vld [vmem:[%s12912_s0 + $0x20] sm:$0xff]   ;;  %v10001_v13 = vld [vmem:[%s12912_s0 + $0x28] sm:$0xff]   ;;  %v10002_v14 = vld [vmem:[%s12912_s0 + $0x30] sm:$0xff]  }
   0x6   :  { %v10003_v15 = vld [vmem:[%s12912_s0 + $0x38] sm:$0xff]   ;;  %v10004_v16 = vld [vmem:[%s12912_s0 + $0x40] sm:$0xff]   ;;  %v10005_v17 = vld [vmem:[%s12912_s0 + $0x48] sm:$0xff]  }
   0x7   :  { %8890 = vmatpush3.bf16.msra.mxu0 %v9989_v1  ;;  %v10006_v18 = vld [vmem:[%s12912_s0 + $0x50] sm:$0xff]   ;;  %v10007_v19 = vld [vmem:[%s12912_s0 + $0x58] sm:$0xff]   ;;  %v10008_v20 = vld [vmem:[%s12912_s0 + $0x60] sm:$0xff]  }
   0x8   :  { %8891 = vmatprep.subr.bf16.mxu0 %v9990_v2  ;;  %v10009_v21 = vld [vmem:[%s12912_s0 + $0x68] sm:$0xff]   ;;  %v10010_v22 = vld [vmem:[%s12912_s0 + $0x70] sm:$0xff]   ;;  %v10011_v23 = vld [vmem:[%s12912_s0 + $0x78] sm:$0xff]  }
   0x9   :  { %v10012_v24 = vld [vmem:[%s12912_s0 + $0x80] sm:$0xff]   ;;  %v10013_v25 = vld [vmem:[%s12912_s0 + $0x88] sm:$0xff]   ;;  %v10014_v27 = vld [vmem:[%s12912_s0 + $0x90] sm:$0xff]  }
   0xa   :  { %v10015_v28 = vld [vmem:[%s12912_s0 + $0x98] sm:$0xff]   ;;  %v10016_v29 = vld [vmem:[%s12912_s0 + $0xa0] sm:$0xff]   ;;  %v10017_v30 = vld [vmem:[%s12912_s0 + $0xa8] sm:$0xff]  }
   0xb   :  { %8892 = vmatpush3.bf16.msra.mxu0 %v9990_v2  ;;  %v10018_v31 = vld [vmem:[%s12912_s0 + $0xb0] sm:$0xff]   ;;  %v10019_v32 = vld [vmem:[%s12912_s0 + $0xb8] sm:$0xff]   ;;  %v10020_v33 = vld [vmem:[%s12912_s0 + $0xc0] sm:$0xff]  }
   0xc   :  { %8893 = vmatprep.subr.bf16.mxu0 %v9991_v3  ;;  %v10021_v34 = vld [vmem:[%s12912_s0 + $0xc8] sm:$0xff]   ;;  %v10022_v35 = vld [vmem:[%s12912_s0 + $0xd0] sm:$0xff]   ;;  %v10023_v36 = vld [vmem:[%s12912_s0 + $0xd8] sm:$0xff]  }
   0xd   :  { %v10024_v37 = vld [vmem:[%s12912_s0 + $0xe0] sm:$0xff]   ;;  %v10025_v38 = vld [vmem:[%s12912_s0 + $0xe8] sm:$0xff]   ;;  %v10026_v39 = vld [vmem:[%s12912_s0 + $0xf0] sm:$0xff]  }
   0xe   :  { %v10027_v40 = vld [vmem:[%s12912_s0 + $0xf8] sm:$0xff]   ;;  %v10030_v41 = vld [vmem:[%s12913_s2 + $0x4] ss:$8 sps:$4 sm:$0xff]  }
   0xf   :  { %8894 = vmatpush3.bf16.msra.mxu0 %v9991_v3  ;;  %v10033_v42 = vld [vmem:[%s12913_s2 + $0x74] ss:$8 sps:$4 sm:$0xff]  }
  0x10   :  { %8895 = vmatprep.subr.bf16.mxu0 %v9992_v5  ;;  %1717 = vmatprep.mubr.bf16.mxu1 %v10033_v42 }
  0x13   :  { %8896 = vmatpush3.bf16.msra.mxu0 %v9992_v5 }
  0x14   :  { %8897 = vmatprep.subr.bf16.mxu0 %v9993_v6 }
  0x17   :  { %8898 = vmatpush3.bf16.msra.mxu0 %v9993_v6 }
  0x18   :  { %8899 = vmatprep.subr.bf16.mxu0 %v9994_v7 }
  0x1b   :  { %8900 = vmatpush3.bf16.msra.mxu0 %v9994_v7 }
  0x1c   :  { %8901 = vmatprep.subr.bf16.mxu0 %v9995_v8 }
  0x1f   :  { %8902 = vmatpush3.bf16.msra.mxu0 %v9995_v8 }
  0x20   :  { %1629 = vmatprep.subr.bf16.mxu0 %v12924_v26 }
  0x22   :  { %8904 = vmatmul.mubr.bf16.vlgmr.msra.gmra.mrb[0].mxu0 %v9997_v9 }
  0x23   :  { %8907 = vmatprep.mubr.bf16.mxu0 %v9998_v10 }
  0x2a   :  { %8908 = vmatmul.mubr.bf16.gmra.mrb[4].mxu0 %v9999_v11 }
  0x2b   :  { %8911 = vmatprep.mubr.bf16.mxu0 %v10000_v12 }
  0x32   :  { %8912 = vmatmul.mubr.bf16.gmra.mrb[8].mxu0 %v10001_v13 }
  0x33   :  { %8915 = vmatprep.mubr.bf16.mxu0 %v10002_v14 }
  0x3a   :  { %8916 = vmatmul.mubr.bf16.gmra.mrb[12].mxu0 %v10003_v15 }
  0x3b   :  { %8919 = vmatprep.mubr.bf16.mxu0 %v10004_v16 }
  0x42   :  { %8920 = vmatmul.mubr.bf16.gmra.mrb[16].mxu0 %v10005_v17 }
  0x43   :  { %8923 = vmatprep.mubr.bf16.mxu0 %v10006_v18 }
  0x4a   :  { %8924 = vmatmul.mubr.bf16.gmra.mrb[20].mxu0 %v10007_v19 }
  0x4b   :  { %8927 = vmatprep.mubr.bf16.mxu0 %v10008_v20 }
  0x52   :  { %8928 = vmatmul.mubr.bf16.gmra.mrb[24].mxu0 %v10009_v21 }
  0x53   :  { %8931 = vmatprep.mubr.bf16.mxu0 %v10010_v22 }
  0x5a   :  { %8932 = vmatmul.mubr.bf16.gmra.mrb[28].mxu0 %v10011_v23 }
  0x5b   :  { %8935 = vmatprep.mubr.bf16.mxu0 %v10012_v24 }
  0x62   :  { %8936 = vmatmul.mubr.bf16.gmra.mrb[32].mxu0 %v10013_v25 }
  0x63   :  { %8939 = vmatprep.mubr.bf16.mxu0 %v10014_v27 }
  0x6a   :  { %8940 = vmatmul.mubr.bf16.gmra.mrb[36].mxu0 %v10015_v28 }
  0x6b   :  { %8943 = vmatprep.mubr.bf16.mxu0 %v10016_v29 }
  0x72   :  { %8944 = vmatmul.mubr.bf16.gmra.mrb[40].mxu0 %v10017_v30 }
  0x73   :  { %8947 = vmatprep.mubr.bf16.mxu0 %v10018_v31 }
  0x7a   :  { %8948 = vmatmul.mubr.bf16.gmra.mrb[44].mxu0 %v10019_v32 }
  0x7b   :  { %8951 = vmatprep.mubr.bf16.mxu0 %v10020_v33 }
  0x82   :  { %8952 = vmatmul.mubr.bf16.gmra.mrb[48].mxu0 %v10021_v34 }
  0x83   :  { %8955 = vmatprep.mubr.bf16.mxu0 %v10022_v35 }
  0x8a   :  { %8956 = vmatmul.mubr.bf16.gmra.mrb[52].mxu0 %v10023_v36 }
  0x8b   :  { %8959 = vmatprep.mubr.bf16.mxu0 %v10024_v37 }
  0x92   :  { %8960 = vmatmul.mubr.bf16.gmra.mrb[56].mxu0 %v10025_v38 }
  0x93   :  { %8963 = vmatprep.mubr.bf16.mxu0 %v10026_v39 }
  0x9a   :  { %8964 = vmatmul.mubr.bf16.gmra.mrb[60].mxu0 %v10027_v40 }
  0x9b   :  { %1661 = vmatprep.mubr.bf16.mxu0 %v10030_v41 }
  0xf5   :  { %v8905_v43 = vpop.f32.mrb[0].mxu0 }
  0xf6   :  { %v719_v44 = vmul.f32 0.2, %v8905_v43  ;;  %v398_v45 = vpop.f32.mrb[1].mxu0  ;;  %vm655_vm0 = vcmp.ge.f32.partialorder %v8905_v43, 0.0 }
  0xf7   :  { %v717_v46 = vmul.f32 0.2, %v398_v45  ;;  %v8906_v47 = vpop.f32.mrb[2].mxu0  ;;  %vm653_vm1 = vcmp.ge.f32.partialorder %v398_v45, 0.0 }
  0xf8   :  { %vm656_vm2 = vcmp.ge.f32.partialorder %v8906_v47, 0.0  ;;  %v720_v48 = vmul.f32 0.2, %v8906_v47  ;;  %v401_v49 = vpop.f32.mrb[3].mxu0  ;;  %v783_v51 = vsel %vm655_vm0, %v8905_v43, %v719_v44 }
  0xf9   :  { %vm654_vm3 = vcmp.ge.f32.partialorder %v401_v49, 0.0  ;;  %v718_v50 = vmul.f32 0.2, %v401_v49  ;;  %v781_v53 = vsel %vm653_vm1, %v398_v45, %v717_v46 }
  0xfa   :  { %v784_v52 = vsel %vm656_vm2, %v8906_v47, %v720_v48 }
  0xfb   :  { %v782_v54 = vsel %vm654_vm3, %v401_v49, %v718_v50  ;;  %v974_v55 = vpack.c.bf16 %v784_v52, %v783_v51 }
  0xfc   :  { %v973_v56 = vpack.c.bf16 %v782_v54, %v781_v53 }
  0xfd   :  { %v8909_v57 = vpop.f32.mrb[4].mxu0 }
  0xfe   :  { %v723_v58 = vmul.f32 0.2, %v8909_v57  ;;  %v414_v59 = vpop.f32.mrb[5].mxu0  ;;  %1630 = vmatpush1.bf16.msra.mxu0 %v973_v56  ;;  %9575 = vmatpush1.bf16.msra.mxu1 %v973_v56  ;;  %vm659_vm4 = vcmp.ge.f32.partialorder %v8909_v57, 0.0 }
  0xff   :  { %v721_v60 = vmul.f32 0.2, %v414_v59  ;;  %v8910_v61 = vpop.f32.mrb[6].mxu0  ;;  %1631 = vmatprep.subr.bf16.mxu0 %v12924_v26  ;;  %9560 = vmatprep.subr.bf16.mxu1 %v12924_v26  ;;  %vm657_vm5 = vcmp.ge.f32.partialorder %v414_v59, 0.0 }
 0x100   :  { %vm660_vm6 = vcmp.ge.f32.partialorder %v8910_v61, 0.0  ;;  %v724_v62 = vmul.f32 0.2, %v8910_v61  ;;  %v417_v63 = vpop.f32.mrb[7].mxu0  ;;  %v787_v1 = vsel %vm659_vm4, %v8909_v57, %v723_v58 }
 0x101   :  { %vm658_vm7 = vcmp.ge.f32.partialorder %v417_v63, 0.0  ;;  %v722_v0 = vmul.f32 0.2, %v417_v63  ;;  %v785_v3 = vsel %vm657_vm5, %v414_v59, %v721_v60 }
 0x102   :  { %1632 = vmatpush1.bf16.msra.mxu0 %v974_v55  ;;  %9576 = vmatpush1.bf16.msra.mxu1 %v974_v55  ;;  %v788_v2 = vsel %vm660_vm6, %v8910_v61, %v724_v62 }
 0x103   :  { %1633 = vmatprep.subr.bf16.mxu0 %v12924_v26  ;;  %9561 = vmatprep.subr.bf16.mxu1 %v12924_v26  ;;  %v786_v4 = vsel %vm658_vm7, %v417_v63, %v722_v0  ;;  %v976_v5 = vpack.c.bf16 %v788_v2, %v787_v1 }
 0x104   :  { %v975_v6 = vpack.c.bf16 %v786_v4, %v785_v3 }
 0x105   :  { %v8913_v7 = vpop.f32.mrb[8].mxu0 }
 0x106   :  { %v727_v8 = vmul.f32 0.2, %v8913_v7  ;;  %v430_v9 = vpop.f32.mrb[9].mxu0  ;;  %1634 = vmatpush1.bf16.msra.mxu0 %v975_v6  ;;  %9577 = vmatpush1.bf16.msra.mxu1 %v975_v6  ;;  %vm663_vm8 = vcmp.ge.f32.partialorder %v8913_v7, 0.0 }
 0x107   :  { %v725_v10 = vmul.f32 0.2, %v430_v9  ;;  %v8914_v11 = vpop.f32.mrb[10].mxu0  ;;  %1635 = vmatprep.subr.bf16.mxu0 %v12924_v26  ;;  %9562 = vmatprep.subr.bf16.mxu1 %v12924_v26  ;;  %vm661_vm9 = vcmp.ge.f32.partialorder %v430_v9, 0.0 }
 0x108   :  { %vm664_vm10 = vcmp.ge.f32.partialorder %v8914_v11, 0.0  ;;  %v728_v12 = vmul.f32 0.2, %v8914_v11  ;;  %v433_v13 = vpop.f32.mrb[11].mxu0  ;;  %v791_v15 = vsel %vm663_vm8, %v8913_v7, %v727_v8 }
 0x109   :  { %vm662_vm11 = vcmp.ge.f32.partialorder %v433_v13, 0.0  ;;  %v726_v14 = vmul.f32 0.2, %v433_v13  ;;  %v789_v17 = vsel %vm661_vm9, %v430_v9, %v725_v10 }
 0x10a   :  { %1636 = vmatpush1.bf16.msra.mxu0 %v976_v5  ;;  %9578 = vmatpush1.bf16.msra.mxu1 %v976_v5  ;;  %v792_v16 = vsel %vm664_vm10, %v8914_v11, %v728_v12 }
 0x10b   :  { %1637 = vmatprep.subr.bf16.mxu0 %v12924_v26  ;;  %9563 = vmatprep.subr.bf16.mxu1 %v12924_v26  ;;  %v790_v18 = vsel %vm662_vm11, %v433_v13, %v726_v14  ;;  %v978_v19 = vpack.c.bf16 %v792_v16, %v791_v15 }
 0x10c   :  { %v977_v20 = vpack.c.bf16 %v790_v18, %v789_v17 }
 0x10d   :  { %v8917_v21 = vpop.f32.mrb[12].mxu0 }
 0x10e   :  { %v731_v22 = vmul.f32 0.2, %v8917_v21  ;;  %v446_v23 = vpop.f32.mrb[13].mxu0  ;;  %1638 = vmatpush1.bf16.msra.mxu0 %v977_v20  ;;  %9579 = vmatpush1.bf16.msra.mxu1 %v977_v20  ;;  %vm667_vm12 = vcmp.ge.f32.partialorder %v8917_v21, 0.0 }
 0x10f   :  { %v729_v24 = vmul.f32 0.2, %v446_v23  ;;  %v8918_v25 = vpop.f32.mrb[14].mxu0  ;;  %1639 = vmatprep.subr.bf16.mxu0 %v12924_v26  ;;  %9564 = vmatprep.subr.bf16.mxu1 %v12924_v26  ;;  %vm665_vm13 = vcmp.ge.f32.partialorder %v446_v23, 0.0 }
 0x110   :  { %vm668_vm14 = vcmp.ge.f32.partialorder %v8918_v25, 0.0  ;;  %v732_v27 = vmul.f32 0.2, %v8918_v25  ;;  %v449_v28 = vpop.f32.mrb[15].mxu0  ;;  %v795_v30 = vsel %vm667_vm12, %v8917_v21, %v731_v22 }
 0x111   :  { %vm666_vm15 = vcmp.ge.f32.partialorder %v449_v28, 0.0  ;;  %v730_v29 = vmul.f32 0.2, %v449_v28  ;;  %v793_v32 = vsel %vm665_vm13, %v446_v23, %v729_v24 }
 0x112   :  { %1640 = vmatpush1.bf16.msra.mxu0 %v978_v19  ;;  %9580 = vmatpush1.bf16.msra.mxu1 %v978_v19  ;;  %v796_v31 = vsel %vm668_vm14, %v8918_v25, %v732_v27 }
 0x113   :  { %1641 = vmatprep.subr.bf16.mxu0 %v12924_v26  ;;  %9565 = vmatprep.subr.bf16.mxu1 %v12924_v26  ;;  %v794_v33 = vsel %vm666_vm15, %v449_v28, %v730_v29  ;;  %v980_v34 = vpack.c.bf16 %v796_v31, %v795_v30  ;;  %v10028_v29 = vld [vmem:[%s12913_s2] ss:$8 sps:$4 sm:$0xff]   ;;  %v10031_v30 = vld [vmem:[%s12913_s2 + $0x70] ss:$8 sps:$4 sm:$0xff]   ;;  %v10034_v31 = vld [vmem:[%s12913_s2 + $0x14] ss:$8 sps:$4 sm:$0xff]  }
 0x114   :  { %v979_v35 = vpack.c.bf16 %v794_v33, %v793_v32  ;;  %v10036_v32 = vld [vmem:[%s12913_s2 + $0x84] ss:$8 sps:$4 sm:$0xff]   ;;  %v10038_v33 = vld [vmem:[%s12913_s2 + $0x10] ss:$8 sps:$4 sm:$0xff]  }
 0x115   :  { %v8921_v36 = vpop.f32.mrb[16].mxu0 }
 0x116   :  { %v735_v37 = vmul.f32 0.2, %v8921_v36  ;;  %v462_v38 = vpop.f32.mrb[17].mxu0  ;;  %1642 = vmatpush1.bf16.msra.mxu0 %v979_v35  ;;  %9581 = vmatpush1.bf16.msra.mxu1 %v979_v35  ;;  %vm671_vm0 = vcmp.ge.f32.partialorder %v8921_v36, 0.0  ;;  %v10040_v35 = vld [vmem:[%s12913_s2 + $0x24] ss:$8 sps:$4 sm:$0xff]  }
 0x117   :  { %v733_v39 = vmul.f32 0.2, %v462_v38  ;;  %v8922_v40 = vpop.f32.mrb[18].mxu0  ;;  %1643 = vmatprep.subr.bf16.mxu0 %v12924_v26  ;;  %9566 = vmatprep.subr.bf16.mxu1 %v12924_v26  ;;  %vm669_vm1 = vcmp.ge.f32.partialorder %v462_v38, 0.0 }
 0x118   :  { %vm672_vm2 = vcmp.ge.f32.partialorder %v8922_v40, 0.0  ;;  %v736_v41 = vmul.f32 0.2, %v8922_v40  ;;  %v465_v42 = vpop.f32.mrb[19].mxu0  ;;  %v799_v44 = vsel %vm671_vm0, %v8921_v36, %v735_v37  ;;  %v10042_v36 = vld [vmem:[%s12913_s2 + $0x94] ss:$8 sps:$4 sm:$0xff]  }
 0x119   :  { %vm670_vm3 = vcmp.ge.f32.partialorder %v465_v42, 0.0  ;;  %v734_v43 = vmul.f32 0.2, %v465_v42  ;;  %v797_v46 = vsel %vm669_vm1, %v462_v38, %v733_v39  ;;  %v10044_v37 = vld [vmem:[%s12913_s2 + $0x20] ss:$8 sps:$4 sm:$0xff]   ;;  %vm2254_vm0 = vcmask 1043456  }
 0x11a   :  { %1644 = vmatpush1.bf16.msra.mxu0 %v980_v34  ;;  %9582 = vmatpush1.bf16.msra.mxu1 %v980_v34  ;;  %v800_v45 = vsel %vm672_vm2, %v8922_v40, %v736_v41  ;;  %v10039_v34 = vld [vmem:[%s12913_s2 + $0x80] ss:$8 sps:$4 sm:$0xff]   ;;  %v10045_v38 = vld [vmem:[%s12913_s2 + $0x90] ss:$8 sps:$4 sm:$0xff]   ;;  %v10046_v39 = vld [vmem:[%s12913_s2 + $0x34] ss:$8 sps:$4 sm:$0xff]  }
 0x11b   :  { %1645 = vmatprep.subr.bf16.mxu0 %v12924_v26  ;;  %9567 = vmatprep.subr.bf16.mxu1 %v12924_v26  ;;  %v798_v47 = vsel %vm670_vm3, %v465_v42, %v734_v43  ;;  %v982_v48 = vpack.c.bf16 %v800_v45, %v799_v44  ;;  %v10048_v40 = vld [vmem:[%s12913_s2 + $0xa4] ss:$8 sps:$4 sm:$0xff]   ;;  %v10050_v41 = vld [vmem:[%s12913_s2 + $0x30] ss:$8 sps:$4 sm:$0xff]   ;;  %v10051_v42 = vld [vmem:[%s12913_s2 + $0xa0] ss:$8 sps:$4 sm:$0xff]  }
 0x11c   :  { %v981_v49 = vpack.c.bf16 %v798_v47, %v797_v46  ;;  %v10052_v43 = vld [vmem:[%s12913_s2 + $0x44] ss:$8 sps:$4 sm:$0xff]   ;;  %v10054_v44 = vld [vmem:[%s12913_s2 + $0xb4] ss:$8 sps:$4 sm:$0xff]   ;;  %v10056_v45 = vld [vmem:[%s12913_s2 + $0x40] ss:$8 sps:$4 sm:$0xff]  }
 0x11d   :  { %v8925_v50 = vpop.f32.mrb[20].mxu0  ;;  %v10057_v46 = vld [vmem:[%s12913_s2 + $0xb0] ss:$8 sps:$4 sm:$0xff]   ;;  %v10058_v47 = vld [vmem:[%s12913_s2 + $0x54] ss:$8 sps:$4 sm:$0xff]  }
 0x11e   :  { %v739_v51 = vmul.f32 0.2, %v8925_v50  ;;  %v478_v52 = vpop.f32.mrb[21].mxu0  ;;  %1646 = vmatpush1.bf16.msra.mxu0 %v981_v49  ;;  %9583 = vmatpush1.bf16.msra.mxu1 %v981_v49  ;;  %vm675_vm4 = vcmp.ge.f32.partialorder %v8925_v50, 0.0  ;;  %v10062_v49 = vld [vmem:[%s12913_s2 + $0x50] ss:$8 sps:$4 sm:$0xff]  }
 0x11f   :  { %v737_v53 = vmul.f32 0.2, %v478_v52  ;;  %v8926_v54 = vpop.f32.mrb[22].mxu0  ;;  %1647 = vmatprep.subr.bf16.mxu0 %v12924_v26  ;;  %9568 = vmatprep.subr.bf16.mxu1 %v12924_v26  ;;  %vm673_vm5 = vcmp.ge.f32.partialorder %v478_v52, 0.0 }
 0x120   :  { %vm676_vm6 = vcmp.ge.f32.partialorder %v8926_v54, 0.0  ;;  %v740_v55 = vmul.f32 0.2, %v8926_v54  ;;  %v481_v56 = vpop.f32.mrb[23].mxu0  ;;  %v803_v58 = vsel %vm675_vm4, %v8925_v50, %v739_v51  ;;  %v10063_v50 = vld [vmem:[%s12913_s2 + $0xc0] ss:$8 sps:$4 sm:$0xff]  }
 0x121   :  { %vm674_vm7 = vcmp.ge.f32.partialorder %v481_v56, 0.0  ;;  %v738_v57 = vmul.f32 0.2, %v481_v56  ;;  %v801_v60 = vsel %vm673_vm5, %v478_v52, %v737_v53  ;;  %v10064_v51 = vld [vmem:[%s12913_s2 + $0x64] ss:$8 sps:$4 sm:$0xff]  }
 0x122   :  { %1648 = vmatpush1.bf16.msra.mxu0 %v982_v48  ;;  %9584 = vmatpush1.bf16.msra.mxu1 %v982_v48  ;;  %v804_v59 = vsel %vm676_vm6, %v8926_v54, %v740_v55  ;;  %v10060_v48 = vld [vmem:[%s12913_s2 + $0xc4] ss:$8 sps:$4 sm:$0xff]   ;;  %v10066_v52 = vld [vmem:[%s12913_s2 + $0xd4] ss:$8 sps:$4 sm:$0xff]   ;;  %v10068_v53 = vld [vmem:[%s12913_s2 + $0x60] ss:$8 sps:$4 sm:$0xff]  }
 0x123   :  { %1649 = vmatprep.subr.bf16.mxu0 %v12924_v26  ;;  %9569 = vmatprep.subr.bf16.mxu1 %v12924_v26  ;;  %v802_v61 = vsel %vm674_vm7, %v481_v56, %v738_v57  ;;  %v984_v62 = vpack.c.bf16 %v804_v59, %v803_v58  ;;  %v10069_v54 = vld [vmem:[%s12913_s2 + $0xd0] ss:$8 sps:$4 sm:$0xff]   ;;  %v10070_v55 = vld [vmem:[%s12913_s2 + $0xe4] ss:$8 sps:$4 sm:$0xff]   ;;  %v10072_v56 = vld [vmem:[%s12913_s2 + $0xe0] ss:$8 sps:$4 sm:$0xff]  }
 0x124   :  { %v983_v63 = vpack.c.bf16 %v802_v61, %v801_v60  ;;  %v10073_v57 = vld [vmem:[%s12913_s2 + $0xf4] ss:$8 sps:$4 sm:$0xff]   ;;  %v10075_v58 = vld [vmem:[%s12913_s2 + $0xf0] ss:$8 sps:$4 sm:$0xff]   ;;  %v10076_v59 = vld [vmem:[%s12913_s2 + $0x104] ss:$8 sps:$4 sm:$0xff]  }
 0x125   :  { %v8929_v0 = vpop.f32.mrb[24].mxu0  ;;  %v10078_v61 = vld [vmem:[%s12913_s2 + $0x100] ss:$8 sps:$4 sm:$0xff]  }
 0x126   :  { %v743_v1 = vmul.f32 0.2, %v8929_v0  ;;  %v494_v2 = vpop.f32.mrb[25].mxu0  ;;  %1650 = vmatpush1.bf16.msra.mxu0 %v983_v63  ;;  %9585 = vmatpush1.bf16.msra.mxu1 %v983_v63  ;;  %vm679_vm8 = vcmp.ge.f32.partialorder %v8929_v0, 0.0 }
 0x127   :  { %v741_v3 = vmul.f32 0.2, %v494_v2  ;;  %v8930_v4 = vpop.f32.mrb[26].mxu0  ;;  %1651 = vmatprep.subr.bf16.mxu0 %v12924_v26  ;;  %9570 = vmatprep.subr.bf16.mxu1 %v12924_v26  ;;  %vm677_vm9 = vcmp.ge.f32.partialorder %v494_v2, 0.0 }
 0x128   :  { %vm680_vm10 = vcmp.ge.f32.partialorder %v8930_v4, 0.0  ;;  %v744_v5 = vmul.f32 0.2, %v8930_v4  ;;  %v497_v6 = vpop.f32.mrb[27].mxu0  ;;  %v807_v8 = vsel %vm679_vm8, %v8929_v0, %v743_v1 }
 0x129   :  { %vm678_vm11 = vcmp.ge.f32.partialorder %v497_v6, 0.0  ;;  %v742_v7 = vmul.f32 0.2, %v497_v6  ;;  %v805_v10 = vsel %vm677_vm9, %v494_v2, %v741_v3  ;;  %v10081_v3 = vld [vmem:[%s12913_s2 + $0x110] ss:$8 sps:$4 sm:$0xff]  }
 0x12a   :  { %1652 = vmatpush1.bf16.msra.mxu0 %v984_v62  ;;  %9586 = vmatpush1.bf16.msra.mxu1 %v984_v62  ;;  %v808_v9 = vsel %vm680_vm10, %v8930_v4, %v744_v5  ;;  %v10079_v62 = vld [vmem:[%s12913_s2 + $0x114] ss:$8 sps:$4 sm:$0xff]   ;;  %v10082_v5 = vld [vmem:[%s12913_s2 + $0x124] ss:$8 sps:$4 sm:$0xff]  }
 0x12b   :  { %1653 = vmatprep.subr.bf16.mxu0 %v12924_v26  ;;  %9571 = vmatprep.subr.bf16.mxu1 %v12924_v26  ;;  %v806_v11 = vsel %vm678_vm11, %v497_v6, %v742_v7  ;;  %v986_v12 = vpack.c.bf16 %v808_v9, %v807_v8 }
 0x12c   :  { %v985_v13 = vpack.c.bf16 %v806_v11, %v805_v10 }
 0x12d   :  { %v8933_v14 = vpop.f32.mrb[28].mxu0 }
 0x12e   :  { %v747_v15 = vmul.f32 0.2, %v8933_v14  ;;  %v510_v16 = vpop.f32.mrb[29].mxu0  ;;  %1654 = vmatpush1.bf16.msra.mxu0 %v985_v13  ;;  %9587 = vmatpush1.bf16.msra.mxu1 %v985_v13  ;;  %vm683_vm12 = vcmp.ge.f32.partialorder %v8933_v14, 0.0  ;;  %v10084_v13 = vld [vmem:[%s12913_s2 + $0x120] ss:$8 sps:$4 sm:$0xff]  }
 0x12f   :  { %v745_v17 = vmul.f32 0.2, %v510_v16  ;;  %v8934_v18 = vpop.f32.mrb[30].mxu0  ;;  %1655 = vmatprep.subr.bf16.mxu0 %v12924_v26  ;;  %9572 = vmatprep.subr.bf16.mxu1 %v12924_v26  ;;  %vm681_vm13 = vcmp.ge.f32.partialorder %v510_v16, 0.0 }
 0x130   :  { %vm684_vm14 = vcmp.ge.f32.partialorder %v8934_v18, 0.0  ;;  %v748_v19 = vmul.f32 0.2, %v8934_v18  ;;  %v513_v20 = vpop.f32.mrb[31].mxu0  ;;  %v811_v22 = vsel %vm683_vm12, %v8933_v14, %v747_v15  ;;  %v10085_v15 = vld [vmem:[%s12913_s2 + $0x134] ss:$8 sps:$4 sm:$0xff]  }
 0x131   :  { %vm682_vm15 = vcmp.ge.f32.partialorder %v513_v20, 0.0  ;;  %v746_v21 = vmul.f32 0.2, %v513_v20  ;;  %v809_v24 = vsel %vm681_vm13, %v510_v16, %v745_v17 }
 0x132   :  { %1656 = vmatpush1.bf16.msra.mxu0 %v986_v12  ;;  %9588 = vmatpush1.bf16.msra.mxu1 %v986_v12  ;;  %v812_v23 = vsel %vm684_vm14, %v8934_v18, %v748_v19 }
 0x133   :  { %1657 = vmatprep.subr.bf16.mxu0 %v12924_v26  ;;  %9573 = vmatprep.subr.bf16.mxu1 %v12924_v26  ;;  %v810_v25 = vsel %vm682_vm15, %v513_v20, %v746_v21  ;;  %v988_v27 = vpack.c.bf16 %v812_v23, %v811_v22  ;;  %v10087_v22 = vld [vmem:[%s12913_s2 + $0x130] ss:$8 sps:$4 sm:$0xff]  }
 0x134   :  { %v987_v28 = vpack.c.bf16 %v810_v25, %v809_v24  ;;  %v10088_v24 = vld [vmem:[%s12913_s2 + $0x144] ss:$8 sps:$4 sm:$0xff]  }
 0x135   :  { %v10727_v60 = vpop.f32.mrb[32].mxu0 }
 0x136   :  { %1658 = vmatpush1.bf16.msra.mxu0 %v987_v28  ;;  %9589 = vmatpush1.bf16.msra.mxu1 %v987_v28  ;;  %v10735_v63 = vpop.f32.mrb[33].mxu0  ;;  %vm687_vm3 = vcmp.ge.f32.partialorder %v10727_v60, 0.0 }
 0x137   :  { %1659 = vmatprep.subr.bf16.mxu0 %v12924_v26  ;;  %9574 = vmatprep.subr.bf16.mxu1 %v12924_v26  ;;  %v10737_v0 = vpop.f32.mrb[34].mxu0  ;;  %vm685_vm1 = vcmp.ge.f32.partialorder %v10735_v63, 0.0 }
 0x138   :  { %v10739_v1 = vpop.f32.mrb[35].mxu0  ;;  %vm688_vm4 = vcmp.ge.f32.partialorder %v10737_v0, 0.0 }
 0x139   :  { %vm686_vm2 = vcmp.ge.f32.partialorder %v10739_v1, 0.0 }
 0x13a   :  { %1660 = vmatpush1.bf16.msra.mxu0 %v988_v27  ;;  %9590 = vmatpush1.bf16.msra.mxu1 %v988_v27 }
 0x13d   :  { %1662 = vmatmul.mubr.bf16.vlgmr.msra.gmra.mrb[64].mxu0 %v10028_v29  ;;  %1718 = vmatmul.mubr.bf16.vlgmr.msra.gmra.mrb[0].mxu1 %v10031_v30  ;;  %v10741_v2 = vpop.f32.mrb[36].mxu0 }
 0x13e   :  { %1669 = vmatprep.mubr.bf16.mxu0 %v10034_v31  ;;  %1725 = vmatprep.mubr.bf16.mxu1 %v10036_v32  ;;  %v10746_v4 = vpop.f32.mrb[37].mxu0  ;;  %vm691_vm5 = vcmp.ge.f32.partialorder %v10741_v2, 0.0 }
 0x13f   :  { %v10751_v6 = vpop.f32.mrb[38].mxu0  ;;  %vm689_vm6 = vcmp.ge.f32.partialorder %v10746_v4, 0.0 }
 0x140   :  { %v10753_v7 = vpop.f32.mrb[39].mxu0  ;;  %vm692_vm7 = vcmp.ge.f32.partialorder %v10751_v6, 0.0 }
 0x141   :  { %vm690_vm8 = vcmp.ge.f32.partialorder %v10753_v7, 0.0 }
 0x145   :  { %1670 = vmatmul.mubr.bf16.gmra.mrb[68].mxu0 %v10038_v33  ;;  %1726 = vmatmul.mubr.bf16.gmra.mrb[4].mxu1 %v10039_v34  ;;  %v10755_v8 = vpop.f32.mrb[40].mxu0  ;;  %v10090_v33 = vld [vmem:[%s12913_s2 + $0x140] ss:$8 sps:$4 sm:$0xff]  }
 0x146   :  { %1677 = vmatprep.mubr.bf16.mxu0 %v10040_v35  ;;  %1733 = vmatprep.mubr.bf16.mxu1 %v10042_v36  ;;  %v10757_v9 = vpop.f32.mrb[41].mxu0  ;;  %v10091_v35 = vld [vmem:[%s12913_s2 + $0x154] ss:$8 sps:$4 sm:$0xff]   ;;  %vm695_vm9 = vcmp.ge.f32.partialorder %v10755_v8, 0.0 }
 0x147   :  { %v10759_v10 = vpop.f32.mrb[42].mxu0  ;;  %vm693_vm10 = vcmp.ge.f32.partialorder %v10757_v9, 0.0 }
 0x148   :  { %v10761_v11 = vpop.f32.mrb[43].mxu0  ;;  %vm696_vm11 = vcmp.ge.f32.partialorder %v10759_v10, 0.0 }
 0x149   :  { %vm694_vm12 = vcmp.ge.f32.partialorder %v10761_v11, 0.0 }
 0x14d   :  { %1678 = vmatmul.mubr.bf16.gmra.mrb[72].mxu0 %v10044_v37  ;;  %1734 = vmatmul.mubr.bf16.gmra.mrb[8].mxu1 %v10045_v38  ;;  %v10763_v12 = vpop.f32.mrb[44].mxu0 }
 0x14e   :  { %1685 = vmatprep.mubr.bf16.mxu0 %v10046_v39  ;;  %1741 = vmatprep.mubr.bf16.mxu1 %v10048_v40  ;;  %v10768_v14 = vpop.f32.mrb[45].mxu0  ;;  %v10093_v39 = vld [vmem:[%s12913_s2 + $0x150] ss:$8 sps:$4 sm:$0xff]   ;;  %v10094_v40 = vld [vmem:[%s12913_s2 + $0x164] ss:$8 sps:$4 sm:$0xff]   ;;  %vm699_vm13 = vcmp.ge.f32.partialorder %v10763_v12, 0.0 }
 0x14f   :  { %v10773_v16 = vpop.f32.mrb[46].mxu0  ;;  %vm697_vm14 = vcmp.ge.f32.partialorder %v10768_v14, 0.0 }
 0x150   :  { %v10775_v17 = vpop.f32.mrb[47].mxu0  ;;  %vm700_vm15 = vcmp.ge.f32.partialorder %v10773_v16, 0.0 }
 0x155   :  { %1686 = vmatmul.mubr.bf16.gmra.mrb[76].mxu0 %v10050_v41  ;;  %1742 = vmatmul.mubr.bf16.gmra.mrb[12].mxu1 %v10051_v42  ;;  %v10777_v18 = vpop.f32.mrb[48].mxu0  ;;  %v10096_v41 = vld [vmem:[%s12913_s2 + $0x160] ss:$8 sps:$4 sm:$0xff]   ;;  %v10097_v42 = vld [vmem:[%s12913_s2 + $0x174] ss:$8 sps:$4 sm:$0xff]  }
 0x156   :  { %1693 = vmatprep.mubr.bf16.mxu0 %v10052_v43  ;;  %1749 = vmatprep.mubr.bf16.mxu1 %v10054_v44  ;;  %v10779_v19 = vpop.f32.mrb[49].mxu0  ;;  %v10099_v43 = vld [vmem:[%s12913_s2 + $0x170] ss:$8 sps:$4 sm:$0xff]   ;;  %v8312_v44 = vld [vmem:[%s12914_s3 + $0x4] sm:$0xf] }
 0x157   :  { %v10781_v20 = vpop.f32.mrb[50].mxu0  ;;  %9951 = vmatprep.subr.msk.bf16.mxu0 %vm2254_vm0, %v8312_v44  ;;  %9967 = vmatprep.subr.msk.bf16.mxu1 %vm2254_vm0, %v8312_v44 }
 0x158   :  { %v10783_v21 = vpop.f32.mrb[51].mxu0 }
 0x15d   :  { %1694 = vmatmul.mubr.bf16.gmra.mrb[80].mxu0 %v10056_v45  ;;  %1750 = vmatmul.mubr.bf16.gmra.mrb[16].mxu1 %v10057_v46  ;;  %v10788_v23 = vpop.f32.mrb[52].mxu0  ;;  %v10100_v45 = vld [vmem:[%s12913_s2 + $0x184] ss:$8 sps:$4 sm:$0xff]   ;;  %v2256_v46 = vsel %vm2254_vm0, %v8312_v44, 0  ;;  %v10121_v44 = vld [vmem:[%s12913_s2 + $0x1f4] ss:$8 sps:$4 sm:$0xff]  }
 0x15e   :  { %1701 = vmatprep.mubr.bf16.mxu0 %v10058_v47  ;;  %1757 = vmatprep.mubr.bf16.mxu1 %v10060_v48  ;;  %v10793_v25 = vpop.f32.mrb[53].mxu0  ;;  %v10102_v47 = vld [vmem:[%s12913_s2 + $0x180] ss:$8 sps:$4 sm:$0xff]   ;;  %v10103_v48 = vld [vmem:[%s12913_s2 + $0x194] ss:$8 sps:$4 sm:$0xff]  }
 0x15f   :  { %v10795_v27 = vpop.f32.mrb[54].mxu0  ;;  %8968 = vmatpush3.bf16.msra.mxu0 %v2256_v46  ;;  %9128 = vmatpush3.bf16.msra.mxu1 %v2256_v46  ;;  %v759_v46 = vmul.f32 0.2, %v10755_v8 }
 0x160   :  { %v10797_v28 = vpop.f32.mrb[55].mxu0 }
 0x165   :  { %1702 = vmatmul.mubr.bf16.gmra.mrb[84].mxu0 %v10062_v49  ;;  %1758 = vmatmul.mubr.bf16.gmra.mrb[20].mxu1 %v10063_v50  ;;  %v10799_v29 = vpop.f32.mrb[56].mxu0  ;;  %v10105_v49 = vld [vmem:[%s12913_s2 + $0x190] ss:$8 sps:$4 sm:$0xff]   ;;  %v10857_v50 = vld [vmem:[%s12914_s3] sm:$0xf] }
 0x166   :  { %1709 = vmatprep.mubr.bf16.mxu0 %v10064_v51  ;;  %1765 = vmatprep.mubr.bf16.mxu1 %v10066_v52  ;;  %v10801_v30 = vpop.f32.mrb[57].mxu0  ;;  %v10106_v51 = vld [vmem:[%s12913_s2 + $0x1a4] ss:$8 sps:$4 sm:$0xff]   ;;  %v10108_v52 = vld [vmem:[%s12913_s2 + $0x1a0] ss:$8 sps:$4 sm:$0xff]  }
 0x167   :  { %v10803_v31 = vpop.f32.mrb[58].mxu0  ;;  %9952 = vmatprep.subr.msk.bf16.mxu0 %vm2254_vm0, %v10857_v50  ;;  %9968 = vmatprep.subr.msk.bf16.mxu1 %vm2254_vm0, %v10857_v50 }
 0x168   :  { %v10805_v32 = vpop.f32.mrb[59].mxu0 }
 0x16d   :  { %1710 = vmatmul.mubr.bf16.gmra.mrb[88].mxu0 %v10068_v53  ;;  %1766 = vmatmul.mubr.bf16.gmra.mrb[24].mxu1 %v10069_v54  ;;  %v10810_v34 = vpop.f32.mrb[60].mxu0  ;;  %v10109_v53 = vld [vmem:[%s12913_s2 + $0x1b4] ss:$8 sps:$4 sm:$0xff]   ;;  %v10111_v54 = vld [vmem:[%s12913_s2 + $0x1b0] ss:$8 sps:$4 sm:$0xff]  }
 0x16e   :  { %1773 = vmatprep.mubr.bf16.mxu1 %v10070_v55  ;;  %v10815_v36 = vpop.f32.mrb[61].mxu0  ;;  %v10112_v55 = vld [vmem:[%s12913_s2 + $0x1c4] ss:$8 sps:$4 sm:$0xff]  }
 0x16f   :  { %v10817_v37 = vpop.f32.mrb[62].mxu0 }
 0x170   :  { %v10819_v38 = vpop.f32.mrb[63].mxu0 }
 0x175   :  { %1774 = vmatmul.mubr.bf16.gmra.mrb[28].mxu1 %v10072_v56  ;;  %v10114_v56 = vld [vmem:[%s12913_s2 + $0x1c0] ss:$8 sps:$4 sm:$0xff]  }
 0x176   :  { %1781 = vmatprep.mubr.bf16.mxu1 %v10073_v57  ;;  %v10115_v57 = vld [vmem:[%s12913_s2 + $0x1d4] ss:$8 sps:$4 sm:$0xff]  }
 0x17d   :  { %1782 = vmatmul.mubr.bf16.gmra.mrb[32].mxu1 %v10075_v58  ;;  %v749_v58 = vmul.f32 0.2, %v10735_v63 }
 0x17e   :  { %1789 = vmatprep.mubr.bf16.mxu1 %v10076_v59  ;;  %v750_v59 = vmul.f32 0.2, %v10739_v1 }
 0x185   :  { %1790 = vmatmul.mubr.bf16.gmra.mrb[36].mxu1 %v10078_v61  ;;  %v751_v61 = vmul.f32 0.2, %v10727_v60 }
 0x186   :  { %1797 = vmatprep.mubr.bf16.mxu1 %v10079_v62  ;;  %v752_v62 = vmul.f32 0.2, %v10737_v0 }
 0x18d   :  { %1798 = vmatmul.mubr.bf16.gmra.mrb[40].mxu1 %v10081_v3  ;;  %v10893_v3 = vsel %vm685_vm1, %v10735_v63, %v749_v58  ;;  %v10118_v63 = vld [vmem:[%s12913_s2 + $0x1e4] ss:$8 sps:$4 sm:$0xff]   ;;  %vm698_vm1 = vcmp.ge.f32.partialorder %v10775_v17, 0.0 }
 0x18e   :  { %1805 = vmatprep.mubr.bf16.mxu1 %v10082_v5  ;;  %v10896_v5 = vsel %vm686_vm2, %v10739_v1, %v750_v59  ;;  %vm703_vm2 = vcmp.ge.f32.partialorder %v10777_v18, 0.0 }
 0x195   :  { %1806 = vmatmul.mubr.bf16.gmra.mrb[44].mxu1 %v10084_v13  ;;  %v10117_v13 = vld [vmem:[%s12913_s2 + $0x1d0] ss:$8 sps:$4 sm:$0xff]  }
 0x196   :  { %1813 = vmatprep.mubr.bf16.mxu1 %v10085_v15 }
 0x19d   :  { %1814 = vmatmul.mubr.bf16.gmra.mrb[48].mxu1 %v10087_v22  ;;  %v10904_v22 = vsel %vm687_vm3, %v10727_v60, %v751_v61  ;;  %v754_v60 = vmul.f32 0.2, %v10753_v7  ;;  %vm701_vm3 = vcmp.ge.f32.partialorder %v10779_v19, 0.0 }
 0x19e   :  { %1821 = vmatprep.mubr.bf16.mxu1 %v10088_v24  ;;  %v10907_v24 = vsel %vm688_vm4, %v10737_v0, %v752_v62  ;;  %v10120_v0 = vld [vmem:[%s12913_s2 + $0x1e0] ss:$8 sps:$4 sm:$0xff]   ;;  %v10127_v62 = vld [vmem:[%s12913_s2 + $0x214] ss:$8 sps:$4 sm:$0xff]   ;;  %vm704_vm4 = vcmp.ge.f32.partialorder %v10781_v20, 0.0 }
 0x1a5   :  { %1822 = vmatmul.mubr.bf16.gmra.mrb[52].mxu1 %v10090_v33  ;;  %v755_v33 = vmul.f32 0.2, %v10741_v2 }
 0x1a6   :  { %1829 = vmatprep.mubr.bf16.mxu1 %v10091_v35  ;;  %v753_v35 = vmul.f32 0.2, %v10746_v4 }
 0x1ad   :  { %1830 = vmatmul.mubr.bf16.gmra.mrb[56].mxu1 %v10093_v39  ;;  %v756_v39 = vmul.f32 0.2, %v10751_v6 }
 0x1ae   :  { %1837 = vmatprep.mubr.bf16.mxu1 %v10094_v40  ;;  %v10926_v40 = vsel %vm689_vm6, %v10746_v4, %v753_v35  ;;  %vm707_vm6 = vcmp.ge.f32.partialorder %v10788_v23, 0.0 }
 0x1b5   :  { %1838 = vmatmul.mubr.bf16.gmra.mrb[60].mxu1 %v10096_v41  ;;  %v10929_v41 = vsel %vm690_vm8, %v10753_v7, %v754_v60  ;;  %v757_v7 = vmul.f32 0.2, %v10757_v9  ;;  %vm708_vm8 = vcmp.ge.f32.partialorder %v10795_v27, 0.0 }
 0x1b6   :  { %1845 = vmatprep.mubr.bf16.mxu1 %v10097_v42  ;;  %v10932_v42 = vsel %vm691_vm5, %v10741_v2, %v755_v33  ;;  %v760_v2 = vmul.f32 0.2, %v10759_v10  ;;  %vm702_vm5 = vcmp.ge.f32.partialorder %v10783_v21, 0.0  ;;  %v10129_v33 = vld [vmem:[%s12913_s2 + $0x210] ss:$8 sps:$4 sm:$0xff]  }
 0x1bd   :  { %1846 = vmatmul.mubr.bf16.gmra.mrb[64].mxu1 %v10099_v43  ;;  %v10935_v43 = vsel %vm692_vm7, %v10751_v6, %v756_v39  ;;  %v758_v6 = vmul.f32 0.2, %v10761_v11  ;;  %vm705_vm7 = vcmp.ge.f32.partialorder %v10793_v25, 0.0 }
 0x1be   :  { %1853 = vmatprep.mubr.bf16.mxu1 %v10100_v45 }
 0x1c5   :  { %1854 = vmatmul.mubr.bf16.gmra.mrb[68].mxu1 %v10102_v47  ;;  %v10123_v47 = vld [vmem:[%s12913_s2 + $0x1f0] ss:$8 sps:$4 sm:$0xff]  }
 0x1c6   :  { %1861 = vmatprep.mubr.bf16.mxu1 %v10103_v48  ;;  %v10956_v48 = vsel %vm693_vm10, %v10757_v9, %v757_v7  ;;  %v771_v7 = vmul.f32 0.2, %v10788_v23  ;;  %vm711_vm10 = vcmp.ge.f32.partialorder %v10799_v29, 0.0 }
 0x1cd   :  { %1862 = vmatmul.mubr.bf16.gmra.mrb[72].mxu1 %v10105_v49  ;;  %v10959_v49 = vsel %vm694_vm12, %v10761_v11, %v758_v6  ;;  %v761_v11 = vmul.f32 0.2, %v10768_v14  ;;  %vm712_vm12 = vcmp.ge.f32.partialorder %v10803_v31, 0.0 }
 0x1ce   :  { %1869 = vmatprep.mubr.bf16.mxu1 %v10106_v51  ;;  %v10962_v51 = vsel %vm695_vm9, %v10755_v8, %v759_v46  ;;  %v764_v8 = vmul.f32 0.2, %v10773_v16  ;;  %vm706_vm9 = vcmp.ge.f32.partialorder %v10797_v28, 0.0 }
 0x1d0   :  { %v10995_v61 = vsel %vm700_vm15, %v10773_v16, %v764_v8  ;;  %v766_v16 = vmul.f32 0.2, %v10783_v21  ;;  %vm713_vm15 = vcmp.ge.f32.partialorder %v10815_v36, 0.0 }
 0x1d2   :  { %v11019_v39 = vsel %vm702_vm5, %v10783_v21, %v766_v16  ;;  %v769_v21 = vmul.f32 0.2, %v10793_v25  ;;  %vm5680_vm5 = vcmask 130048  }
 0x1d5   :  { %1870 = vmatmul.mubr.bf16.gmra.mrb[76].mxu1 %v10108_v52  ;;  %v10965_v52 = vsel %vm696_vm11, %v10759_v10, %v760_v2  ;;  %v762_v10 = vmul.f32 0.2, %v10775_v17  ;;  %vm709_vm11 = vcmp.ge.f32.partialorder %v10801_v30, 0.0 }
 0x1d6   :  { %1877 = vmatprep.mubr.bf16.mxu1 %v10109_v53  ;;  %v10124_v53 = vld [vmem:[%s12913_s2 + $0x204] ss:$8 sps:$4 sm:$0xff]  }
 0x1d7   :  { %v10989_v58 = vsel %vm698_vm1, %v10775_v17, %v762_v10  ;;  %v765_v17 = vmul.f32 0.2, %v10779_v19  ;;  %v11056_v10 = vsel %vm707_vm6, %v10788_v23, %v771_v7  ;;  %v776_v7 = vmul.f32 0.2, %v10803_v31  ;;  %v10147_v23 = vld [vmem:[%s12913_s2 + $0x270] ss:$8 sps:$4 sm:$0xff]  }
 0x1d8   :  { %vm714_vm1 = vcmp.ge.f32.partialorder %v10819_v38, 0.0 }
 0x1d9   :  { %v11016_v35 = vsel %vm701_vm3, %v10779_v19, %v765_v17  ;;  %vm2241_vm3 = vcmask 64512  }
 0x1dd   :  { %1878 = vmatmul.mubr.bf16.gmra.mrb[80].mxu1 %v10111_v54 }
 0x1de   :  { %1885 = vmatprep.mubr.bf16.mxu1 %v10112_v55  ;;  %v763_v55 = vmul.f32 0.2, %v10763_v12 }
 0x1e0   :  { %v10992_v59 = vsel %vm699_vm13, %v10763_v12, %v763_v55  ;;  %v768_v12 = vmul.f32 0.2, %v10781_v20  ;;  %vm710_vm13 = vcmp.ge.f32.partialorder %v10805_v32, 0.0 }
 0x1e5   :  { %1886 = vmatmul.mubr.bf16.gmra.mrb[84].mxu1 %v10114_v56  ;;  %v10126_v56 = vld [vmem:[%s12913_s2 + $0x200] ss:$8 sps:$4 sm:$0xff]  }
 0x1e6   :  { %1893 = vmatprep.mubr.bf16.mxu1 %v10115_v57  ;;  %v10986_v57 = vsel %vm697_vm14, %v10768_v14, %v761_v11  ;;  %v11050_v11 = vsel %vm705_vm7, %v10793_v25, %v769_v21  ;;  %v774_v21 = vmul.f32 0.2, %v10805_v32  ;;  %vm715_vm14 = vcmp.ge.f32.partialorder %v10810_v34, 0.0 }
 0x1ed   :  { %1894 = vmatmul.mubr.bf16.gmra.mrb[88].mxu1 %v10117_v13 }
 0x1ee   :  { %1901 = vmatprep.mubr.bf16.mxu1 %v10118_v63  ;;  %v767_v63 = vmul.f32 0.2, %v10777_v18 }
 0x1f0   :  { %v11022_v60 = vsel %vm703_vm2, %v10777_v18, %v767_v63  ;;  %v772_v18 = vmul.f32 0.2, %v10795_v27  ;;  %v10133_v63 = vld [vmem:[%s12913_s2 + $0x234] ss:$8 sps:$4 sm:$0xff]   ;;  %vm716_vm2 = vcmp.ge.f32.partialorder %v10817_v37, 0.0 }
 0x1f5   :  { %1902 = vmatmul.mubr.bf16.gmra.mrb[92].mxu1 %v10120_v0  ;;  %v11025_v0 = vsel %vm704_vm4, %v10781_v20, %v768_v12  ;;  %v770_v20 = vmul.f32 0.2, %v10797_v28 }
 0x1f6   :  { %1909 = vmatprep.mubr.bf16.mxu1 %v10121_v44  ;;  %v10130_v44 = vld [vmem:[%s12913_s2 + $0x224] ss:$8 sps:$4 sm:$0xff]  }
 0x1f7   :  { %v11053_v8 = vsel %vm706_vm9, %v10797_v28, %v770_v20  ;;  %v11101_v28 = vsel %vm712_vm12, %v10803_v31, %v776_v7  ;;  %v779_v7 = vmul.f32 0.2, %v10810_v34 }
 0x1fd   :  { %1910 = vmatmul.mubr.bf16.gmra.mrb[96].mxu1 %v10123_v47 }
 0x1fe   :  { %1917 = vmatprep.mubr.bf16.mxu1 %v10124_v53  ;;  %v10132_v53 = vld [vmem:[%s12913_s2 + $0x220] ss:$8 sps:$4 sm:$0xff]  }
 0x205   :  { %1918 = vmatmul.mubr.bf16.gmra.mrb[100].mxu1 %v10126_v56  ;;  %v11059_v56 = vsel %vm708_vm8, %v10795_v27, %v772_v18 }
 0x206   :  { %1925 = vmatprep.mubr.bf16.mxu1 %v10127_v62 }
 0x20d   :  { %1926 = vmatmul.mubr.bf16.gmra.mrb[104].mxu1 %v10129_v33  ;;  %v775_v33 = vmul.f32 0.2, %v10799_v29 }
 0x20e   :  { %1933 = vmatprep.mubr.bf16.mxu1 %v10130_v44  ;;  %v773_v44 = vmul.f32 0.2, %v10801_v30 }
 0x210   :  { %v11042_v2 = vpop.f32.mrb[0].mxu1  ;;  %v11044_v6 = vpop.f32.mrb[64].mxu0 }
 0x211   :  { %v1721_v47 = vpop.f32.mrb[1].mxu1  ;;  %v1665_v55 = vpop.f32.mrb[65].mxu0 }
 0x212   :  { %v11061_v62 = vpop.f32.mrb[2].mxu1  ;;  %v11066_v17 = vpop.f32.mrb[66].mxu0 }
 0x213   :  { %v1724_v12 = vpop.f32.mrb[3].mxu1  ;;  %v1668_v16 = vpop.f32.mrb[67].mxu0 }
 0x214   :  { %v11095_v12 = vsel %vm710_vm13, %v10805_v32, %v774_v21  ;;  %v11098_v16 = vsel %vm711_vm10, %v10799_v29, %v775_v33  ;;  %v777_v21 = vmul.f32 0.2, %v10815_v36  ;;  %v780_v32 = vmul.f32 0.2, %v10817_v37 }
 0x215   :  { %1934 = vmatmul.mubr.bf16.gmra.mrb[108].mxu1 %v10132_v53  ;;  %v10135_v53 = vld [vmem:[%s12913_s2 + $0x230] ss:$8 sps:$4 sm:$0xff]  }
 0x216   :  { %1941 = vmatprep.mubr.bf16.mxu1 %v10133_v63  ;;  %v11092_v63 = vsel %vm709_vm11, %v10801_v30, %v773_v44  ;;  %v10138_v30 = vld [vmem:[%s12913_s2 + $0x240] ss:$8 sps:$4 sm:$0xff]   ;;  %v11134_v14 = vsel %vm713_vm15, %v10815_v36, %v777_v21  ;;  %v11152_v36 = vsel %vm716_vm2, %v10817_v37, %v780_v32  ;;  %v10141_v37 = vld [vmem:[%s12913_s2 + $0x250] ss:$8 sps:$4 sm:$0xff]   ;;  %vm5971_vm11 = vcmask 523264  }
 0x218   :  { %v11084_v18 = vpop.f32.mrb[4].mxu1  ;;  %v11086_v20 = vpop.f32.mrb[68].mxu0 }
 0x219   :  { %v1729_v47 = vpop.f32.mrb[5].mxu1  ;;  %v1673_v55 = vpop.f32.mrb[69].mxu0 }
 0x21a   :  { %v11103_v25 = vpop.f32.mrb[6].mxu1  ;;  %v10136_v47 = vld [vmem:[%s12913_s2 + $0x244] ss:$8 sps:$4 sm:$0xff]   ;;  %v11108_v19 = vpop.f32.mrb[70].mxu0  ;;  %v778_v55 = vmul.f32 0.2, %v10819_v38 }
 0x21b   :  { %v1732_v33 = vpop.f32.mrb[7].mxu1  ;;  %v1676_v44 = vpop.f32.mrb[71].mxu0 }
 0x21c   :  { %v11137_v13 = vsel %vm714_vm1, %v10819_v38, %v778_v55  ;;  %v10144_v38 = vld [vmem:[%s12913_s2 + $0x260] ss:$8 sps:$4 sm:$0xff]  }
 0x21d   :  { %1942 = vmatmul.mubr.bf16.gmra.mrb[112].mxu1 %v10135_v53 }
 0x21e   :  { %1949 = vmatprep.mubr.bf16.mxu1 %v10136_v47  ;;  %v11140_v47 = vsel %vm715_vm14, %v10810_v34, %v779_v7 }
 0x21f   :  { %12928 = vst [vmem:[#allocation3_spill] sm:$0xff] %v11140_v47 }
 0x220   :  { %v11126_v33 = vpop.f32.mrb[8].mxu1  ;;  %v11128_v53 = vpop.f32.mrb[72].mxu0 }
 0x221   :  { %v1737_v44 = vpop.f32.mrb[9].mxu1  ;;  %v1681_v46 = vpop.f32.mrb[73].mxu0 }
 0x222   :  { %v11142_v9 = vpop.f32.mrb[10].mxu1  ;;  %v10139_v44 = vld [vmem:[%s12913_s2 + $0x254] ss:$8 sps:$4 sm:$0xff]   ;;  %v11147_v54 = vpop.f32.mrb[74].mxu0 }
 0x223   :  { %v1740_v21 = vpop.f32.mrb[11].mxu1  ;;  %v1684_v7 = vpop.f32.mrb[75].mxu0 }
 0x224   :  { %v10142_v7 = vld [vmem:[%s12913_s2 + $0x264] ss:$8 sps:$4 sm:$0xff]  }
 0x225   :  { %1950 = vmatmul.mubr.bf16.gmra.mrb[116].mxu1 %v10138_v30 }
 0x226   :  { %1957 = vmatprep.mubr.bf16.mxu1 %v10139_v44 }
 0x228   :  { %v11160_v4 = vpop.f32.mrb[12].mxu1  ;;  %v11162_v45 = vpop.f32.mrb[76].mxu0 }
 0x229   :  { %v1745_v46 = vpop.f32.mrb[13].mxu1  ;;  %v1689_v32 = vpop.f32.mrb[77].mxu0 }
 0x22a   :  { %v11167_v21 = vpop.f32.mrb[14].mxu1  ;;  %v11169_v1 = vpop.f32.mrb[78].mxu0 }
 0x22b   :  { %v1748_v30 = vpop.f32.mrb[15].mxu1  ;;  %v1692_v55 = vpop.f32.mrb[79].mxu0 }
 0x22c   :  { %v10145_v55 = vld [vmem:[%s12913_s2 + $0x274] ss:$8 sps:$4 sm:$0xff]  }
 0x22d   :  { %1958 = vmatmul.mubr.bf16.gmra.mrb[120].mxu1 %v10141_v37 }
 0x22e   :  { %1965 = vmatprep.mubr.bf16.mxu1 %v10142_v7 }
 0x230   :  { %v11178_v15 = vpop.f32.mrb[16].mxu1  ;;  %v1695_v32 = vpop.f32.mrb[80].mxu0 }
 0x231   :  { %v1753_v26 = vpop.f32.mrb[17].mxu1  ;;  %v1697_v29 = vpop.f32.mrb[81].mxu0 }
 0x232   :  { %v11183_v34 = vpop.f32.mrb[18].mxu1  ;;  %v1698_v30 = vpop.f32.mrb[82].mxu0 }
 0x233   :  { %v1756_v46 = vpop.f32.mrb[19].mxu1  ;;  %v2178_v37 = vpack.c.bf16 %v1698_v30, %v1695_v32  ;;  %v1700_v7 = vpop.f32.mrb[83].mxu0  ;;  %v10148_v32 = vld [vmem:[%s12913_s2 + $0x284] ss:$8 sps:$4 sm:$0xff]  }
 0x235   :  { %1966 = vmatmul.mubr.bf16.gmra.mrb[124].mxu1 %v10144_v38  ;;  %8969 = vmatprep.mubr.msk.bf16.mxu0 %vm2241_vm3, %v2178_v37 }
 0x236   :  { %1973 = vmatprep.mubr.bf16.mxu1 %v10145_v55 }
 0x238   :  { %v11191_v26 = vpop.f32.mrb[20].mxu1  ;;  %v1703_v29 = vpop.f32.mrb[84].mxu0 }
 0x239   :  { %v1761_v31 = vpop.f32.mrb[21].mxu1  ;;  %v1705_v27 = vpop.f32.mrb[85].mxu0 }
 0x23a   :  { %v11196_v47 = vpop.f32.mrb[22].mxu1  ;;  %v1706_v46 = vpop.f32.mrb[86].mxu0  ;;  %v11205_v27 = vsel %vm2254_vm0, %v10857_v50, 0  ;;  %v8321_v31 = vld [vmem:[%s12914_s3 + $0x8] sm:$0xf] }
 0x23b   :  { %v2179_v30 = vpack.c.bf16 %v1706_v46, %v1703_v29  ;;  %v1764_v55 = vpop.f32.mrb[23].mxu1  ;;  %v1708_v37 = vpop.f32.mrb[87].mxu0  ;;  %12929 = vst [vmem:[#allocation4_spill] sm:$0xff] %v11205_v27  ;;  %v10150_v50 = vld [vmem:[%s12913_s2 + $0x280] ss:$8 sps:$4 sm:$0xff]  }
 0x23d   :  { %1974 = vmatmul.mubr.bf16.gmra.mrb[128].mxu1 %v10147_v23  ;;  %8970 = vmatmul.mubr.msk.bf16.vlgmr.msra.gmra.mrb[92].mxu0 %vm2241_vm3, %v2179_v30  ;;  %v10151_v23 = vld [vmem:[%s12913_s2 + $0x294] ss:$8 sps:$4 sm:$0xff]  }
 0x23e   :  { %1981 = vmatprep.mubr.bf16.mxu1 %v10148_v32  ;;  %8978 = vmatpush3.bf16.msra.mxu0 %v11205_v27 }
 0x23f   :  { %9953 = vmatprep.subr.msk.bf16.mxu0 %vm2254_vm0, %v8321_v31 }
 0x240   :  { %v1711_v7 = vpop.f32.mrb[88].mxu0  ;;  %v11213_v29 = vpop.f32.mrb[24].mxu1 }
 0x241   :  { %v1713_v46 = vpop.f32.mrb[89].mxu0  ;;  %v1769_v55 = vpop.f32.mrb[25].mxu1 }
 0x242   :  { %v1714_v37 = vpop.f32.mrb[90].mxu0  ;;  %v11218_v38 = vpop.f32.mrb[26].mxu1  ;;  %v12930_v46 = vpack.c.bf16 %v11061_v62, %v11042_v2  ;;  %v12931_v55 = vpack.c.bf16 %v11066_v17, %v11044_v6  ;;  %v10154_v2 = vld [vmem:[%s12913_s2 + $0x2a4] ss:$8 sps:$4 sm:$0xff]   ;;  %v12932_v17 = vpack.c.bf16 %v11108_v19, %v11086_v20  ;;  %v10157_v19 = vld [vmem:[%s12913_s2 + $0x2b4] ss:$8 sps:$4 sm:$0xff]  }
 0x243   :  { %v2180_v32 = vpack.c.bf16 %v1714_v37, %v1711_v7  ;;  %v2187_v30 = vpack.c.bf16 %v11218_v38, %v11213_v29  ;;  %v1772_v44 = vpop.f32.mrb[27].mxu1  ;;  %v1716_v27 = vpop.f32.mrb[91].mxu0  ;;  %v8326_v6 = vld [vmem:[%s12914_s3 + $0xc] sm:$0xf]  ;;  %v10169_v38 = vld [vmem:[%s12913_s2 + $0x2f4] ss:$8 sps:$4 sm:$0xff]  }
 0x244   :  { %v10153_v44 = vld [vmem:[%s12913_s2 + $0x290] ss:$8 sps:$4 sm:$0xff]  }
 0x245   :  { %1982 = vmatmul.mubr.bf16.gmra.mrb[132].mxu1 %v10150_v50  ;;  %8973 = vmatprep.mubr.msk.bf16.mxu0 %vm2241_vm3, %v2180_v32  ;;  %v12933_v32 = vpack.c.bf16 %v11147_v54, %v11128_v53  ;;  %v12934_v54 = vpack.c.bf16 %v11169_v1, %v11162_v45  ;;  %v12935_v53 = vpack.c.bf16 %v11103_v25, %v11084_v18  ;;  %v8331_v25 = vld [vmem:[%s12914_s3 + $0x10] sm:$0xf] }
 0x246   :  { %8974 = vmatmul.mubr.msk.bf16.gmra.mrb[96].mxu0 %vm2241_vm3, %v12930_v46  ;;  %1989 = vmatprep.mubr.bf16.mxu1 %v10151_v23  ;;  %v11244_v23 = vsel %vm2254_vm0, %v8321_v31, 0  ;;  %v12936_v18 = vpack.c.bf16 %v11142_v9, %v11126_v33  ;;  %v10163_v9 = vld [vmem:[%s12913_s2 + $0x2d4] ss:$8 sps:$4 sm:$0xff]  }
 0x247   :  { %8979 = vmatprep.mubr.msk.bf16.mxu0 %vm2241_vm3, %v12931_v55  ;;  %v10156_v55 = vld [vmem:[%s12913_s2 + $0x2a0] ss:$8 sps:$4 sm:$0xff]  }
 0x248   :  { %v11234_v7 = vpop.f32.mrb[28].mxu1 }
 0x249   :  { %v1777_v37 = vpop.f32.mrb[29].mxu1 }
 0x24a   :  { %v1778_v27 = vpop.f32.mrb[30].mxu1 }
 0x24b   :  { %v2188_v62 = vpack.c.bf16 %v1778_v27, %v11234_v7  ;;  %v1780_v50 = vpop.f32.mrb[31].mxu1 }
 0x24d   :  { %1990 = vmatmul.mubr.bf16.gmra.mrb[136].mxu1 %v10153_v44 }
 0x24e   :  { %8980 = vmatmul.mubr.msk.bf16.vlgmr.msra.gmra.mrb[92].mxu0 %vm2241_vm3, %v12932_v17  ;;  %1997 = vmatprep.mubr.bf16.mxu1 %v10154_v2  ;;  %v10159_v2 = vld [vmem:[%s12913_s2 + $0x2b0] ss:$8 sps:$4 sm:$0xff]   ;;  %v10160_v17 = vld [vmem:[%s12913_s2 + $0x2c4] ss:$8 sps:$4 sm:$0xff]  }
 0x24f   :  { %8983 = vmatprep.mubr.msk.bf16.mxu0 %vm2241_vm3, %v12933_v32  ;;  %8988 = vmatpush3.bf16.msra.mxu0 %v11244_v23  ;;  %v11280_v32 = vsel %vm2254_vm0, %v8326_v6, 0 }
 0x250   :  { %v1783_v31 = vpop.f32.mrb[32].mxu1  ;;  %9954 = vmatprep.subr.msk.bf16.mxu0 %vm2254_vm0, %v8326_v6 }
 0x251   :  { %v1785_v46 = vpop.f32.mrb[33].mxu1 }
 0x252   :  { %v1786_v7 = vpop.f32.mrb[34].mxu1 }
 0x253   :  { %v2189_v20 = vpack.c.bf16 %v1786_v7, %v1783_v31  ;;  %v1788_v37 = vpop.f32.mrb[35].mxu1  ;;  %v12937_v31 = vpack.c.bf16 %v11167_v21, %v11160_v4  ;;  %v12938_v4 = vpack.c.bf16 %v11183_v34, %v11178_v15  ;;  %v12939_v21 = vpack.c.bf16 %v11196_v47, %v11191_v26  ;;  %v8336_v47 = vld [vmem:[%s12914_s3 + $0x14] sm:$0xf] }
 0x255   :  { %1998 = vmatmul.mubr.bf16.gmra.mrb[140].mxu1 %v10156_v55  ;;  %v10162_v55 = vld [vmem:[%s12913_s2 + $0x2c0] ss:$8 sps:$4 sm:$0xff]  }
 0x256   :  { %8984 = vmatmul.mubr.msk.bf16.gmra.mrb[96].mxu0 %vm2241_vm3, %v12934_v54  ;;  %2005 = vmatprep.mubr.bf16.mxu1 %v10157_v19 }
 0x257   :  { %8989 = vmatprep.mubr.msk.bf16.mxu0 %vm2241_vm3, %v12935_v53  ;;  %v10165_v53 = vld [vmem:[%s12913_s2 + $0x2d0] ss:$8 sps:$4 sm:$0xff]  }
 0x258   :  { %v1791_v44 = vpop.f32.mrb[36].mxu1 }
 0x259   :  { %v1793_v27 = vpop.f32.mrb[37].mxu1 }
 0x25a   :  { %v1794_v50 = vpop.f32.mrb[38].mxu1  ;;  %v10166_v27 = vld [vmem:[%s12913_s2 + $0x2e4] ss:$8 sps:$4 sm:$0xff]  }
 0x25b   :  { %v2190_v1 = vpack.c.bf16 %v1794_v50, %v1791_v44  ;;  %v1796_v45 = vpop.f32.mrb[39].mxu1 }
 0x25d   :  { %2006 = vmatmul.mubr.bf16.gmra.mrb[144].mxu1 %v10159_v2  ;;  %v11316_v2 = vsel %vm2254_vm0, %v8331_v25, 0 }
 0x25e   :  { %8990 = vmatmul.mubr.msk.bf16.vlgmr.msra.gmra.mrb[92].mxu0 %vm2241_vm3, %v12936_v18  ;;  %2013 = vmatprep.mubr.bf16.mxu1 %v10160_v17  ;;  %v10168_v17 = vld [vmem:[%s12913_s2 + $0x2e0] ss:$8 sps:$4 sm:$0xff]   ;;  %v10171_v18 = vld [vmem:[%s12913_s2 + $0x2f0] ss:$8 sps:$4 sm:$0xff]  }
 0x25f   :  { %8993 = vmatprep.mubr.msk.bf16.mxu0 %vm2241_vm3, %v12937_v31  ;;  %8998 = vmatpush3.bf16.msra.mxu0 %v11280_v32 }
 0x260   :  { %v1799_v6 = vpop.f32.mrb[40].mxu1  ;;  %9955 = vmatprep.subr.msk.bf16.mxu0 %vm2254_vm0, %v8331_v25 }
 0x261   :  { %v1801_v46 = vpop.f32.mrb[41].mxu1 }
 0x262   :  { %v1802_v7 = vpop.f32.mrb[42].mxu1 }
 0x263   :  { %v2191_v33 = vpack.c.bf16 %v1802_v7, %v1799_v6  ;;  %v1804_v19 = vpop.f32.mrb[43].mxu1  ;;  %v10172_v6 = vld [vmem:[%s12913_s2 + $0x304] ss:$8 sps:$4 sm:$0xff]   ;;  %v11343_v7 = vsel %vm2254_vm0, %v8336_v47, 0 }
 0x264   :  { %v10174_v19 = vld [vmem:[%s12913_s2 + $0x300] ss:$8 sps:$4 sm:$0xff]  }
 0x265   :  { %2014 = vmatmul.mubr.bf16.gmra.mrb[148].mxu1 %v10162_v55 }
 0x266   :  { %8994 = vmatmul.mubr.msk.bf16.gmra.mrb[96].mxu0 %vm2241_vm3, %v12938_v4  ;;  %2021 = vmatprep.mubr.bf16.mxu1 %v10163_v9 }
 0x267   :  { %8999 = vmatprep.mubr.msk.bf16.mxu0 %vm2241_vm3, %v12939_v21  ;;  %v10175_v21 = vld [vmem:[%s12913_s2 + $0x314] ss:$8 sps:$4 sm:$0xff]  }
 0x268   :  { %v1807_v37 = vpop.f32.mrb[44].mxu1 }
 0x269   :  { %v1809_v54 = vpop.f32.mrb[45].mxu1 }
 0x26a   :  { %v1810_v44 = vpop.f32.mrb[46].mxu1 }
 0x26b   :  { %v2192_v15 = vpack.c.bf16 %v1810_v44, %v1807_v37  ;;  %v1812_v34 = vpop.f32.mrb[47].mxu1  ;;  %v10177_v44 = vld [vmem:[%s12913_s2 + $0x310] ss:$8 sps:$4 sm:$0xff]  }
 0x26d   :  { %2022 = vmatmul.mubr.bf16.gmra.mrb[152].mxu1 %v10165_v53 }
 0x26e   :  { %9000 = vmatmul.mubr.msk.bf16.vlgmr.msra.gmra.mrb[92].mxu0 %vm2241_vm3, %v2187_v30  ;;  %2029 = vmatprep.mubr.bf16.mxu1 %v10166_v27 }
 0x26f   :  { %9003 = vmatprep.mubr.msk.bf16.mxu0 %vm2241_vm3, %v2188_v62  ;;  %9008 = vmatpush3.bf16.msra.mxu0 %v11316_v2 }
 0x270   :  { %v1815_v26 = vpop.f32.mrb[48].mxu1  ;;  %9956 = vmatprep.subr.msk.bf16.mxu0 %vm2254_vm0, %v8336_v47 }
 0x271   :  { %v1817_v50 = vpop.f32.mrb[49].mxu1 }
 0x272   :  { %v1818_v45 = vpop.f32.mrb[50].mxu1  ;;  %v8346_v50 = vld [vmem:[%s12914_s3 + $0x1c] sm:$0xf] }
 0x273   :  { %v2193_v29 = vpack.c.bf16 %v1818_v45, %v1815_v26  ;;  %v1820_v30 = vpop.f32.mrb[51].mxu1 }
 0x274   :  { %v10181_v30 = vld [vmem:[%s12913_s2 + $0x334] ss:$8 sps:$4 sm:$0xff]  }
 0x275   :  { %2030 = vmatmul.mubr.bf16.gmra.mrb[156].mxu1 %v10168_v17 }
 0x276   :  { %9004 = vmatmul.mubr.msk.bf16.gmra.mrb[96].mxu0 %vm2241_vm3, %v2189_v20  ;;  %2037 = vmatprep.mubr.bf16.mxu1 %v10169_v38  ;;  %v8341_v20 = vld [vmem:[%s12914_s3 + $0x18] sm:$0xf]  ;;  %v10180_v38 = vld [vmem:[%s12913_s2 + $0x320] ss:$8 sps:$4 sm:$0xff]  }
 0x277   :  { %9009 = vmatprep.mubr.msk.bf16.mxu0 %vm2241_vm3, %v2190_v1  ;;  %v11367_v26 = vsel %vm2254_vm0, %v8341_v20, 0 }
 0x278   :  { %v1823_v62 = vpop.f32.mrb[52].mxu1 }
 0x279   :  { %v1825_v25 = vpop.f32.mrb[53].mxu1 }
 0x27a   :  { %v1826_v31 = vpop.f32.mrb[54].mxu1 }
 0x27b   :  { %v2194_v46 = vpack.c.bf16 %v1826_v31, %v1823_v62  ;;  %v1828_v55 = vpop.f32.mrb[55].mxu1 }
 0x27c   :  { %v10184_v55 = vld [vmem:[%s12913_s2 + $0x344] ss:$8 sps:$4 sm:$0xff]  }
 0x27d   :  { %2038 = vmatmul.mubr.bf16.gmra.mrb[160].mxu1 %v10171_v18 }
 0x27e   :  { %9010 = vmatmul.mubr.msk.bf16.vlgmr.msra.gmra.mrb[92].mxu0 %vm2241_vm3, %v2191_v33  ;;  %2045 = vmatprep.mubr.bf16.mxu1 %v10172_v6  ;;  %v10183_v6 = vld [vmem:[%s12913_s2 + $0x330] ss:$8 sps:$4 sm:$0xff]  }
 0x27f   :  { %9013 = vmatprep.mubr.msk.bf16.mxu0 %vm2241_vm3, %v2192_v15  ;;  %9018 = vmatpush3.bf16.msra.mxu0 %v11343_v7  ;;  %v10178_v15 = vld [vmem:[%s12913_s2 + $0x324] ss:$8 sps:$4 sm:$0xff]  }
 0x280   :  { %v1831_v1 = vpop.f32.mrb[56].mxu1  ;;  %9957 = vmatprep.subr.msk.bf16.mxu0 %vm2254_vm0, %v8341_v20 }
 0x281   :  { %v1833_v9 = vpop.f32.mrb[57].mxu1 }
 0x282   :  { %v1834_v4 = vpop.f32.mrb[58].mxu1 }
 0x283   :  { %v2195_v37 = vpack.c.bf16 %v1834_v4, %v1831_v1  ;;  %v1836_v33 = vpop.f32.mrb[59].mxu1  ;;  %v10186_v4 = vld [vmem:[%s12913_s2 + $0x340] ss:$8 sps:$4 sm:$0xff]  }
 0x285   :  { %2046 = vmatmul.mubr.bf16.gmra.mrb[164].mxu1 %v10174_v19 }
 0x286   :  { %9014 = vmatmul.mubr.msk.bf16.gmra.mrb[96].mxu0 %vm2241_vm3, %v2193_v29  ;;  %2053 = vmatprep.mubr.bf16.mxu1 %v10175_v21 }
 0x287   :  { %9019 = vmatprep.mubr.msk.bf16.mxu0 %vm2241_vm3, %v2194_v46 }
 0x288   :  { %v1839_v54 = vpop.f32.mrb[60].mxu1 }
 0x289   :  { %v1841_v53 = vpop.f32.mrb[61].mxu1 }
 0x28a   :  { %v1842_v27 = vpop.f32.mrb[62].mxu1  ;;  %v11397_v53 = vsel %vm2254_vm0, %v8346_v50, 0 }
 0x28b   :  { %v2196_v34 = vpack.c.bf16 %v1842_v27, %v1839_v54  ;;  %v1844_v47 = vpop.f32.mrb[63].mxu1 }
 0x28d   :  { %2054 = vmatmul.mubr.bf16.gmra.mrb[168].mxu1 %v10177_v44  ;;  %v8351_v44 = vld [vmem:[%s12914_s3 + $0x20] sm:$0xf] }
 0x28e   :  { %9020 = vmatmul.mubr.msk.bf16.vlgmr.msra.gmra.mrb[92].mxu0 %vm2241_vm3, %v2195_v37  ;;  %2061 = vmatprep.mubr.bf16.mxu1 %v10178_v15  ;;  %v10187_v37 = vld [vmem:[%s12913_s2 + $0x354] ss:$8 sps:$4 sm:$0xff]  }
 0x28f   :  { %9023 = vmatprep.mubr.msk.bf16.mxu0 %vm2241_vm3, %v2196_v34  ;;  %9028 = vmatpush3.bf16.msra.mxu0 %v11367_v26  ;;  %v10189_v34 = vld [vmem:[%s12913_s2 + $0x350] ss:$8 sps:$4 sm:$0xff]  }
 0x290   :  { %v1847_v17 = vpop.f32.mrb[64].mxu1  ;;  %9958 = vmatprep.subr.msk.bf16.mxu0 %vm2254_vm0, %v8346_v50  ;;  %v10190_v50 = vld [vmem:[%s12913_s2 + $0x364] ss:$8 sps:$4 sm:$0xff]  }
 0x291   :  { %v1849_v45 = vpop.f32.mrb[65].mxu1 }
 0x292   :  { %v1850_v29 = vpop.f32.mrb[66].mxu1 }
 0x293   :  { %v2197_v62 = vpack.c.bf16 %v1850_v29, %v1847_v17  ;;  %v1852_v25 = vpop.f32.mrb[67].mxu1 }
 0x294   :  { %v10193_v25 = vld [vmem:[%s12913_s2 + $0x374] ss:$8 sps:$4 sm:$0xff]  }
 0x295   :  { %2062 = vmatmul.mubr.bf16.gmra.mrb[172].mxu1 %v10180_v38 }
 0x296   :  { %9024 = vmatmul.mubr.msk.bf16.gmra.mrb[96].mxu0 %vm2241_vm3, %v2197_v62  ;;  %2069 = vmatprep.mubr.bf16.mxu1 %v10181_v30  ;;  %v10192_v30 = vld [vmem:[%s12913_s2 + $0x360] ss:$8 sps:$4 sm:$0xff]  }
 0x298   :  { %v1855_v18 = vpop.f32.mrb[68].mxu1 }
 0x299   :  { %v1857_v31 = vpop.f32.mrb[69].mxu1 }
 0x29a   :  { %v1858_v46 = vpop.f32.mrb[70].mxu1 }
 0x29b   :  { %v2198_v20 = vpack.c.bf16 %v1858_v46, %v1855_v18  ;;  %v1860_v1 = vpop.f32.mrb[71].mxu1 }
 0x29c   :  { %v10196_v1 = vld [vmem:[%s12913_s2 + $0x384] ss:$8 sps:$4 sm:$0xff]  }
 0x29d   :  { %2070 = vmatmul.mubr.bf16.gmra.mrb[176].mxu1 %v10183_v6  ;;  %9029 = vmatprep.mubr.msk.bf16.mxu0 %vm2241_vm3, %v2198_v20 }
 0x29e   :  { %2077 = vmatprep.mubr.bf16.mxu1 %v10184_v55  ;;  %v10195_v55 = vld [vmem:[%s12913_s2 + $0x370] ss:$8 sps:$4 sm:$0xff]  }
 0x2a0   :  { %v1863_v9 = vpop.f32.mrb[72].mxu1 }
 0x2a1   :  { %v1865_v19 = vpop.f32.mrb[73].mxu1 }
 0x2a2   :  { %v1866_v21 = vpop.f32.mrb[74].mxu1 }
 0x2a3   :  { %v2199_v33 = vpack.c.bf16 %v1866_v21, %v1863_v9  ;;  %v1868_v54 = vpop.f32.mrb[75].mxu1 }
 0x2a4   :  { %v10199_v54 = vld [vmem:[%s12913_s2 + $0x394] ss:$8 sps:$4 sm:$0xff]  }
 0x2a5   :  { %2078 = vmatmul.mubr.bf16.gmra.mrb[180].mxu1 %v10186_v4  ;;  %9030 = vmatmul.mubr.msk.bf16.vlgmr.msra.gmra.mrb[92].mxu0 %vm2241_vm3, %v2199_v33 }
 0x2a6   :  { %2085 = vmatprep.mubr.bf16.mxu1 %v10187_v37  ;;  %9038 = vmatpush3.bf16.msra.mxu0 %v11397_v53  ;;  %v10198_v37 = vld [vmem:[%s12913_s2 + $0x380] ss:$8 sps:$4 sm:$0xff]  }
 0x2a7   :  { %9959 = vmatprep.subr.msk.bf16.mxu0 %vm2254_vm0, %v8351_v44 }
 0x2a8   :  { %v1871_v27 = vpop.f32.mrb[76].mxu1 }
 0x2a9   :  { %v1873_v15 = vpop.f32.mrb[77].mxu1 }
 0x2aa   :  { %v1874_v47 = vpop.f32.mrb[78].mxu1 }
 0x2ab   :  { %v2200_v17 = vpack.c.bf16 %v1874_v47, %v1871_v27  ;;  %v1876_v45 = vpop.f32.mrb[79].mxu1  ;;  %v8356_v47 = vld [vmem:[%s12914_s3 + $0x24] sm:$0xf] }
 0x2ac   :  { %v10201_v45 = vld [vmem:[%s12913_s2 + $0x390] ss:$8 sps:$4 sm:$0xff]  }
 0x2ad   :  { %2086 = vmatmul.mubr.bf16.gmra.mrb[184].mxu1 %v10189_v34  ;;  %9033 = vmatprep.mubr.msk.bf16.mxu0 %vm2241_vm3, %v2200_v17  ;;  %v11433_v34 = vsel %vm2254_vm0, %v8351_v44, 0 }
 0x2ae   :  { %2093 = vmatprep.mubr.bf16.mxu1 %v10190_v50 }
 0x2b0   :  { %v1879_v38 = vpop.f32.mrb[80].mxu1 }
 0x2b1   :  { %v1881_v29 = vpop.f32.mrb[81].mxu1 }
 0x2b2   :  { %v1882_v62 = vpop.f32.mrb[82].mxu1 }
 0x2b3   :  { %v2201_v18 = vpack.c.bf16 %v1882_v62, %v1879_v38  ;;  %v1884_v31 = vpop.f32.mrb[83].mxu1  ;;  %v10202_v38 = vld [vmem:[%s12913_s2 + $0x3a4] ss:$8 sps:$4 sm:$0xff]  }
 0x2b5   :  { %2094 = vmatmul.mubr.bf16.gmra.mrb[188].mxu1 %v10192_v30  ;;  %9034 = vmatmul.mubr.msk.bf16.gmra.mrb[96].mxu0 %vm2241_vm3, %v2201_v18  ;;  %v10204_v18 = vld [vmem:[%s12913_s2 + $0x3a0] ss:$8 sps:$4 sm:$0xff]  }
 0x2b6   :  { %2101 = vmatprep.mubr.bf16.mxu1 %v10193_v25 }
 0x2b8   :  { %v1887_v6 = vpop.f32.mrb[84].mxu1 }
 0x2b9   :  { %v1889_v46 = vpop.f32.mrb[85].mxu1 }
 0x2ba   :  { %v1890_v20 = vpop.f32.mrb[86].mxu1 }
 0x2bb   :  { %v2202_v9 = vpack.c.bf16 %v1890_v20, %v1887_v6  ;;  %v1892_v19 = vpop.f32.mrb[87].mxu1  ;;  %v10205_v6 = vld [vmem:[%s12913_s2 + $0x3b4] ss:$8 sps:$4 sm:$0xff]  }
 0x2bd   :  { %2102 = vmatmul.mubr.bf16.gmra.mrb[192].mxu1 %v10195_v55  ;;  %9039 = vmatprep.mubr.msk.bf16.mxu0 %vm2241_vm3, %v2202_v9  ;;  %v10207_v9 = vld [vmem:[%s12913_s2 + $0x3b0] ss:$8 sps:$4 sm:$0xff]  }
 0x2be   :  { %2109 = vmatprep.mubr.bf16.mxu1 %v10196_v1 }
 0x2c0   :  { %v1895_v4 = vpop.f32.mrb[88].mxu1 }
 0x2c1   :  { %v1897_v21 = vpop.f32.mrb[89].mxu1 }
 0x2c2   :  { %v1898_v33 = vpop.f32.mrb[90].mxu1 }
 0x2c3   :  { %v2203_v27 = vpack.c.bf16 %v1898_v33, %v1895_v4  ;;  %v1900_v15 = vpop.f32.mrb[91].mxu1  ;;  %v10208_v4 = vld [vmem:[%s12913_s2 + $0x3c4] ss:$8 sps:$4 sm:$0xff]  }
 0x2c5   :  { %2110 = vmatmul.mubr.bf16.gmra.mrb[196].mxu1 %v10198_v37  ;;  %9040 = vmatmul.mubr.msk.bf16.vlgmr.msra.gmra.mrb[92].mxu0 %vm2241_vm3, %v2203_v27  ;;  %v10210_v27 = vld [vmem:[%s12913_s2 + $0x3c0] ss:$8 sps:$4 sm:$0xff]  }
 0x2c6   :  { %2117 = vmatprep.mubr.bf16.mxu1 %v10199_v54  ;;  %9048 = vmatpush3.bf16.msra.mxu0 %v11433_v34 }
 0x2c7   :  { %9960 = vmatprep.subr.msk.bf16.mxu0 %vm2254_vm0, %v8356_v47 }
 0x2c8   :  { %v1903_v50 = vpop.f32.mrb[92].mxu1 }
 0x2c9   :  { %v1905_v17 = vpop.f32.mrb[93].mxu1 }
 0x2ca   :  { %v1906_v44 = vpop.f32.mrb[94].mxu1 }
 0x2cb   :  { %v2204_v29 = vpack.c.bf16 %v1906_v44, %v1903_v50  ;;  %v1908_v30 = vpop.f32.mrb[95].mxu1  ;;  %v10211_v50 = vld [vmem:[%s12913_s2 + $0x3d4] ss:$8 sps:$4 sm:$0xff]   ;;  %v11469_v44 = vsel %vm2254_vm0, %v8356_v47, 0 }
 0x2cd   :  { %2118 = vmatmul.mubr.bf16.gmra.mrb[200].mxu1 %v10201_v45  ;;  %9043 = vmatprep.mubr.msk.bf16.mxu0 %vm2241_vm3, %v2204_v29 }
 0x2ce   :  { %2125 = vmatprep.mubr.bf16.mxu1 %v10202_v38  ;;  %v8361_v38 = vld [vmem:[%s12914_s3 + $0x28] sm:$0xf] }
 0x2d0   :  { %v1911_v62 = vpop.f32.mrb[96].mxu1 }
 0x2d1   :  { %v1913_v25 = vpop.f32.mrb[97].mxu1 }
 0x2d2   :  { %v1914_v31 = vpop.f32.mrb[98].mxu1  ;;  %v10214_v25 = vld [vmem:[%s12913_s2 + $0x3e4] ss:$8 sps:$4 sm:$0xff]  }
 0x2d3   :  { %v2205_v46 = vpack.c.bf16 %v1914_v31, %v1911_v62  ;;  %v1916_v55 = vpop.f32.mrb[99].mxu1  ;;  %v10213_v62 = vld [vmem:[%s12913_s2 + $0x3d0] ss:$8 sps:$4 sm:$0xff]  }
 0x2d4   :  { %v10216_v55 = vld [vmem:[%s12913_s2 + $0x3e0] ss:$8 sps:$4 sm:$0xff]  }
 0x2d5   :  { %2126 = vmatmul.mubr.bf16.gmra.mrb[204].mxu1 %v10204_v18  ;;  %9044 = vmatmul.mubr.msk.bf16.gmra.mrb[96].mxu0 %vm2241_vm3, %v2205_v46 }
 0x2d6   :  { %2133 = vmatprep.mubr.bf16.mxu1 %v10205_v6 }
 0x2d8   :  { %v1919_v20 = vpop.f32.mrb[100].mxu1 }
 0x2d9   :  { %v1921_v1 = vpop.f32.mrb[101].mxu1 }
 0x2da   :  { %v1922_v19 = vpop.f32.mrb[102].mxu1  ;;  %v10217_v1 = vld [vmem:[%s12913_s2 + $0x3f4] ss:$8 sps:$4 sm:$0xff]  }
 0x2db   :  { %v2206_v21 = vpack.c.bf16 %v1922_v19, %v1919_v20  ;;  %v1924_v37 = vpop.f32.mrb[103].mxu1 }
 0x2dc   :  { %v10219_v37 = vld [vmem:[%s12913_s2 + $0x3f0] ss:$8 sps:$4 sm:$0xff]  }
 0x2dd   :  { %2134 = vmatmul.mubr.bf16.gmra.mrb[208].mxu1 %v10207_v9  ;;  %9049 = vmatprep.mubr.msk.bf16.mxu0 %vm2241_vm3, %v2206_v21 }
 0x2de   :  { %2141 = vmatprep.mubr.bf16.mxu1 %v10208_v4 }
 0x2e0   :  { %v1927_v33 = vpop.f32.mrb[104].mxu1 }
 0x2e1   :  { %v1929_v54 = vpop.f32.mrb[105].mxu1 }
 0x2e2   :  { %v1930_v15 = vpop.f32.mrb[106].mxu1 }
 0x2e3   :  { %v2207_v17 = vpack.c.bf16 %v1930_v15, %v1927_v33  ;;  %v1932_v45 = vpop.f32.mrb[107].mxu1 }
 0x2e5   :  { %2142 = vmatmul.mubr.bf16.gmra.mrb[212].mxu1 %v10210_v27  ;;  %9050 = vmatmul.mubr.msk.bf16.vlgmr.msra.gmra.mrb[92].mxu0 %vm2241_vm3, %v2207_v17 }
 0x2e6   :  { %2149 = vmatprep.mubr.bf16.mxu1 %v10211_v50  ;;  %9058 = vmatpush3.bf16.msra.mxu0 %v11469_v44 }
 0x2e7   :  { %9961 = vmatprep.subr.msk.bf16.mxu0 %vm2254_vm0, %v8361_v38 }
 0x2e8   :  { %v1935_v29 = vpop.f32.mrb[108].mxu1 }
 0x2e9   :  { %v1937_v30 = vpop.f32.mrb[109].mxu1 }
 0x2ea   :  { %v1938_v47 = vpop.f32.mrb[110].mxu1  ;;  %v11496_v30 = vsel %vm2254_vm0, %v8361_v38, 0 }
 0x2eb   :  { %v2208_v18 = vpack.c.bf16 %v1938_v47, %v1935_v29  ;;  %v1940_v31 = vpop.f32.mrb[111].mxu1 }
 0x2ed   :  { %2150 = vmatmul.mubr.bf16.gmra.mrb[216].mxu1 %v10213_v62  ;;  %9053 = vmatprep.mubr.msk.bf16.mxu0 %vm2241_vm3, %v2208_v18  ;;  %v8366_v62 = vld [vmem:[%s12914_s3 + $0x2c] sm:$0xf] }
 0x2ee   :  { %2157 = vmatprep.mubr.bf16.mxu1 %v10214_v25 }
 0x2f0   :  { %v1943_v6 = vpop.f32.mrb[112].mxu1 }
 0x2f1   :  { %v1945_v46 = vpop.f32.mrb[113].mxu1 }
 0x2f2   :  { %v1946_v20 = vpop.f32.mrb[114].mxu1 }
 0x2f3   :  { %v2209_v9 = vpack.c.bf16 %v1946_v20, %v1943_v6  ;;  %v1948_v19 = vpop.f32.mrb[115].mxu1 }
 0x2f5   :  { %2158 = vmatmul.mubr.bf16.gmra.mrb[220].mxu1 %v10216_v55  ;;  %9054 = vmatmul.mubr.msk.bf16.gmra.mrb[96].mxu0 %vm2241_vm3, %v2209_v9 }
 0x2f6   :  { %2165 = vmatprep.mubr.bf16.mxu1 %v10217_v1 }
 0x2f8   :  { %v1951_v4 = vpop.f32.mrb[116].mxu1 }
 0x2f9   :  { %v1953_v21 = vpop.f32.mrb[117].mxu1 }
 0x2fa   :  { %v1954_v33 = vpop.f32.mrb[118].mxu1 }
 0x2fb   :  { %v2210_v54 = vpack.c.bf16 %v1954_v33, %v1951_v4  ;;  %v1956_v27 = vpop.f32.mrb[119].mxu1 }
 0x2fd   :  { %2166 = vmatmul.mubr.bf16.gmra.mrb[224].mxu1 %v10219_v37  ;;  %9059 = vmatprep.mubr.msk.bf16.mxu0 %vm2241_vm3, %v2210_v54 }
 0x300   :  { %v1959_v15 = vpop.f32.mrb[120].mxu1 }
 0x301   :  { %v1961_v50 = vpop.f32.mrb[121].mxu1 }
 0x302   :  { %v1962_v17 = vpop.f32.mrb[122].mxu1 }
 0x303   :  { %v2211_v45 = vpack.c.bf16 %v1962_v17, %v1959_v15  ;;  %v1964_v29 = vpop.f32.mrb[123].mxu1  ;;  %v11508_v17 = vsel %vm2254_vm0, %v8366_v62, 0 }
 0x305   :  { %9060 = vmatmul.mubr.msk.bf16.vlgmr.msra.gmra.mrb[92].mxu0 %vm2241_vm3, %v2211_v45  ;;  %v8371_v45 = vld [vmem:[%s12914_s3 + $0x30] sm:$0xf] }
 0x306   :  { %9068 = vmatpush3.bf16.msra.mxu0 %v11496_v30 }
 0x307   :  { %9962 = vmatprep.subr.msk.bf16.mxu0 %vm2254_vm0, %v8366_v62 }
 0x308   :  { %v1967_v47 = vpop.f32.mrb[124].mxu1 }
 0x309   :  { %v1969_v25 = vpop.f32.mrb[125].mxu1 }
 0x30a   :  { %v1970_v18 = vpop.f32.mrb[126].mxu1 }
 0x30b   :  { %v2212_v31 = vpack.c.bf16 %v1970_v18, %v1967_v47  ;;  %v1972_v6 = vpop.f32.mrb[127].mxu1 }
 0x30d   :  { %9063 = vmatprep.mubr.msk.bf16.mxu0 %vm2241_vm3, %v2212_v31 }
 0x310   :  { %v1975_v46 = vpop.f32.mrb[128].mxu1 }
 0x311   :  { %v1977_v38 = vpop.f32.mrb[129].mxu1 }
 0x312   :  { %v1978_v55 = vpop.f32.mrb[130].mxu1 }
 0x313   :  { %v2213_v20 = vpack.c.bf16 %v1978_v55, %v1975_v46  ;;  %v1980_v1 = vpop.f32.mrb[131].mxu1 }
 0x315   :  { %9064 = vmatmul.mubr.msk.bf16.gmra.mrb[96].mxu0 %vm2241_vm3, %v2213_v20 }
 0x318   :  { %v1983_v9 = vpop.f32.mrb[132].mxu1 }
 0x319   :  { %v1985_v19 = vpop.f32.mrb[133].mxu1 }
 0x31a   :  { %v1986_v4 = vpop.f32.mrb[134].mxu1 }
 0x31b   :  { %v2214_v21 = vpack.c.bf16 %v1986_v4, %v1983_v9  ;;  %v1988_v37 = vpop.f32.mrb[135].mxu1 }
 0x31d   :  { %9069 = vmatprep.mubr.msk.bf16.mxu0 %vm2241_vm3, %v2214_v21 }
 0x320   :  { %v1991_v33 = vpop.f32.mrb[136].mxu1 }
 0x321   :  { %v1993_v54 = vpop.f32.mrb[137].mxu1 }
 0x322   :  { %v1994_v27 = vpop.f32.mrb[138].mxu1 }
 0x323   :  { %v2215_v15 = vpack.c.bf16 %v1994_v27, %v1991_v33  ;;  %v1996_v50 = vpop.f32.mrb[139].mxu1 }
 0x324   :  { %v8376_v50 = vld [vmem:[%s12914_s3 + $0x34] sm:$0xf] }
 0x325   :  { %9070 = vmatmul.mubr.msk.bf16.vlgmr.msra.gmra.mrb[92].mxu0 %vm2241_vm3, %v2215_v15  ;;  %v11520_v15 = vsel %vm2254_vm0, %v8371_v45, 0 }
 0x326   :  { %9078 = vmatpush3.bf16.msra.mxu0 %v11508_v17 }
 0x327   :  { %9963 = vmatprep.subr.msk.bf16.mxu0 %vm2254_vm0, %v8371_v45 }
 0x328   :  { %v1999_v29 = vpop.f32.mrb[140].mxu1 }
 0x329   :  { %v2001_v47 = vpop.f32.mrb[141].mxu1 }
 0x32a   :  { %v2002_v25 = vpop.f32.mrb[142].mxu1 }
 0x32b   :  { %v2216_v18 = vpack.c.bf16 %v2002_v25, %v1999_v29  ;;  %v2004_v31 = vpop.f32.mrb[143].mxu1 }
 0x32d   :  { %9073 = vmatprep.mubr.msk.bf16.mxu0 %vm2241_vm3, %v2216_v18 }
 0x330   :  { %v2007_v6 = vpop.f32.mrb[144].mxu1 }
 0x331   :  { %v2009_v62 = vpop.f32.mrb[145].mxu1 }
 0x332   :  { %v2010_v46 = vpop.f32.mrb[146].mxu1 }
 0x333   :  { %v2217_v38 = vpack.c.bf16 %v2010_v46, %v2007_v6  ;;  %v2012_v55 = vpop.f32.mrb[147].mxu1 }
 0x335   :  { %9074 = vmatmul.mubr.msk.bf16.gmra.mrb[96].mxu0 %vm2241_vm3, %v2217_v38 }
 0x338   :  { %v2015_v20 = vpop.f32.mrb[148].mxu1 }
 0x339   :  { %v2017_v1 = vpop.f32.mrb[149].mxu1 }
 0x33a   :  { %v2018_v9 = vpop.f32.mrb[150].mxu1 }
 0x33b   :  { %v2218_v19 = vpack.c.bf16 %v2018_v9, %v2015_v20  ;;  %v2020_v4 = vpop.f32.mrb[151].mxu1 }
 0x33d   :  { %9079 = vmatprep.mubr.msk.bf16.mxu0 %vm2241_vm3, %v2218_v19 }
 0x340   :  { %v2023_v21 = vpop.f32.mrb[152].mxu1 }
 0x341   :  { %v2025_v37 = vpop.f32.mrb[153].mxu1 }
 0x342   :  { %v2026_v33 = vpop.f32.mrb[154].mxu1 }
 0x343   :  { %v2219_v54 = vpack.c.bf16 %v2026_v33, %v2023_v21  ;;  %v2028_v27 = vpop.f32.mrb[155].mxu1 }
 0x344   :  { %v11532_v27 = vsel %vm2254_vm0, %v8376_v50, 0 }
 0x345   :  { %9080 = vmatmul.mubr.msk.bf16.vlgmr.msra.gmra.mrb[92].mxu0 %vm2241_vm3, %v2219_v54 }
 0x346   :  { %9088 = vmatpush3.bf16.msra.mxu0 %v11520_v15 }
 0x347   :  { %9964 = vmatprep.subr.msk.bf16.mxu0 %vm2254_vm0, %v8376_v50 }
 0x348   :  { %v2031_v29 = vpop.f32.mrb[156].mxu1 }
 0x349   :  { %v2033_v47 = vpop.f32.mrb[157].mxu1 }
 0x34a   :  { %v2034_v25 = vpop.f32.mrb[158].mxu1 }
 0x34b   :  { %v2220_v18 = vpack.c.bf16 %v2034_v25, %v2031_v29  ;;  %v2036_v31 = vpop.f32.mrb[159].mxu1  ;;  %v8381_v29 = vld [vmem:[%s12914_s3 + $0x38] sm:$0xf] }
 0x34d   :  { %9083 = vmatprep.mubr.msk.bf16.mxu0 %vm2241_vm3, %v2220_v18 }
 0x350   :  { %v2039_v6 = vpop.f32.mrb[160].mxu1 }
 0x351   :  { %v2041_v45 = vpop.f32.mrb[161].mxu1 }
 0x352   :  { %v2042_v62 = vpop.f32.mrb[162].mxu1 }
 0x353   :  { %v2221_v46 = vpack.c.bf16 %v2042_v62, %v2039_v6  ;;  %v2044_v38 = vpop.f32.mrb[163].mxu1 }
 0x355   :  { %9084 = vmatmul.mubr.msk.bf16.gmra.mrb[96].mxu0 %vm2241_vm3, %v2221_v46 }
 0x358   :  { %v2047_v55 = vpop.f32.mrb[164].mxu1 }
 0x359   :  { %v2049_v20 = vpop.f32.mrb[165].mxu1 }
 0x35a   :  { %v2050_v1 = vpop.f32.mrb[166].mxu1 }
 0x35b   :  { %v2222_v9 = vpack.c.bf16 %v2050_v1, %v2047_v55  ;;  %v2052_v19 = vpop.f32.mrb[167].mxu1 }
 0x35d   :  { %9089 = vmatprep.mubr.msk.bf16.mxu0 %vm2241_vm3, %v2222_v9 }
 0x360   :  { %v2055_v4 = vpop.f32.mrb[168].mxu1 }
 0x361   :  { %v2057_v21 = vpop.f32.mrb[169].mxu1 }
 0x362   :  { %v2058_v37 = vpop.f32.mrb[170].mxu1 }
 0x363   :  { %v2223_v33 = vpack.c.bf16 %v2058_v37, %v2055_v4  ;;  %v2060_v54 = vpop.f32.mrb[171].mxu1 }
 0x365   :  { %9090 = vmatmul.mubr.msk.bf16.vlgmr.msra.gmra.mrb[92].mxu0 %vm2241_vm3, %v2223_v33 }
 0x366   :  { %9098 = vmatpush3.bf16.msra.mxu0 %v11532_v27 }
 0x367   :  { %9965 = vmatprep.subr.msk.bf16.mxu0 %vm2254_vm0, %v8381_v29 }
 0x368   :  { %v2063_v47 = vpop.f32.mrb[172].mxu1 }
 0x369   :  { %v2065_v25 = vpop.f32.mrb[173].mxu1 }
 0x36a   :  { %v2066_v18 = vpop.f32.mrb[174].mxu1  ;;  %v8386_v25 = vld [vmem:[%s12914_s3 + $0x3c] sm:$0xf] }
 0x36b   :  { %v2224_v31 = vpack.c.bf16 %v2066_v18, %v2063_v47  ;;  %v2068_v6 = vpop.f32.mrb[175].mxu1  ;;  %v11544_v47 = vsel %vm2254_vm0, %v8381_v29, 0 }
 0x36d   :  { %9093 = vmatprep.mubr.msk.bf16.mxu0 %vm2241_vm3, %v2224_v31 }
 0x370   :  { %v2071_v45 = vpop.f32.mrb[176].mxu1 }
 0x371   :  { %v2073_v50 = vpop.f32.mrb[177].mxu1 }
 0x372   :  { %v2074_v62 = vpop.f32.mrb[178].mxu1 }
 0x373   :  { %v2225_v46 = vpack.c.bf16 %v2074_v62, %v2071_v45  ;;  %v2076_v38 = vpop.f32.mrb[179].mxu1 }
 0x375   :  { %9094 = vmatmul.mubr.msk.bf16.gmra.mrb[96].mxu0 %vm2241_vm3, %v2225_v46 }
 0x378   :  { %v2079_v55 = vpop.f32.mrb[180].mxu1 }
 0x379   :  { %v2081_v20 = vpop.f32.mrb[181].mxu1 }
 0x37a   :  { %v2082_v1 = vpop.f32.mrb[182].mxu1 }
 0x37b   :  { %v2226_v9 = vpack.c.bf16 %v2082_v1, %v2079_v55  ;;  %v2084_v19 = vpop.f32.mrb[183].mxu1 }
 0x37d   :  { %9099 = vmatprep.mubr.msk.bf16.mxu0 %vm2241_vm3, %v2226_v9 }
 0x380   :  { %v2087_v4 = vpop.f32.mrb[184].mxu1 }
 0x381   :  { %v2089_v21 = vpop.f32.mrb[185].mxu1 }
 0x382   :  { %v2090_v37 = vpop.f32.mrb[186].mxu1 }
 0x383   :  { %v2227_v33 = vpack.c.bf16 %v2090_v37, %v2087_v4  ;;  %v2092_v54 = vpop.f32.mrb[187].mxu1 }
 0x385   :  { %9100 = vmatmul.mubr.msk.bf16.vlgmr.msra.gmra.mrb[92].mxu0 %vm2241_vm3, %v2227_v33 }
 0x386   :  { %9108 = vmatpush3.bf16.msra.mxu0 %v11544_v47 }
 0x387   :  { %9966 = vmatprep.subr.msk.bf16.mxu0 %vm2254_vm0, %v8386_v25 }
 0x388   :  { %v2095_v18 = vpop.f32.mrb[188].mxu1 }
 0x389   :  { %v2097_v31 = vpop.f32.mrb[189].mxu1 }
 0x38a   :  { %v2098_v6 = vpop.f32.mrb[190].mxu1  ;;  %v11556_v31 = vsel %vm2254_vm0, %v8386_v25, 0 }
 0x38b   :  { %v2228_v45 = vpack.c.bf16 %v2098_v6, %v2095_v18  ;;  %v2100_v50 = vpop.f32.mrb[191].mxu1  ;;  %v12940_v6 = vmov 0  }
 0x38d   :  { %9103 = vmatprep.mubr.msk.bf16.mxu0 %vm2241_vm3, %v2228_v45 }
 0x390   :  { %v2103_v62 = vpop.f32.mrb[192].mxu1 }
 0x391   :  { %v2105_v29 = vpop.f32.mrb[193].mxu1 }
 0x392   :  { %v2106_v46 = vpop.f32.mrb[194].mxu1 }
 0x393   :  { %v2229_v38 = vpack.c.bf16 %v2106_v46, %v2103_v62  ;;  %v2108_v55 = vpop.f32.mrb[195].mxu1 }
 0x395   :  { %9104 = vmatmul.mubr.msk.bf16.gmra.mrb[96].mxu0 %vm2241_vm3, %v2229_v38 }
 0x398   :  { %v2111_v20 = vpop.f32.mrb[196].mxu1 }
 0x399   :  { %v2113_v1 = vpop.f32.mrb[197].mxu1 }
 0x39a   :  { %v2114_v9 = vpop.f32.mrb[198].mxu1 }
 0x39b   :  { %v2230_v19 = vpack.c.bf16 %v2114_v9, %v2111_v20  ;;  %v2116_v4 = vpop.f32.mrb[199].mxu1 }
 0x39d   :  { %9109 = vmatprep.mubr.msk.bf16.mxu0 %vm2241_vm3, %v2230_v19 }
 0x3a0   :  { %v2119_v21 = vpop.f32.mrb[200].mxu1 }
 0x3a1   :  { %v2121_v37 = vpop.f32.mrb[201].mxu1 }
 0x3a2   :  { %v2122_v33 = vpop.f32.mrb[202].mxu1 }
 0x3a3   :  { %v2231_v54 = vpack.c.bf16 %v2122_v33, %v2119_v21  ;;  %v2124_v18 = vpop.f32.mrb[203].mxu1 }
 0x3a5   :  { %9110 = vmatmul.mubr.msk.bf16.vlgmr.msra.gmra.mrb[92].mxu0 %vm2241_vm3, %v2231_v54 }
 0x3a6   :  { %9118 = vmatpush3.bf16.msra.mxu0 %v11556_v31 }
 0x3a7   :  { %3703 = vmatprep.subr.bf16.mxu0 %v12940_v6 }
 0x3a8   :  { %v2127_v45 = vpop.f32.mrb[204].mxu1 }
 0x3a9   :  { %v2129_v50 = vpop.f32.mrb[205].mxu1 }
 0x3aa   :  { %v2130_v62 = vpop.f32.mrb[206].mxu1 }
 0x3ab   :  { %v2232_v29 = vpack.c.bf16 %v2130_v62, %v2127_v45  ;;  %v2132_v46 = vpop.f32.mrb[207].mxu1  ;;  %v12941_v62 = vpack.c.bf16 %v10896_v5, %v10893_v3 }
 0x3ad   :  { %9113 = vmatprep.mubr.msk.bf16.mxu0 %vm2241_vm3, %v2232_v29 }
 0x3b0   :  { %v2135_v38 = vpop.f32.mrb[208].mxu1 }
 0x3b1   :  { %v2137_v55 = vpop.f32.mrb[209].mxu1 }
 0x3b2   :  { %v2138_v20 = vpop.f32.mrb[210].mxu1 }
 0x3b3   :  { %v2233_v1 = vpack.c.bf16 %v2138_v20, %v2135_v38  ;;  %v2140_v9 = vpop.f32.mrb[211].mxu1  ;;  %v12942_v38 = vpack.c.bf16 %v10907_v24, %v10904_v22 }
 0x3b4   :  { %v12943_v9 = vpack.c.bf16 %v10929_v41, %v10926_v40  ;;  %v10264_v40 = vld [vmem:[%s12913_s2 + $0x4] ss:$8 sps:$4 sm:$0xff]   ;;  %v12946_v41 = vpack.c.bf16 %v10965_v52, %v10962_v51  ;;  %v12951_v51 = vpack.c.bf16 %v11053_v8, %v11050_v11  ;;  %v12952_v52 = vpack.c.bf16 %v11059_v56, %v11056_v10  ;;  %v10270_v11 = vld [vmem:[%s12913_s2 + $0x34] ss:$8 sps:$4 sm:$0xff]   ;;  %v10271_v8 = vld [vmem:[%s12913_s2 + $0x30] ss:$8 sps:$4 sm:$0xff]  }
 0x3b5   :  { %9114 = vmatmul.mubr.msk.bf16.gmra.mrb[96].mxu0 %vm2241_vm3, %v2233_v1  ;;  %v10272_v10 = vld [vmem:[%s12913_s2 + $0x44] ss:$8 sps:$4 sm:$0xff]   ;;  %v10273_v56 = vld [vmem:[%s12913_s2 + $0x40] ss:$8 sps:$4 sm:$0xff]  }
 0x3b8   :  { %v2143_v25 = vpop.f32.mrb[212].mxu1 }
 0x3b9   :  { %v2145_v19 = vpop.f32.mrb[213].mxu1 }
 0x3ba   :  { %v2146_v4 = vpop.f32.mrb[214].mxu1 }
 0x3bb   :  { %v2234_v21 = vpack.c.bf16 %v2146_v4, %v2143_v25  ;;  %v2148_v37 = vpop.f32.mrb[215].mxu1  ;;  %v12944_v25 = vpack.c.bf16 %v10935_v43, %v10932_v42  ;;  %v12945_v4 = vpack.c.bf16 %v10959_v49, %v10956_v48  ;;  %v12947_v42 = vpack.c.bf16 %v10989_v58, %v10986_v57 }
 0x3bc   :  { %v12948_v43 = vpack.c.bf16 %v10995_v61, %v10992_v59  ;;  %v12949_v48 = vpack.c.bf16 %v11019_v39, %v11016_v35  ;;  %v12950_v49 = vpack.c.bf16 %v11025_v0, %v11022_v60  ;;  %v12953_v57 = vpack.c.bf16 %v11095_v12, %v11092_v63  ;;  %v12956_v61 = vld [vmem:[#allocation3_spill] sm:$0xff]  ;;  %v10266_v60 = vld [vmem:[%s12913_s2 + $0x14] ss:$8 sps:$4 sm:$0xff]   ;;  %v10275_v63 = vld [vmem:[%s12913_s2 + $0x50] ss:$8 sps:$4 sm:$0xff]  }
 0x3bd   :  { %9119 = vmatprep.mubr.msk.bf16.mxu0 %vm2241_vm3, %v2234_v21  ;;  %v12954_v58 = vpack.c.bf16 %v11101_v28, %v11098_v16  ;;  %v12955_v59 = vpack.c.bf16 %v11137_v13, %v11134_v14  ;;  %v12957_v35 = vpack.c.bf16 %v11152_v36, %v12956_v61  ;;  %v10265_v39 = vld [vmem:[%s12913_s2] ss:$8 sps:$4 sm:$0xff]   ;;  %v10267_v13 = vld [vmem:[%s12913_s2 + $0x10] ss:$8 sps:$4 sm:$0xff]   ;;  %v10268_v14 = vld [vmem:[%s12913_s2 + $0x24] ss:$8 sps:$4 sm:$0xff]  }
 0x3be   :  { %v10269_v0 = vld [vmem:[%s12913_s2 + $0x20] ss:$8 sps:$4 sm:$0xff]   ;;  %v10274_v28 = vld [vmem:[%s12913_s2 + $0x54] ss:$8 sps:$4 sm:$0xff]   ;;  %v10276_v12 = vld [vmem:[%s12913_s2 + $0x64] ss:$8 sps:$4 sm:$0xff]  }
 0x3bf   :  { %v10277_v16 = vld [vmem:[%s12913_s2 + $0x60] ss:$8 sps:$4 sm:$0xff]   ;;  %v10278_v36 = vld [vmem:[%s12913_s2 + $0x74] ss:$8 sps:$4 sm:$0xff]   ;;  %v10280_v21 = vld [vmem:[%s12913_s2 + $0x84] ss:$8 sps:$4 sm:$0xff]  }
 0x3c0   :  { %v2151_v33 = vpop.f32.mrb[216].mxu1  ;;  %v10281_v37 = vld [vmem:[%s12913_s2 + $0x80] ss:$8 sps:$4 sm:$0xff]  }
 0x3c1   :  { %v2153_v54 = vpop.f32.mrb[217].mxu1 }
 0x3c2   :  { %v2154_v18 = vpop.f32.mrb[218].mxu1  ;;  %v10283_v54 = vld [vmem:[%s12913_s2 + $0x90] ss:$8 sps:$4 sm:$0xff]  }
 0x3c3   :  { %v2235_v45 = vpack.c.bf16 %v2154_v18, %v2151_v33  ;;  %v2156_v50 = vpop.f32.mrb[219].mxu1  ;;  %v10282_v33 = vld [vmem:[%s12913_s2 + $0x94] ss:$8 sps:$4 sm:$0xff]   ;;  %v10284_v18 = vld [vmem:[%s12913_s2 + $0xa4] ss:$8 sps:$4 sm:$0xff]  }
 0x3c4   :  { %v10286_v50 = vld [vmem:[%s12913_s2 + $0xb4] ss:$8 sps:$4 sm:$0xff]  }
 0x3c5   :  { %9120 = vmatmul.mubr.msk.bf16.vlgmr.msra.gmra.mrb[92].mxu0 %vm2241_vm3, %v2235_v45  ;;  %v10285_v45 = vld [vmem:[%s12913_s2 + $0xa0] ss:$8 sps:$4 sm:$0xff]  }
 0x3c6   :  { %3704 = vmatpush1.bf16.msra.mxu0 %v12941_v62  ;;  %v10287_v62 = vld [vmem:[%s12913_s2 + $0xb0] ss:$8 sps:$4 sm:$0xff]  }
 0x3c7   :  { %3705 = vmatprep.subr.bf16.mxu0 %v12940_v6 }
 0x3c8   :  { %v2159_v29 = vpop.f32.mrb[220].mxu1 }
 0x3c9   :  { %v2161_v46 = vpop.f32.mrb[221].mxu1 }
 0x3ca   :  { %3706 = vmatpush1.bf16.msra.mxu0 %v12942_v38  ;;  %v2162_v55 = vpop.f32.mrb[222].mxu1  ;;  %v10289_v46 = vld [vmem:[%s12913_s2 + $0xc0] ss:$8 sps:$4 sm:$0xff]   ;;  %v10290_v38 = vld [vmem:[%s12913_s2 + $0xd4] ss:$8 sps:$4 sm:$0xff]  }
 0x3cb   :  { %3707 = vmatprep.subr.bf16.mxu0 %v12940_v6  ;;  %v2236_v20 = vpack.c.bf16 %v2162_v55, %v2159_v29  ;;  %v2164_v1 = vpop.f32.mrb[223].mxu1  ;;  %v10288_v29 = vld [vmem:[%s12913_s2 + $0xc4] ss:$8 sps:$4 sm:$0xff]   ;;  %v10291_v55 = vld [vmem:[%s12913_s2 + $0xd0] ss:$8 sps:$4 sm:$0xff]  }
 0x3cc   :  { %v10293_v1 = vld [vmem:[%s12913_s2 + $0xe0] ss:$8 sps:$4 sm:$0xff]  }
 0x3cd   :  { %9123 = vmatprep.mubr.msk.bf16.mxu0 %vm2241_vm3, %v2236_v20  ;;  %v10292_v20 = vld [vmem:[%s12913_s2 + $0xe4] ss:$8 sps:$4 sm:$0xff]  }
 0x3ce   :  { %3708 = vmatpush1.bf16.msra.mxu0 %v12943_v9  ;;  %v10294_v9 = vld [vmem:[%s12913_s2 + $0xf4] ss:$8 sps:$4 sm:$0xff]  }
 0x3cf   :  { %3709 = vmatprep.subr.bf16.mxu0 %v12940_v6 }
 0x3d0   :  { %v2167_v3 = vpop.f32.mrb[224].mxu1 }
 0x3d1   :  { %v2169_v5 = vpop.f32.mrb[225].mxu1 }
 0x3d2   :  { %3710 = vmatpush1.bf16.msra.mxu0 %v12944_v25  ;;  %v2170_v22 = vpop.f32.mrb[226].mxu1  ;;  %v10296_v5 = vld [vmem:[%s12913_s2 + $0x104] ss:$8 sps:$4 sm:$0xff]   ;;  %v10297_v25 = vld [vmem:[%s12913_s2 + $0x100] ss:$8 sps:$4 sm:$0xff]  }
 0x3d3   :  { %v2237_v24 = vpack.c.bf16 %v2170_v22, %v2167_v3  ;;  %3711 = vmatprep.subr.bf16.mxu0 %v12940_v6  ;;  %v2172_v19 = vpop.f32.mrb[227].mxu1  ;;  %v10295_v3 = vld [vmem:[%s12913_s2 + $0xf0] ss:$8 sps:$4 sm:$0xff]   ;;  %v10298_v22 = vld [vmem:[%s12913_s2 + $0x114] ss:$8 sps:$4 sm:$0xff]  }
 0x3d4   :  { %v10300_v19 = vld [vmem:[%s12913_s2 + $0x124] ss:$8 sps:$4 sm:$0xff]  }
 0x3d5   :  { %9124 = vmatmul.mubr.msk.bf16.gmra.mrb[96].mxu0 %vm2241_vm3, %v2237_v24  ;;  %v10299_v24 = vld [vmem:[%s12913_s2 + $0x110] ss:$8 sps:$4 sm:$0xff]  }
 0x3d6   :  { %3712 = vmatpush1.bf16.msra.mxu0 %v12945_v4  ;;  %3735 = vmatprep.mubr.bf16.mxu0 %v10264_v40  ;;  %v10301_v4 = vld [vmem:[%s12913_s2 + $0x120] ss:$8 sps:$4 sm:$0xff]   ;;  %v10302_v40 = vld [vmem:[%s12913_s2 + $0x134] ss:$8 sps:$4 sm:$0xff]  }
 0x3d7   :  { %3713 = vmatprep.subr.bf16.mxu0 %v12940_v6 }
 0x3da   :  { %3714 = vmatpush1.bf16.msra.mxu0 %v12946_v41 }
 0x3db   :  { %3715 = vmatprep.subr.bf16.mxu0 %v12940_v6 }
 0x3de   :  { %3716 = vmatpush1.bf16.msra.mxu0 %v12947_v42 }
 0x3df   :  { %3717 = vmatprep.subr.bf16.mxu0 %v12940_v6 }
 0x3e2   :  { %3718 = vmatpush1.bf16.msra.mxu0 %v12948_v43 }
 0x3e3   :  { %3719 = vmatprep.subr.bf16.mxu0 %v12940_v6 }
 0x3e6   :  { %3720 = vmatpush1.bf16.msra.mxu0 %v12949_v48 }
 0x3e7   :  { %3721 = vmatprep.subr.bf16.mxu0 %v12940_v6 }
 0x3ea   :  { %3722 = vmatpush1.bf16.msra.mxu0 %v12950_v49  ;;  %v10303_v49 = vld [vmem:[%s12913_s2 + $0x130] ss:$8 sps:$4 sm:$0xff]  }
 0x3eb   :  { %3723 = vmatprep.subr.bf16.mxu0 %v12940_v6 }
 0x3ee   :  { %3724 = vmatpush1.bf16.msra.mxu0 %v12951_v51  ;;  %v10304_v51 = vld [vmem:[%s12913_s2 + $0x144] ss:$8 sps:$4 sm:$0xff]  }
 0x3ef   :  { %3725 = vmatprep.subr.bf16.mxu0 %v12940_v6 }
 0x3f2   :  { %3726 = vmatpush1.bf16.msra.mxu0 %v12952_v52  ;;  %v10305_v52 = vld [vmem:[%s12913_s2 + $0x140] ss:$8 sps:$4 sm:$0xff]  }
 0x3f3   :  { %3727 = vmatprep.subr.bf16.mxu0 %v12940_v6 }
 0x3f6   :  { %3728 = vmatpush1.bf16.msra.mxu0 %v12953_v57  ;;  %v10306_v57 = vld [vmem:[%s12913_s2 + $0x154] ss:$8 sps:$4 sm:$0xff]  }
 0x3f7   :  { %3729 = vmatprep.subr.bf16.mxu0 %v12940_v6 }
 0x3fa   :  { %3730 = vmatpush1.bf16.msra.mxu0 %v12954_v58 }
 0x3fb   :  { %3731 = vmatprep.subr.bf16.mxu0 %v12940_v6 }
 0x3fe   :  { %3732 = vmatpush1.bf16.msra.mxu0 %v12955_v59 }
 0x3ff   :  { %3733 = vmatprep.subr.bf16.mxu0 %v12940_v6  ;;  %v10279_v6 = vld [vmem:[%s12913_s2 + $0x70] ss:$8 sps:$4 sm:$0xff]  }
 0x402   :  { %3734 = vmatpush1.bf16.msra.mxu0 %v12957_v35 }
 0x405   :  { %3736 = vmatmul.mubr.bf16.vlgmr.msra.gmra.mrb[100].mxu0 %v10265_v39  ;;  %v10307_v39 = vld [vmem:[%s12913_s2 + $0x150] ss:$8 sps:$4 sm:$0xff]  }
 0x406   :  { %3743 = vmatprep.mubr.bf16.mxu0 %v10266_v60  ;;  %v10308_v60 = vld [vmem:[%s12913_s2 + $0x164] ss:$8 sps:$4 sm:$0xff]  }
 0x40d   :  { %3744 = vmatmul.mubr.bf16.gmra.mrb[104].mxu0 %v10267_v13  ;;  %v10309_v13 = vld [vmem:[%s12913_s2 + $0x160] ss:$8 sps:$4 sm:$0xff]  }
 0x40e   :  { %3751 = vmatprep.mubr.bf16.mxu0 %v10268_v14  ;;  %v10310_v14 = vld [vmem:[%s12913_s2 + $0x174] ss:$8 sps:$4 sm:$0xff]  }
 0x415   :  { %3752 = vmatmul.mubr.bf16.gmra.mrb[108].mxu0 %v10269_v0  ;;  %v10311_v0 = vld [vmem:[%s12913_s2 + $0x170] ss:$8 sps:$4 sm:$0xff]  }
 0x416   :  { %3759 = vmatprep.mubr.bf16.mxu0 %v10270_v11  ;;  %v10312_v11 = vld [vmem:[%s12913_s2 + $0x184] ss:$8 sps:$4 sm:$0xff]  }
 0x41d   :  { %3760 = vmatmul.mubr.bf16.gmra.mrb[112].mxu0 %v10271_v8  ;;  %v10313_v8 = vld [vmem:[%s12913_s2 + $0x180] ss:$8 sps:$4 sm:$0xff]  }
 0x41e   :  { %3767 = vmatprep.mubr.bf16.mxu0 %v10272_v10  ;;  %v10314_v10 = vld [vmem:[%s12913_s2 + $0x194] ss:$8 sps:$4 sm:$0xff]  }
 0x425   :  { %3768 = vmatmul.mubr.bf16.gmra.mrb[116].mxu0 %v10273_v56  ;;  %v10315_v56 = vld [vmem:[%s12913_s2 + $0x190] ss:$8 sps:$4 sm:$0xff]  }
 0x426   :  { %3775 = vmatprep.mubr.bf16.mxu0 %v10274_v28  ;;  %v10316_v28 = vld [vmem:[%s12913_s2 + $0x1a4] ss:$8 sps:$4 sm:$0xff]  }
 0x42d   :  { %3776 = vmatmul.mubr.bf16.gmra.mrb[120].mxu0 %v10275_v63  ;;  %v10317_v63 = vld [vmem:[%s12913_s2 + $0x1a0] ss:$8 sps:$4 sm:$0xff]  }
 0x42e   :  { %3783 = vmatprep.mubr.bf16.mxu0 %v10276_v12  ;;  %v10318_v12 = vld [vmem:[%s12913_s2 + $0x1b4] ss:$8 sps:$4 sm:$0xff]  }
 0x435   :  { %3784 = vmatmul.mubr.bf16.gmra.mrb[124].mxu0 %v10277_v16 }
 0x436   :  { %3791 = vmatprep.mubr.bf16.mxu0 %v10278_v36 }
 0x43d   :  { %3792 = vmatmul.mubr.bf16.gmra.mrb[128].mxu0 %v10279_v6 }
 0x43e   :  { %3799 = vmatprep.mubr.bf16.mxu0 %v10280_v21 }
 0x445   :  { %3800 = vmatmul.mubr.bf16.gmra.mrb[132].mxu0 %v10281_v37 }
 0x446   :  { %3807 = vmatprep.mubr.bf16.mxu0 %v10282_v33  ;;  %v10319_v33 = vld [vmem:[%s12913_s2 + $0x1b0] ss:$8 sps:$4 sm:$0xff]  }
 0x44d   :  { %3808 = vmatmul.mubr.bf16.gmra.mrb[136].mxu0 %v10283_v54  ;;  %v10320_v54 = vld [vmem:[%s12913_s2 + $0x1c4] ss:$8 sps:$4 sm:$0xff]  }
 0x44e   :  { %3815 = vmatprep.mubr.bf16.mxu0 %v10284_v18 }
 0x455   :  { %3816 = vmatmul.mubr.bf16.gmra.mrb[140].mxu0 %v10285_v45 }
 0x456   :  { %3823 = vmatprep.mubr.bf16.mxu0 %v10286_v50 }
 0x45d   :  { %3824 = vmatmul.mubr.bf16.gmra.mrb[144].mxu0 %v10287_v62 }
 0x45e   :  { %3831 = vmatprep.mubr.bf16.mxu0 %v10288_v29 }
 0x465   :  { %3832 = vmatmul.mubr.bf16.gmra.mrb[148].mxu0 %v10289_v46  ;;  %v10321_v46 = vld [vmem:[%s12913_s2 + $0x1c0] ss:$8 sps:$4 sm:$0xff]  }
 0x466   :  { %3839 = vmatprep.mubr.bf16.mxu0 %v10290_v38  ;;  %v10322_v38 = vld [vmem:[%s12913_s2 + $0x1d4] ss:$8 sps:$4 sm:$0xff]  }
 0x46d   :  { %3840 = vmatmul.mubr.bf16.gmra.mrb[152].mxu0 %v10291_v55 }
 0x46e   :  { %3847 = vmatprep.mubr.bf16.mxu0 %v10292_v20 }
 0x475   :  { %3848 = vmatmul.mubr.bf16.gmra.mrb[156].mxu0 %v10293_v1 }
 0x476   :  { %3855 = vmatprep.mubr.bf16.mxu0 %v10294_v9 }
 0x47d   :  { %3856 = vmatmul.mubr.bf16.gmra.mrb[160].mxu0 %v10295_v3 }
 0x47e   :  { %3863 = vmatprep.mubr.bf16.mxu0 %v10296_v5  ;;  %v10323_v5 = vld [vmem:[%s12913_s2 + $0x1d0] ss:$8 sps:$4 sm:$0xff]  }
 0x485   :  { %3864 = vmatmul.mubr.bf16.gmra.mrb[164].mxu0 %v10297_v25  ;;  %v10324_v25 = vld [vmem:[%s12913_s2 + $0x1e4] ss:$8 sps:$4 sm:$0xff]  }
 0x486   :  { %3871 = vmatprep.mubr.bf16.mxu0 %v10298_v22 }
 0x48d   :  { %3872 = vmatmul.mubr.bf16.gmra.mrb[168].mxu0 %v10299_v24 }
 0x48e   :  { %3879 = vmatprep.mubr.bf16.mxu0 %v10300_v19 }
 0x495   :  { %3880 = vmatmul.mubr.bf16.gmra.mrb[172].mxu0 %v10301_v4 }
 0x496   :  { %3887 = vmatprep.mubr.bf16.mxu0 %v10302_v40 }
 0x498   :  { %v11747_v41 = vpop.f32.mrb[92].mxu0 }
 0x499   :  { %v11749_v42 = vpop.f32.mrb[93].mxu0  ;;  %vm3665_vm6 = vcmp.ge.f32.partialorder %v11747_v41, 0.0 }
 0x49a   :  { %v11751_v43 = vpop.f32.mrb[94].mxu0  ;;  %vm3663_vm4 = vcmp.ge.f32.partialorder %v11749_v42, 0.0 }
 0x49b   :  { %v11753_v48 = vpop.f32.mrb[95].mxu0  ;;  %vm3666_vm7 = vcmp.ge.f32.partialorder %v11751_v43, 0.0 }
 0x49d   :  { %3888 = vmatmul.mubr.bf16.gmra.mrb[176].mxu0 %v10303_v49  ;;  %v10325_v49 = vld [vmem:[%s12913_s2 + $0x1e0] ss:$8 sps:$4 sm:$0xff]  }
 0x49e   :  { %3895 = vmatprep.mubr.bf16.mxu0 %v10304_v51  ;;  %v10326_v51 = vld [vmem:[%s12913_s2 + $0x1f4] ss:$8 sps:$4 sm:$0xff]  }
 0x4a5   :  { %3896 = vmatmul.mubr.bf16.gmra.mrb[180].mxu0 %v10305_v52 }
 0x4a6   :  { %3903 = vmatprep.mubr.bf16.mxu0 %v10306_v57 }
 0x4a8   :  { %v11767_v58 = vpop.f32.mrb[96].mxu0 }
 0x4a9   :  { %v11769_v59 = vpop.f32.mrb[97].mxu0  ;;  %vm3669_vm10 = vcmp.ge.f32.partialorder %v11767_v58, 0.0 }
 0x4aa   :  { %v11771_v61 = vpop.f32.mrb[98].mxu0  ;;  %vm3667_vm8 = vcmp.ge.f32.partialorder %v11769_v59, 0.0 }
 0x4ab   :  { %v11773_v35 = vpop.f32.mrb[99].mxu0  ;;  %vm3670_vm12 = vcmp.ge.f32.partialorder %v11771_v61, 0.0 }
 0x4ac   :  { %vm3668_vm9 = vcmp.ge.f32.partialorder %v11773_v35, 0.0 }
 0x4ad   :  { %3904 = vmatmul.mubr.bf16.gmra.mrb[184].mxu0 %v10307_v39 }
 0x4ae   :  { %3911 = vmatprep.mubr.bf16.mxu0 %v10308_v60 }
 0x4b5   :  { %3912 = vmatmul.mubr.bf16.gmra.mrb[188].mxu0 %v10309_v13 }
 0x4b6   :  { %3919 = vmatprep.mubr.bf16.mxu0 %v10310_v14  ;;  %v10327_v14 = vld [vmem:[%s12913_s2 + $0x1f0] ss:$8 sps:$4 sm:$0xff]  }
 0x4bd   :  { %3920 = vmatmul.mubr.bf16.gmra.mrb[192].mxu0 %v10311_v0  ;;  %v10328_v0 = vld [vmem:[%s12913_s2 + $0x204] ss:$8 sps:$4 sm:$0xff]  }
 0x4be   :  { %3927 = vmatprep.mubr.bf16.mxu0 %v10312_v11 }
 0x4c5   :  { %3928 = vmatmul.mubr.bf16.gmra.mrb[196].mxu0 %v10313_v8 }
 0x4c6   :  { %3935 = vmatprep.mubr.bf16.mxu0 %v10314_v10 }
 0x4cd   :  { %3936 = vmatmul.mubr.bf16.gmra.mrb[200].mxu0 %v10315_v56 }
 0x4ce   :  { %3943 = vmatprep.mubr.bf16.mxu0 %v10316_v28 }
 0x4d5   :  { %3944 = vmatmul.mubr.bf16.gmra.mrb[204].mxu0 %v10317_v63  ;;  %v10329_v63 = vld [vmem:[%s12913_s2 + $0x200] ss:$8 sps:$4 sm:$0xff]  }
 0x4d6   :  { %3951 = vmatprep.mubr.bf16.mxu0 %v10318_v12  ;;  %v10330_v12 = vld [vmem:[%s12913_s2 + $0x214] ss:$8 sps:$4 sm:$0xff]  }
 0x4d8   :  { %v11811_v16 = vpop.f32.mrb[100].mxu0 }
 0x4d9   :  { %v3739_v36 = vpop.f32.mrb[101].mxu0 }
 0x4da   :  { %v11813_v6 = vpop.f32.mrb[102].mxu0  ;;  %v12958_v36 = vld [vmem:[#allocation4_spill] sm:$0xff] }
 0x4db   :  { %v4248_v21 = vpack.c.bf16 %v11813_v6, %v11811_v16  ;;  %v3742_v37 = vpop.f32.mrb[103].mxu0  ;;  %v10337_v16 = vld [vmem:[%s12913_s2 + $0x244] ss:$8 sps:$4 sm:$0xff]  }
 0x4dc   :  { %v10331_v37 = vld [vmem:[%s12914_s3 + $0x8] sm:$0xf] }
 0x4dd   :  { %3952 = vmatmul.mubr.bf16.gmra.mrb[208].mxu0 %v10319_v33 }
 0x4de   :  { %3959 = vmatprep.mubr.bf16.mxu0 %v10320_v54 }
 0x4e0   :  { %v11823_v18 = vpop.f32.mrb[104].mxu0 }
 0x4e1   :  { %v3747_v45 = vpop.f32.mrb[105].mxu0 }
 0x4e2   :  { %v11825_v50 = vpop.f32.mrb[106].mxu0 }
 0x4e3   :  { %v4249_v62 = vpack.c.bf16 %v11825_v50, %v11823_v18  ;;  %v3750_v29 = vpop.f32.mrb[107].mxu0 }
 0x4e5   :  { %3960 = vmatmul.mubr.bf16.gmra.mrb[212].mxu0 %v10321_v46 }
 0x4e6   :  { %3967 = vmatprep.mubr.bf16.mxu0 %v10322_v38  ;;  %v10332_v38 = vld [vmem:[%s12913_s2 + $0x210] ss:$8 sps:$4 sm:$0xff]  }
 0x4e8   :  { %v11835_v55 = vpop.f32.mrb[108].mxu0 }
 0x4e9   :  { %v3755_v20 = vpop.f32.mrb[109].mxu0 }
 0x4ea   :  { %v11837_v1 = vpop.f32.mrb[110].mxu0  ;;  %v10333_v20 = vld [vmem:[%s12913_s2 + $0x224] ss:$8 sps:$4 sm:$0xff]  }
 0x4eb   :  { %v4250_v9 = vpack.c.bf16 %v11837_v1, %v11835_v55  ;;  %v3758_v3 = vpop.f32.mrb[111].mxu0  ;;  %v10339_v1 = vld [vmem:[%s12913_s2 + $0x240] ss:$8 sps:$4 sm:$0xff]  }
 0x4ed   :  { %3968 = vmatmul.mubr.bf16.gmra.mrb[216].mxu0 %v10323_v5 }
 0x4ee   :  { %3975 = vmatprep.mubr.bf16.mxu0 %v10324_v25 }
 0x4f0   :  { %v11847_v22 = vpop.f32.mrb[112].mxu0 }
 0x4f1   :  { %v3763_v24 = vpop.f32.mrb[113].mxu0 }
 0x4f2   :  { %v11849_v19 = vpop.f32.mrb[114].mxu0 }
 0x4f3   :  { %v4251_v4 = vpack.c.bf16 %v11849_v19, %v11847_v22  ;;  %v3766_v40 = vpop.f32.mrb[115].mxu0  ;;  %v10342_v22 = vld [vmem:[%s12913_s2 + $0x264] ss:$8 sps:$4 sm:$0xff]  }
 0x4f5   :  { %3976 = vmatmul.mubr.bf16.gmra.mrb[220].mxu0 %v10325_v49  ;;  %v10334_v49 = vld [vmem:[%s12913_s2 + $0x220] ss:$8 sps:$4 sm:$0xff]  }
 0x4f6   :  { %3983 = vmatprep.mubr.bf16.mxu0 %v10326_v51  ;;  %v10335_v51 = vld [vmem:[%s12913_s2 + $0x234] ss:$8 sps:$4 sm:$0xff]  }
 0x4f8   :  { %v3769_v52 = vpop.f32.mrb[116].mxu0 }
 0x4f9   :  { %v3771_v57 = vpop.f32.mrb[117].mxu0 }
 0x4fa   :  { %v3772_v39 = vpop.f32.mrb[118].mxu0 }
 0x4fb   :  { %v4252_v60 = vpack.c.bf16 %v3772_v39, %v3769_v52  ;;  %v3774_v13 = vpop.f32.mrb[119].mxu0 }
 0x4fd   :  { %3984 = vmatmul.mubr.bf16.gmra.mrb[224].mxu0 %v10327_v14  ;;  %9129 = vmatprep.mubr.msk.bf16.mxu1 %vm2241_vm3, %v4252_v60  ;;  %v10336_v14 = vld [vmem:[%s12913_s2 + $0x230] ss:$8 sps:$4 sm:$0xff]  }
 0x4fe   :  { %3991 = vmatprep.mubr.bf16.mxu0 %v10328_v0 }
 0x500   :  { %v3777_v11 = vpop.f32.mrb[120].mxu0 }
 0x501   :  { %v3779_v8 = vpop.f32.mrb[121].mxu0 }
 0x502   :  { %v3780_v10 = vpop.f32.mrb[122].mxu0 }
 0x503   :  { %v4253_v56 = vpack.c.bf16 %v3780_v10, %v3777_v11  ;;  %v3782_v28 = vpop.f32.mrb[123].mxu0 }
 0x505   :  { %3992 = vmatmul.mubr.bf16.gmra.mrb[228].mxu0 %v10329_v63  ;;  %9130 = vmatmul.mubr.msk.bf16.vlgmr.msra.gmra.mrb[228].mxu1 %vm2241_vm3, %v4253_v56  ;;  %v10341_v56 = vld [vmem:[%s12913_s2 + $0x250] ss:$8 sps:$4 sm:$0xff]  }
 0x506   :  { %3999 = vmatprep.mubr.bf16.mxu0 %v10330_v12  ;;  %9138 = vmatpush3.bf16.msra.mxu1 %v12958_v36 }
 0x507   :  { %9969 = vmatprep.subr.msk.bf16.mxu1 %vm2254_vm0, %v10331_v37  ;;  %v10344_v37 = vld [vmem:[%s12913_s2 + $0x260] ss:$8 sps:$4 sm:$0xff]  }
 0x508   :  { %v3785_v33 = vpop.f32.mrb[124].mxu0 }
 0x509   :  { %v3787_v54 = vpop.f32.mrb[125].mxu0 }
 0x50a   :  { %v3788_v45 = vpop.f32.mrb[126].mxu0 }
 0x50b   :  { %v4254_v29 = vpack.c.bf16 %v3788_v45, %v3785_v33  ;;  %v3790_v46 = vpop.f32.mrb[127].mxu0 }
 0x50d   :  { %4000 = vmatmul.mubr.bf16.gmra.mrb[232].mxu0 %v10332_v38  ;;  %9133 = vmatprep.mubr.msk.bf16.mxu1 %vm2241_vm3, %v4254_v29  ;;  %v10346_v38 = vld [vmem:[%s12913_s2 + $0x270] ss:$8 sps:$4 sm:$0xff]  }
 0x50e   :  { %4007 = vmatprep.mubr.bf16.mxu0 %v10333_v20  ;;  %v10347_v20 = vld [vmem:[%s12913_s2 + $0x284] ss:$8 sps:$4 sm:$0xff]  }
 0x510   :  { %v3793_v3 = vpop.f32.mrb[128].mxu0 }
 0x511   :  { %v3795_v5 = vpop.f32.mrb[129].mxu0 }
 0x512   :  { %v3796_v25 = vpop.f32.mrb[130].mxu0 }
 0x513   :  { %v4255_v24 = vpack.c.bf16 %v3796_v25, %v3793_v3  ;;  %v3798_v40 = vpop.f32.mrb[131].mxu0 }
 0x515   :  { %4008 = vmatmul.mubr.bf16.gmra.mrb[236].mxu0 %v10334_v49  ;;  %9134 = vmatmul.mubr.msk.bf16.gmra.mrb[232].mxu1 %vm2241_vm3, %v4255_v24  ;;  %v10348_v49 = vld [vmem:[%s12913_s2 + $0x280] ss:$8 sps:$4 sm:$0xff]  }
 0x516   :  { %9139 = vmatprep.mubr.msk.bf16.mxu1 %vm2241_vm3, %v4248_v21  ;;  %4015 = vmatprep.mubr.bf16.mxu0 %v10335_v51  ;;  %v10338_v21 = vld [vmem:[%s12914_s3 + $0xc] sm:$0xf]  ;;  %v10349_v51 = vld [vmem:[%s12913_s2 + $0x294] ss:$8 sps:$4 sm:$0xff]  }
 0x518   :  { %v3801_v52 = vpop.f32.mrb[132].mxu0 }
 0x519   :  { %v3803_v57 = vpop.f32.mrb[133].mxu0 }
 0x51a   :  { %v3804_v39 = vpop.f32.mrb[134].mxu0 }
 0x51b   :  { %v4256_v60 = vpack.c.bf16 %v3804_v39, %v3801_v52  ;;  %v3806_v13 = vpop.f32.mrb[135].mxu0  ;;  %v10350_v52 = vld [vmem:[%s12914_s3 + $0x14] sm:$0xf] }
 0x51d   :  { %4016 = vmatmul.mubr.bf16.gmra.mrb[240].mxu0 %v10336_v14  ;;  %9140 = vmatmul.mubr.msk.bf16.vlgmr.msra.gmra.mrb[228].mxu1 %vm2241_vm3, %v4249_v62 }
 0x51e   :  { %9143 = vmatprep.mubr.msk.bf16.mxu1 %vm2241_vm3, %v4250_v9  ;;  %4023 = vmatprep.mubr.bf16.mxu0 %v10337_v16  ;;  %v10351_v16 = vld [vmem:[%s12913_s2 + $0x290] ss:$8 sps:$4 sm:$0xff]  }
 0x51f   :  { %9148 = vmatpush3.bf16.msra.mxu1 %v11244_v23  ;;  %v10340_v23 = vld [vmem:[%s12913_s2 + $0x254] ss:$8 sps:$4 sm:$0xff]  }
 0x520   :  { %v3809_v6 = vpop.f32.mrb[136].mxu0  ;;  %9970 = vmatprep.subr.msk.bf16.mxu1 %vm2254_vm0, %v10338_v21 }
 0x521   :  { %v3811_v18 = vpop.f32.mrb[137].mxu0 }
 0x522   :  { %v3812_v50 = vpop.f32.mrb[138].mxu0 }
 0x523   :  { %v4257_v62 = vpack.c.bf16 %v3812_v50, %v3809_v6  ;;  %v3814_v55 = vpop.f32.mrb[139].mxu0 }
 0x524   :  { %v10353_v55 = vld [vmem:[%s12913_s2 + $0x2a0] ss:$8 sps:$4 sm:$0xff]  }
 0x525   :  { %4024 = vmatmul.mubr.bf16.gmra.mrb[244].mxu0 %v10339_v1  ;;  %9144 = vmatmul.mubr.msk.bf16.gmra.mrb[232].mxu1 %vm2241_vm3, %v4251_v4  ;;  %v10343_v4 = vld [vmem:[%s12914_s3 + $0x10] sm:$0xf]  ;;  %v10354_v1 = vld [vmem:[%s12913_s2 + $0x2b4] ss:$8 sps:$4 sm:$0xff]  }
 0x526   :  { %9149 = vmatprep.mubr.msk.bf16.mxu1 %vm2241_vm3, %v4256_v60  ;;  %4031 = vmatprep.mubr.bf16.mxu0 %v10340_v23 }
 0x528   :  { %v3817_v9 = vpop.f32.mrb[140].mxu0 }
 0x529   :  { %v3819_v0 = vpop.f32.mrb[141].mxu0 }
 0x52a   :  { %v3820_v11 = vpop.f32.mrb[142].mxu0 }
 0x52b   :  { %v4258_v8 = vpack.c.bf16 %v3820_v11, %v3817_v9  ;;  %v3822_v10 = vpop.f32.mrb[143].mxu0 }
 0x52c   :  { %v10355_v10 = vld [vmem:[%s12913_s2 + $0x2b0] ss:$8 sps:$4 sm:$0xff]  }
 0x52d   :  { %4032 = vmatmul.mubr.bf16.gmra.mrb[248].mxu0 %v10341_v56  ;;  %9150 = vmatmul.mubr.msk.bf16.vlgmr.msra.gmra.mrb[228].mxu1 %vm2241_vm3, %v4257_v62  ;;  %v10356_v56 = vld [vmem:[%s12913_s2 + $0x2c4] ss:$8 sps:$4 sm:$0xff]  }
 0x52e   :  { %9153 = vmatprep.mubr.msk.bf16.mxu1 %vm2241_vm3, %v4258_v8  ;;  %4039 = vmatprep.mubr.bf16.mxu0 %v10342_v22 }
 0x52f   :  { %9158 = vmatpush3.bf16.msra.mxu1 %v11280_v32  ;;  %v10345_v32 = vld [vmem:[%s12913_s2 + $0x274] ss:$8 sps:$4 sm:$0xff]  }
 0x530   :  { %v3825_v19 = vpop.f32.mrb[144].mxu0  ;;  %9971 = vmatprep.subr.msk.bf16.mxu1 %vm2254_vm0, %v10343_v4 }
 0x531   :  { %v3827_v28 = vpop.f32.mrb[145].mxu0 }
 0x532   :  { %v3828_v63 = vpop.f32.mrb[146].mxu0 }
 0x533   :  { %v4259_v12 = vpack.c.bf16 %v3828_v63, %v3825_v19  ;;  %v3830_v36 = vpop.f32.mrb[147].mxu0 }
 0x534   :  { %v10358_v36 = vld [vmem:[%s12913_s2 + $0x2d4] ss:$8 sps:$4 sm:$0xff]  }
 0x535   :  { %4040 = vmatmul.mubr.bf16.gmra.mrb[252].mxu0 %v10344_v37  ;;  %9154 = vmatmul.mubr.msk.bf16.gmra.mrb[232].mxu1 %vm2241_vm3, %v4259_v12  ;;  %v10357_v12 = vld [vmem:[%s12913_s2 + $0x2c0] ss:$8 sps:$4 sm:$0xff]   ;;  %v10359_v37 = vld [vmem:[%s12914_s3 + $0x18] sm:$0xf] }
 0x536   :  { %4047 = vmatprep.mubr.bf16.mxu0 %v10345_v32 }
 0x538   :  { %v3833_v33 = vpop.f32.mrb[148].mxu0 }
 0x539   :  { %v3835_v54 = vpop.f32.mrb[149].mxu0 }
 0x53a   :  { %v3836_v45 = vpop.f32.mrb[150].mxu0 }
 0x53b   :  { %v4260_v29 = vpack.c.bf16 %v3836_v45, %v3833_v33  ;;  %v3838_v46 = vpop.f32.mrb[151].mxu0 }
 0x53c   :  { %v10360_v46 = vld [vmem:[%s12913_s2 + $0x2d0] ss:$8 sps:$4 sm:$0xff]  }
 0x53d   :  { %4048 = vmatmul.mubr.bf16.gmra.mrb[0].mxu0 %v10346_v38  ;;  %9159 = vmatprep.mubr.msk.bf16.mxu1 %vm2241_vm3, %v4260_v29 }
 0x53e   :  { %4055 = vmatprep.mubr.bf16.mxu0 %v10347_v20 }
 0x540   :  { %v3841_v3 = vpop.f32.mrb[152].mxu0 }
 0x541   :  { %v3843_v5 = vpop.f32.mrb[153].mxu0 }
 0x542   :  { %v3844_v25 = vpop.f32.mrb[154].mxu0 }
 0x543   :  { %v4261_v24 = vpack.c.bf16 %v3844_v25, %v3841_v3  ;;  %v3846_v40 = vpop.f32.mrb[155].mxu0 }
 0x544   :  { %v10363_v40 = vld [vmem:[%s12913_s2 + $0x2f4] ss:$8 sps:$4 sm:$0xff]  }
 0x545   :  { %4056 = vmatmul.mubr.bf16.gmra.mrb[4].mxu0 %v10348_v49  ;;  %9160 = vmatmul.mubr.msk.bf16.vlgmr.msra.gmra.mrb[228].mxu1 %vm2241_vm3, %v4261_v24  ;;  %v10362_v24 = vld [vmem:[%s12913_s2 + $0x2e0] ss:$8 sps:$4 sm:$0xff]  }
 0x546   :  { %4063 = vmatprep.mubr.bf16.mxu0 %v10349_v51  ;;  %9168 = vmatpush3.bf16.msra.mxu1 %v11316_v2  ;;  %v10352_v2 = vld [vmem:[%s12913_s2 + $0x2a4] ss:$8 sps:$4 sm:$0xff]  }
 0x547   :  { %9972 = vmatprep.subr.msk.bf16.mxu1 %vm2254_vm0, %v10350_v52 }
 0x548   :  { %v3849_v57 = vpop.f32.mrb[156].mxu0 }
 0x549   :  { %v3851_v39 = vpop.f32.mrb[157].mxu0 }
 0x54a   :  { %v3852_v60 = vpop.f32.mrb[158].mxu0 }
 0x54b   :  { %v4262_v13 = vpack.c.bf16 %v3852_v60, %v3849_v57  ;;  %v3854_v14 = vpop.f32.mrb[159].mxu0  ;;  %v10364_v60 = vld [vmem:[%s12913_s2 + $0x2f0] ss:$8 sps:$4 sm:$0xff]  }
 0x54d   :  { %4064 = vmatmul.mubr.bf16.gmra.mrb[8].mxu0 %v10351_v16  ;;  %9163 = vmatprep.mubr.msk.bf16.mxu1 %vm2241_vm3, %v4262_v13  ;;  %v10365_v13 = vld [vmem:[%s12913_s2 + $0x304] ss:$8 sps:$4 sm:$0xff]  }
 0x54e   :  { %4071 = vmatprep.mubr.bf16.mxu0 %v10352_v2 }
 0x550   :  { %v3857_v6 = vpop.f32.mrb[160].mxu0 }
 0x551   :  { %v3859_v21 = vpop.f32.mrb[161].mxu0 }
 0x552   :  { %v3860_v18 = vpop.f32.mrb[162].mxu0 }
 0x553   :  { %v4263_v50 = vpack.c.bf16 %v3860_v18, %v3857_v6  ;;  %v3862_v62 = vpop.f32.mrb[163].mxu0  ;;  %v10366_v18 = vld [vmem:[%s12913_s2 + $0x300] ss:$8 sps:$4 sm:$0xff]  }
 0x554   :  { %v10368_v62 = vld [vmem:[%s12914_s3 + $0x1c] sm:$0xf] }
 0x555   :  { %4072 = vmatmul.mubr.bf16.gmra.mrb[12].mxu0 %v10353_v55  ;;  %9164 = vmatmul.mubr.msk.bf16.gmra.mrb[232].mxu1 %vm2241_vm3, %v4263_v50  ;;  %v10367_v50 = vld [vmem:[%s12913_s2 + $0x314] ss:$8 sps:$4 sm:$0xff]  }
 0x556   :  { %4079 = vmatprep.mubr.bf16.mxu0 %v10354_v1 }
 0x558   :  { %v3865_v23 = vpop.f32.mrb[164].mxu0 }
 0x559   :  { %v3867_v9 = vpop.f32.mrb[165].mxu0 }
 0x55a   :  { %v3868_v0 = vpop.f32.mrb[166].mxu0 }
 0x55b   :  { %v4264_v11 = vpack.c.bf16 %v3868_v0, %v3865_v23  ;;  %v3870_v8 = vpop.f32.mrb[167].mxu0 }
 0x55d   :  { %4080 = vmatmul.mubr.bf16.gmra.mrb[16].mxu0 %v10355_v10  ;;  %9169 = vmatprep.mubr.msk.bf16.mxu1 %vm2241_vm3, %v4264_v11  ;;  %v10369_v11 = vld [vmem:[%s12913_s2 + $0x310] ss:$8 sps:$4 sm:$0xff]  }
 0x55e   :  { %4087 = vmatprep.mubr.bf16.mxu0 %v10356_v56 }
 0x560   :  { %v3873_v22 = vpop.f32.mrb[168].mxu0 }
 0x561   :  { %v3875_v19 = vpop.f32.mrb[169].mxu0 }
 0x562   :  { %v3876_v4 = vpop.f32.mrb[170].mxu0 }
 0x563   :  { %v4265_v28 = vpack.c.bf16 %v3876_v4, %v3873_v22  ;;  %v3878_v63 = vpop.f32.mrb[171].mxu0  ;;  %v10371_v4 = vld [vmem:[%s12913_s2 + $0x320] ss:$8 sps:$4 sm:$0xff]  }
 0x565   :  { %4088 = vmatmul.mubr.bf16.gmra.mrb[20].mxu0 %v10357_v12  ;;  %9170 = vmatmul.mubr.msk.bf16.vlgmr.msra.gmra.mrb[228].mxu1 %vm2241_vm3, %v4265_v28  ;;  %v10372_v28 = vld [vmem:[%s12913_s2 + $0x334] ss:$8 sps:$4 sm:$0xff]  }
 0x566   :  { %4095 = vmatprep.mubr.bf16.mxu0 %v10358_v36  ;;  %9178 = vmatpush3.bf16.msra.mxu1 %v11343_v7  ;;  %v10361_v7 = vld [vmem:[%s12913_s2 + $0x2e4] ss:$8 sps:$4 sm:$0xff]  }
 0x567   :  { %9973 = vmatprep.subr.msk.bf16.mxu1 %vm2254_vm0, %v10359_v37 }
 0x568   :  { %v3881_v32 = vpop.f32.mrb[172].mxu0 }
 0x569   :  { %v3883_v33 = vpop.f32.mrb[173].mxu0 }
 0x56a   :  { %v3884_v54 = vpop.f32.mrb[174].mxu0  ;;  %v10373_v33 = vld [vmem:[%s12913_s2 + $0x330] ss:$8 sps:$4 sm:$0xff]  }
 0x56b   :  { %v4266_v45 = vpack.c.bf16 %v3884_v54, %v3881_v32  ;;  %v3886_v29 = vpop.f32.mrb[175].mxu0  ;;  %v10374_v54 = vld [vmem:[%s12913_s2 + $0x344] ss:$8 sps:$4 sm:$0xff]  }
 0x56d   :  { %4096 = vmatmul.mubr.bf16.gmra.mrb[24].mxu0 %v10360_v46  ;;  %9173 = vmatprep.mubr.msk.bf16.mxu1 %vm2241_vm3, %v4266_v45 }
 0x56e   :  { %4103 = vmatprep.mubr.bf16.mxu0 %v10361_v7 }
 0x570   :  { %v3889_v38 = vpop.f32.mrb[176].mxu0 }
 0x571   :  { %v3891_v20 = vpop.f32.mrb[177].mxu0 }
 0x572   :  { %v3892_v3 = vpop.f32.mrb[178].mxu0  ;;  %v10375_v20 = vld [vmem:[%s12913_s2 + $0x340] ss:$8 sps:$4 sm:$0xff]  }
 0x573   :  { %v4267_v5 = vpack.c.bf16 %v3892_v3, %v3889_v38  ;;  %v3894_v25 = vpop.f32.mrb[179].mxu0  ;;  %v10376_v3 = vld [vmem:[%s12913_s2 + $0x354] ss:$8 sps:$4 sm:$0xff]  }
 0x575   :  { %4104 = vmatmul.mubr.bf16.gmra.mrb[28].mxu0 %v10362_v24  ;;  %9174 = vmatmul.mubr.msk.bf16.gmra.mrb[232].mxu1 %vm2241_vm3, %v4267_v5  ;;  %v10377_v5 = vld [vmem:[%s12914_s3 + $0x20] sm:$0xf] }
 0x576   :  { %4111 = vmatprep.mubr.bf16.mxu0 %v10363_v40 }
 0x578   :  { %v3897_v49 = vpop.f32.mrb[180].mxu0 }
 0x579   :  { %v3899_v51 = vpop.f32.mrb[181].mxu0 }
 0x57a   :  { %v3900_v52 = vpop.f32.mrb[182].mxu0 }
 0x57b   :  { %v4268_v57 = vpack.c.bf16 %v3900_v52, %v3897_v49  ;;  %v3902_v39 = vpop.f32.mrb[183].mxu0  ;;  %v10378_v52 = vld [vmem:[%s12913_s2 + $0x350] ss:$8 sps:$4 sm:$0xff]  }
 0x57d   :  { %4112 = vmatmul.mubr.bf16.gmra.mrb[32].mxu0 %v10364_v60  ;;  %9179 = vmatprep.mubr.msk.bf16.mxu1 %vm2241_vm3, %v4268_v57 }
 0x57e   :  { %4119 = vmatprep.mubr.bf16.mxu0 %v10365_v13 }
 0x580   :  { %v3905_v14 = vpop.f32.mrb[184].mxu0 }
 0x581   :  { %v3907_v16 = vpop.f32.mrb[185].mxu0 }
 0x582   :  { %v3908_v2 = vpop.f32.mrb[186].mxu0  ;;  %v10380_v16 = vld [vmem:[%s12913_s2 + $0x360] ss:$8 sps:$4 sm:$0xff]  }
 0x583   :  { %v4269_v6 = vpack.c.bf16 %v3908_v2, %v3905_v14  ;;  %v3910_v21 = vpop.f32.mrb[187].mxu0  ;;  %v10381_v2 = vld [vmem:[%s12913_s2 + $0x374] ss:$8 sps:$4 sm:$0xff]  }
 0x585   :  { %4120 = vmatmul.mubr.bf16.gmra.mrb[36].mxu0 %v10366_v18  ;;  %9180 = vmatmul.mubr.msk.bf16.vlgmr.msra.gmra.mrb[228].mxu1 %vm2241_vm3, %v4269_v6 }
 0x586   :  { %4127 = vmatprep.mubr.bf16.mxu0 %v10367_v50  ;;  %9188 = vmatpush3.bf16.msra.mxu1 %v11367_v26  ;;  %v10370_v26 = vld [vmem:[%s12913_s2 + $0x324] ss:$8 sps:$4 sm:$0xff]  }
 0x587   :  { %9974 = vmatprep.subr.msk.bf16.mxu1 %vm2254_vm0, %v10368_v62 }
 0x588   :  { %v3913_v55 = vpop.f32.mrb[188].mxu0 }
 0x589   :  { %v3915_v1 = vpop.f32.mrb[189].mxu0 }
 0x58a   :  { %v3916_v23 = vpop.f32.mrb[190].mxu0  ;;  %v10383_v1 = vld [vmem:[%s12913_s2 + $0x384] ss:$8 sps:$4 sm:$0xff]  }
 0x58b   :  { %v4270_v9 = vpack.c.bf16 %v3916_v23, %v3913_v55  ;;  %v3918_v0 = vpop.f32.mrb[191].mxu0  ;;  %v10382_v55 = vld [vmem:[%s12913_s2 + $0x370] ss:$8 sps:$4 sm:$0xff]  }
 0x58d   :  { %4128 = vmatmul.mubr.bf16.gmra.mrb[40].mxu0 %v10369_v11  ;;  %9183 = vmatprep.mubr.msk.bf16.mxu1 %vm2241_vm3, %v4270_v9 }
 0x58e   :  { %4135 = vmatprep.mubr.bf16.mxu0 %v10370_v26 }
 0x590   :  { %v3921_v8 = vpop.f32.mrb[192].mxu0 }
 0x591   :  { %v3923_v10 = vpop.f32.mrb[193].mxu0 }
 0x592   :  { %v3924_v56 = vpop.f32.mrb[194].mxu0  ;;  %v10385_v10 = vld [vmem:[%s12913_s2 + $0x394] ss:$8 sps:$4 sm:$0xff]  }
 0x593   :  { %v4271_v22 = vpack.c.bf16 %v3924_v56, %v3921_v8  ;;  %v3926_v19 = vpop.f32.mrb[195].mxu0  ;;  %v10384_v8 = vld [vmem:[%s12913_s2 + $0x380] ss:$8 sps:$4 sm:$0xff]   ;;  %v10386_v56 = vld [vmem:[%s12914_s3 + $0x24] sm:$0xf] }
 0x595   :  { %4136 = vmatmul.mubr.bf16.gmra.mrb[44].mxu0 %v10371_v4  ;;  %9184 = vmatmul.mubr.msk.bf16.gmra.mrb[232].mxu1 %vm2241_vm3, %v4271_v22 }
 0x596   :  { %4143 = vmatprep.mubr.bf16.mxu0 %v10372_v28 }
 0x598   :  { %v3929_v63 = vpop.f32.mrb[196].mxu0 }
 0x599   :  { %v3931_v12 = vpop.f32.mrb[197].mxu0 }
 0x59a   :  { %v3932_v36 = vpop.f32.mrb[198].mxu0  ;;  %v10387_v12 = vld [vmem:[%s12913_s2 + $0x390] ss:$8 sps:$4 sm:$0xff]  }
 0x59b   :  { %v4272_v37 = vpack.c.bf16 %v3932_v36, %v3929_v63  ;;  %v3934_v32 = vpop.f32.mrb[199].mxu0 }
 0x59d   :  { %4144 = vmatmul.mubr.bf16.gmra.mrb[48].mxu0 %v10373_v33  ;;  %9189 = vmatprep.mubr.msk.bf16.mxu1 %vm2241_vm3, %v4272_v37 }
 0x59e   :  { %4151 = vmatprep.mubr.bf16.mxu0 %v10374_v54 }
 0x5a0   :  { %v3937_v45 = vpop.f32.mrb[200].mxu0 }
 0x5a1   :  { %v3939_v29 = vpop.f32.mrb[201].mxu0 }
 0x5a2   :  { %v3940_v46 = vpop.f32.mrb[202].mxu0  ;;  %v10390_v29 = vld [vmem:[%s12913_s2 + $0x3b4] ss:$8 sps:$4 sm:$0xff]  }
 0x5a3   :  { %v4273_v7 = vpack.c.bf16 %v3940_v46, %v3937_v45  ;;  %v3942_v38 = vpop.f32.mrb[203].mxu0  ;;  %v10389_v45 = vld [vmem:[%s12913_s2 + $0x3a0] ss:$8 sps:$4 sm:$0xff]  }
 0x5a5   :  { %4152 = vmatmul.mubr.bf16.gmra.mrb[52].mxu0 %v10375_v20  ;;  %9190 = vmatmul.mubr.msk.bf16.vlgmr.msra.gmra.mrb[228].mxu1 %vm2241_vm3, %v4273_v7 }
 0x5a6   :  { %4159 = vmatprep.mubr.bf16.mxu0 %v10376_v3  ;;  %9198 = vmatpush3.bf16.msra.mxu1 %v11397_v53  ;;  %v10379_v53 = vld [vmem:[%s12913_s2 + $0x364] ss:$8 sps:$4 sm:$0xff]  }
 0x5a7   :  { %9975 = vmatprep.subr.msk.bf16.mxu1 %vm2254_vm0, %v10377_v5  ;;  %v10391_v5 = vld [vmem:[%s12913_s2 + $0x3b0] ss:$8 sps:$4 sm:$0xff]  }
 0x5a8   :  { %v3945_v25 = vpop.f32.mrb[204].mxu0 }
 0x5a9   :  { %v3947_v24 = vpop.f32.mrb[205].mxu0 }
 0x5aa   :  { %v3948_v40 = vpop.f32.mrb[206].mxu0 }
 0x5ab   :  { %v4274_v49 = vpack.c.bf16 %v3948_v40, %v3945_v25  ;;  %v3950_v51 = vpop.f32.mrb[207].mxu0  ;;  %v10392_v25 = vld [vmem:[%s12913_s2 + $0x3c4] ss:$8 sps:$4 sm:$0xff]  }
 0x5ad   :  { %4160 = vmatmul.mubr.bf16.gmra.mrb[56].mxu0 %v10378_v52  ;;  %9193 = vmatprep.mubr.msk.bf16.mxu1 %vm2241_vm3, %v4274_v49 }
 0x5ae   :  { %4167 = vmatprep.mubr.bf16.mxu0 %v10379_v53  ;;  %v10393_v53 = vld [vmem:[%s12913_s2 + $0x3c0] ss:$8 sps:$4 sm:$0xff]  }
 0x5b0   :  { %v3953_v57 = vpop.f32.mrb[208].mxu0 }
 0x5b1   :  { %v3955_v39 = vpop.f32.mrb[209].mxu0 }
 0x5b2   :  { %v3956_v60 = vpop.f32.mrb[210].mxu0  ;;  %v10395_v39 = vld [vmem:[%s12914_s3 + $0x28] sm:$0xf] }
 0x5b3   :  { %v4275_v13 = vpack.c.bf16 %v3956_v60, %v3953_v57  ;;  %v3958_v14 = vpop.f32.mrb[211].mxu0  ;;  %v10394_v57 = vld [vmem:[%s12913_s2 + $0x3d4] ss:$8 sps:$4 sm:$0xff]  }
 0x5b5   :  { %4168 = vmatmul.mubr.bf16.gmra.mrb[60].mxu0 %v10380_v16  ;;  %9194 = vmatmul.mubr.msk.bf16.gmra.mrb[232].mxu1 %vm2241_vm3, %v4275_v13 }
 0x5b6   :  { %4175 = vmatprep.mubr.bf16.mxu0 %v10381_v2 }
 0x5b8   :  { %v3961_v6 = vpop.f32.mrb[212].mxu0 }
 0x5b9   :  { %v3963_v21 = vpop.f32.mrb[213].mxu0 }
 0x5ba   :  { %v3964_v18 = vpop.f32.mrb[214].mxu0 }
 0x5bb   :  { %v4276_v50 = vpack.c.bf16 %v3964_v18, %v3961_v6  ;;  %v3966_v62 = vpop.f32.mrb[215].mxu0  ;;  %v10396_v6 = vld [vmem:[%s12913_s2 + $0x3d0] ss:$8 sps:$4 sm:$0xff]  }
 0x5bd   :  { %4176 = vmatmul.mubr.bf16.gmra.mrb[64].mxu0 %v10382_v55  ;;  %9199 = vmatprep.mubr.msk.bf16.mxu1 %vm2241_vm3, %v4276_v50 }
 0x5be   :  { %4183 = vmatprep.mubr.bf16.mxu0 %v10383_v1  ;;  %v10398_v1 = vld [vmem:[%s12913_s2 + $0x3e0] ss:$8 sps:$4 sm:$0xff]  }
 0x5c0   :  { %v3969_v23 = vpop.f32.mrb[216].mxu0 }
 0x5c1   :  { %v3971_v9 = vpop.f32.mrb[217].mxu0 }
 0x5c2   :  { %v3972_v0 = vpop.f32.mrb[218].mxu0 }
 0x5c3   :  { %v4277_v11 = vpack.c.bf16 %v3972_v0, %v3969_v23  ;;  %v3974_v26 = vpop.f32.mrb[219].mxu0  ;;  %v10399_v23 = vld [vmem:[%s12913_s2 + $0x3f4] ss:$8 sps:$4 sm:$0xff]  }
 0x5c5   :  { %4184 = vmatmul.mubr.bf16.gmra.mrb[68].mxu0 %v10384_v8  ;;  %9200 = vmatmul.mubr.msk.bf16.vlgmr.msra.gmra.mrb[228].mxu1 %vm2241_vm3, %v4277_v11 }
 0x5c6   :  { %4191 = vmatprep.mubr.bf16.mxu0 %v10385_v10  ;;  %9208 = vmatpush3.bf16.msra.mxu1 %v11433_v34  ;;  %v10388_v34 = vld [vmem:[%s12913_s2 + $0x3a4] ss:$8 sps:$4 sm:$0xff]   ;;  %v10400_v10 = vld [vmem:[%s12913_s2 + $0x3f0] ss:$8 sps:$4 sm:$0xff]  }
 0x5c7   :  { %9976 = vmatprep.subr.msk.bf16.mxu1 %vm2254_vm0, %v10386_v56 }
 0x5c8   :  { %v3977_v22 = vpop.f32.mrb[220].mxu0 }
 0x5c9   :  { %v3979_v19 = vpop.f32.mrb[221].mxu0 }
 0x5ca   :  { %v3980_v4 = vpop.f32.mrb[222].mxu0 }
 0x5cb   :  { %v4278_v28 = vpack.c.bf16 %v3980_v4, %v3977_v22  ;;  %v3982_v63 = vpop.f32.mrb[223].mxu0 }
 0x5cc   :  { %v10401_v63 = vld [vmem:[%s12914_s3 + $0x2c] sm:$0xf] }
 0x5cd   :  { %4192 = vmatmul.mubr.bf16.gmra.mrb[72].mxu0 %v10387_v12  ;;  %9203 = vmatprep.mubr.msk.bf16.mxu1 %vm2241_vm3, %v4278_v28 }
 0x5ce   :  { %4199 = vmatprep.mubr.bf16.mxu0 %v10388_v34 }
 0x5d0   :  { %v3985_v36 = vpop.f32.mrb[224].mxu0 }
 0x5d1   :  { %v3987_v37 = vpop.f32.mrb[225].mxu0 }
 0x5d2   :  { %v3988_v32 = vpop.f32.mrb[226].mxu0 }
 0x5d3   :  { %v4279_v33 = vpack.c.bf16 %v3988_v32, %v3985_v36  ;;  %v3990_v54 = vpop.f32.mrb[227].mxu0 }
 0x5d5   :  { %4200 = vmatmul.mubr.bf16.gmra.mrb[76].mxu0 %v10389_v45  ;;  %9204 = vmatmul.mubr.msk.bf16.gmra.mrb[232].mxu1 %vm2241_vm3, %v4279_v33 }
 0x5d6   :  { %4207 = vmatprep.mubr.bf16.mxu0 %v10390_v29 }
 0x5d8   :  { %v3993_v46 = vpop.f32.mrb[228].mxu0 }
 0x5d9   :  { %v3995_v7 = vpop.f32.mrb[229].mxu0 }
 0x5da   :  { %v3996_v38 = vpop.f32.mrb[230].mxu0 }
 0x5db   :  { %v4280_v20 = vpack.c.bf16 %v3996_v38, %v3993_v46  ;;  %v3998_v3 = vpop.f32.mrb[231].mxu0 }
 0x5dd   :  { %4208 = vmatmul.mubr.bf16.gmra.mrb[80].mxu0 %v10391_v5  ;;  %9209 = vmatprep.mubr.msk.bf16.mxu1 %vm2241_vm3, %v4280_v20 }
 0x5de   :  { %4215 = vmatprep.mubr.bf16.mxu0 %v10392_v25 }
 0x5e0   :  { %v4001_v24 = vpop.f32.mrb[232].mxu0 }
 0x5e1   :  { %v4003_v40 = vpop.f32.mrb[233].mxu0 }
 0x5e2   :  { %v4004_v49 = vpop.f32.mrb[234].mxu0 }
 0x5e3   :  { %v4281_v51 = vpack.c.bf16 %v4004_v49, %v4001_v24  ;;  %v4006_v52 = vpop.f32.mrb[235].mxu0 }
 0x5e5   :  { %4216 = vmatmul.mubr.bf16.gmra.mrb[84].mxu0 %v10393_v53  ;;  %9210 = vmatmul.mubr.msk.bf16.vlgmr.msra.gmra.mrb[228].mxu1 %vm2241_vm3, %v4281_v51  ;;  %v10402_v51 = vld [vmem:[%s12914_s3 + $0x30] sm:$0xf] }
 0x5e6   :  { %4223 = vmatprep.mubr.bf16.mxu0 %v10394_v57  ;;  %9218 = vmatpush3.bf16.msra.mxu1 %v11469_v44  ;;  %v10397_v44 = vld [vmem:[%s12913_s2 + $0x3e4] ss:$8 sps:$4 sm:$0xff]  }
 0x5e7   :  { %9977 = vmatprep.subr.msk.bf16.mxu1 %vm2254_vm0, %v10395_v39 }
 0x5e8   :  { %v4009_v60 = vpop.f32.mrb[236].mxu0 }
 0x5e9   :  { %v4011_v13 = vpop.f32.mrb[237].mxu0 }
 0x5ea   :  { %v4012_v14 = vpop.f32.mrb[238].mxu0 }
 0x5eb   :  { %v4282_v16 = vpack.c.bf16 %v4012_v14, %v4009_v60  ;;  %v4014_v2 = vpop.f32.mrb[239].mxu0 }
 0x5ed   :  { %4224 = vmatmul.mubr.bf16.gmra.mrb[88].mxu0 %v10396_v6  ;;  %9213 = vmatprep.mubr.msk.bf16.mxu1 %vm2241_vm3, %v4282_v16 }
 0x5ee   :  { %4231 = vmatprep.mubr.bf16.mxu0 %v10397_v44 }
 0x5f0   :  { %v4017_v21 = vpop.f32.mrb[240].mxu0 }
 0x5f1   :  { %v4019_v18 = vpop.f32.mrb[241].mxu0 }
 0x5f2   :  { %v4020_v50 = vpop.f32.mrb[242].mxu0 }
 0x5f3   :  { %v4283_v62 = vpack.c.bf16 %v4020_v50, %v4017_v21  ;;  %v4022_v55 = vpop.f32.mrb[243].mxu0 }
 0x5f5   :  { %4232 = vmatmul.mubr.bf16.gmra.mrb[92].mxu0 %v10398_v1  ;;  %9214 = vmatmul.mubr.msk.bf16.gmra.mrb[232].mxu1 %vm2241_vm3, %v4283_v62 }
 0x5f6   :  { %4239 = vmatprep.mubr.bf16.mxu0 %v10399_v23 }
 0x5f8   :  { %v4025_v9 = vpop.f32.mrb[244].mxu0 }
 0x5f9   :  { %v4027_v0 = vpop.f32.mrb[245].mxu0 }
 0x5fa   :  { %v4028_v11 = vpop.f32.mrb[246].mxu0  ;;  %v10403_v0 = vld [vmem:[%s12914_s3 + $0x34] sm:$0xf] }
 0x5fb   :  { %v4284_v26 = vpack.c.bf16 %v4028_v11, %v4025_v9  ;;  %v4030_v8 = vpop.f32.mrb[247].mxu0 }
 0x5fd   :  { %4240 = vmatmul.mubr.bf16.gmra.mrb[96].mxu0 %v10400_v10  ;;  %9219 = vmatprep.mubr.msk.bf16.mxu1 %vm2241_vm3, %v4284_v26 }
 0x600   :  { %v4033_v56 = vpop.f32.mrb[248].mxu0 }
 0x601   :  { %v4035_v22 = vpop.f32.mrb[249].mxu0 }
 0x602   :  { %v4036_v19 = vpop.f32.mrb[250].mxu0 }
 0x603   :  { %v4285_v4 = vpack.c.bf16 %v4036_v19, %v4033_v56  ;;  %v4038_v28 = vpop.f32.mrb[251].mxu0 }
 0x605   :  { %9220 = vmatmul.mubr.msk.bf16.vlgmr.msra.gmra.mrb[228].mxu1 %vm2241_vm3, %v4285_v4 }
 0x606   :  { %9228 = vmatpush3.bf16.msra.mxu1 %v11496_v30 }
 0x607   :  { %9978 = vmatprep.subr.msk.bf16.mxu1 %vm2254_vm0, %v10401_v63 }
 0x608   :  { %v4041_v12 = vpop.f32.mrb[252].mxu0 }
 0x609   :  { %v4043_v34 = vpop.f32.mrb[253].mxu0 }
 0x60a   :  { %v4044_v36 = vpop.f32.mrb[254].mxu0 }
 0x60b   :  { %v4286_v37 = vpack.c.bf16 %v4044_v36, %v4041_v12  ;;  %v4046_v32 = vpop.f32.mrb[255].mxu0 }
 0x60d   :  { %9223 = vmatprep.mubr.msk.bf16.mxu1 %vm2241_vm3, %v4286_v37 }
 0x610   :  { %v4049_v33 = vpop.f32.mrb[0].mxu0 }
 0x611   :  { %v4051_v54 = vpop.f32.mrb[1].mxu0 }
 0x612   :  { %v4052_v45 = vpop.f32.mrb[2].mxu0 }
 0x613   :  { %v4287_v29 = vpack.c.bf16 %v4052_v45, %v4049_v33  ;;  %v4054_v46 = vpop.f32.mrb[3].mxu0 }
 0x614   :  { %v10404_v46 = vld [vmem:[%s12914_s3 + $0x38] sm:$0xf] }
 0x615   :  { %9224 = vmatmul.mubr.msk.bf16.gmra.mrb[232].mxu1 %vm2241_vm3, %v4287_v29 }
 0x618   :  { %v4057_v30 = vpop.f32.mrb[4].mxu0 }
 0x619   :  { %v4059_v7 = vpop.f32.mrb[5].mxu0 }
 0x61a   :  { %v4060_v38 = vpop.f32.mrb[6].mxu0 }
 0x61b   :  { %v4288_v20 = vpack.c.bf16 %v4060_v38, %v4057_v30  ;;  %v4062_v3 = vpop.f32.mrb[7].mxu0 }
 0x61d   :  { %9229 = vmatprep.mubr.msk.bf16.mxu1 %vm2241_vm3, %v4288_v20 }
 0x620   :  { %v4065_v5 = vpop.f32.mrb[8].mxu0 }
 0x621   :  { %v4067_v25 = vpop.f32.mrb[9].mxu0 }
 0x622   :  { %v4068_v24 = vpop.f32.mrb[10].mxu0 }
 0x623   :  { %v4289_v40 = vpack.c.bf16 %v4068_v24, %v4065_v5  ;;  %v4070_v49 = vpop.f32.mrb[11].mxu0 }
 0x625   :  { %9230 = vmatmul.mubr.msk.bf16.vlgmr.msra.gmra.mrb[228].mxu1 %vm2241_vm3, %v4289_v40 }
 0x626   :  { %9238 = vmatpush3.bf16.msra.mxu1 %v11508_v17 }
 0x627   :  { %9979 = vmatprep.subr.msk.bf16.mxu1 %vm2254_vm0, %v10402_v51 }
 0x628   :  { %v4073_v52 = vpop.f32.mrb[12].mxu0 }
 0x629   :  { %v4075_v53 = vpop.f32.mrb[13].mxu0 }
 0x62a   :  { %v4076_v57 = vpop.f32.mrb[14].mxu0 }
 0x62b   :  { %v4290_v39 = vpack.c.bf16 %v4076_v57, %v4073_v52  ;;  %v4078_v60 = vpop.f32.mrb[15].mxu0 }
 0x62d   :  { %9233 = vmatprep.mubr.msk.bf16.mxu1 %vm2241_vm3, %v4290_v39 }
 0x630   :  { %v4081_v13 = vpop.f32.mrb[16].mxu0 }
 0x631   :  { %v4083_v14 = vpop.f32.mrb[17].mxu0 }
 0x632   :  { %v4084_v16 = vpop.f32.mrb[18].mxu0 }
 0x633   :  { %v4291_v2 = vpack.c.bf16 %v4084_v16, %v4081_v13  ;;  %v4086_v6 = vpop.f32.mrb[19].mxu0 }
 0x635   :  { %9234 = vmatmul.mubr.msk.bf16.gmra.mrb[232].mxu1 %vm2241_vm3, %v4291_v2  ;;  %v10405_v2 = vld [vmem:[%s12914_s3 + $0x3c] sm:$0xf] }
 0x638   :  { %v4089_v17 = vpop.f32.mrb[20].mxu0 }
 0x639   :  { %v4091_v44 = vpop.f32.mrb[21].mxu0 }
 0x63a   :  { %v4092_v21 = vpop.f32.mrb[22].mxu0 }
 0x63b   :  { %v4292_v18 = vpack.c.bf16 %v4092_v21, %v4089_v17  ;;  %v4094_v50 = vpop.f32.mrb[23].mxu0 }
 0x63d   :  { %9239 = vmatprep.mubr.msk.bf16.mxu1 %vm2241_vm3, %v4292_v18 }
 0x640   :  { %v4097_v62 = vpop.f32.mrb[24].mxu0 }
 0x641   :  { %v4099_v55 = vpop.f32.mrb[25].mxu0 }
 0x642   :  { %v4100_v1 = vpop.f32.mrb[26].mxu0 }
 0x643   :  { %v4293_v23 = vpack.c.bf16 %v4100_v1, %v4097_v62  ;;  %v4102_v9 = vpop.f32.mrb[27].mxu0 }
 0x645   :  { %9240 = vmatmul.mubr.msk.bf16.vlgmr.msra.gmra.mrb[228].mxu1 %vm2241_vm3, %v4293_v23 }
 0x646   :  { %9248 = vmatpush3.bf16.msra.mxu1 %v11520_v15 }
 0x647   :  { %9980 = vmatprep.subr.msk.bf16.mxu1 %vm2254_vm0, %v10403_v0 }
 0x648   :  { %v4105_v11 = vpop.f32.mrb[28].mxu0 }
 0x649   :  { %v4107_v26 = vpop.f32.mrb[29].mxu0 }
 0x64a   :  { %v4108_v8 = vpop.f32.mrb[30].mxu0 }
 0x64b   :  { %v4294_v10 = vpack.c.bf16 %v4108_v8, %v4105_v11  ;;  %v4110_v56 = vpop.f32.mrb[31].mxu0 }
 0x64d   :  { %9243 = vmatprep.mubr.msk.bf16.mxu1 %vm2241_vm3, %v4294_v10 }
 0x650   :  { %v4113_v22 = vpop.f32.mrb[32].mxu0 }
 0x651   :  { %v4115_v19 = vpop.f32.mrb[33].mxu0 }
 0x652   :  { %v4116_v4 = vpop.f32.mrb[34].mxu0 }
 0x653   :  { %v4295_v28 = vpack.c.bf16 %v4116_v4, %v4113_v22  ;;  %v4118_v63 = vpop.f32.mrb[35].mxu0 }
 0x655   :  { %9244 = vmatmul.mubr.msk.bf16.gmra.mrb[232].mxu1 %vm2241_vm3, %v4295_v28 }
 0x658   :  { %v4121_v15 = vpop.f32.mrb[36].mxu0 }
 0x659   :  { %v4123_v12 = vpop.f32.mrb[37].mxu0 }
 0x65a   :  { %v4124_v34 = vpop.f32.mrb[38].mxu0 }
 0x65b   :  { %v4296_v36 = vpack.c.bf16 %v4124_v34, %v4121_v15  ;;  %v4126_v37 = vpop.f32.mrb[39].mxu0 }
 0x65d   :  { %9249 = vmatprep.mubr.msk.bf16.mxu1 %vm2241_vm3, %v4296_v36 }
 0x660   :  { %v4129_v32 = vpop.f32.mrb[40].mxu0 }
 0x661   :  { %v4131_v33 = vpop.f32.mrb[41].mxu0 }
 0x662   :  { %v4132_v54 = vpop.f32.mrb[42].mxu0 }
 0x663   :  { %v4297_v45 = vpack.c.bf16 %v4132_v54, %v4129_v32  ;;  %v4134_v29 = vpop.f32.mrb[43].mxu0 }
 0x665   :  { %9250 = vmatmul.mubr.msk.bf16.vlgmr.msra.gmra.mrb[228].mxu1 %vm2241_vm3, %v4297_v45 }
 0x666   :  { %9258 = vmatpush3.bf16.msra.mxu1 %v11532_v27 }
 0x667   :  { %9981 = vmatprep.subr.msk.bf16.mxu1 %vm2254_vm0, %v10404_v46 }
 0x668   :  { %v4137_v30 = vpop.f32.mrb[44].mxu0 }
 0x669   :  { %v4139_v7 = vpop.f32.mrb[45].mxu0 }
 0x66a   :  { %v4140_v38 = vpop.f32.mrb[46].mxu0 }
 0x66b   :  { %v4298_v20 = vpack.c.bf16 %v4140_v38, %v4137_v30  ;;  %v4142_v3 = vpop.f32.mrb[47].mxu0 }
 0x66d   :  { %9253 = vmatprep.mubr.msk.bf16.mxu1 %vm2241_vm3, %v4298_v20 }
 0x670   :  { %v4145_v5 = vpop.f32.mrb[48].mxu0 }
 0x671   :  { %v4147_v25 = vpop.f32.mrb[49].mxu0 }
 0x672   :  { %v4148_v24 = vpop.f32.mrb[50].mxu0 }
 0x673   :  { %v4299_v40 = vpack.c.bf16 %v4148_v24, %v4145_v5  ;;  %v4150_v49 = vpop.f32.mrb[51].mxu0 }
 0x675   :  { %9254 = vmatmul.mubr.msk.bf16.gmra.mrb[232].mxu1 %vm2241_vm3, %v4299_v40 }
 0x678   :  { %v4153_v27 = vpop.f32.mrb[52].mxu0 }
 0x679   :  { %v4155_v51 = vpop.f32.mrb[53].mxu0 }
 0x67a   :  { %v4156_v52 = vpop.f32.mrb[54].mxu0 }
 0x67b   :  { %v4300_v53 = vpack.c.bf16 %v4156_v52, %v4153_v27  ;;  %v4158_v57 = vpop.f32.mrb[55].mxu0 }
 0x67d   :  { %9259 = vmatprep.mubr.msk.bf16.mxu1 %vm2241_vm3, %v4300_v53 }
 0x680   :  { %v4161_v39 = vpop.f32.mrb[56].mxu0 }
 0x681   :  { %v4163_v60 = vpop.f32.mrb[57].mxu0 }
 0x682   :  { %v4164_v13 = vpop.f32.mrb[58].mxu0  ;;  %v3671_v60 = vmul.f32 0.2, %v11749_v42 }
 0x683   :  { %v4301_v14 = vpack.c.bf16 %v4164_v13, %v4161_v39  ;;  %v4166_v16 = vpop.f32.mrb[59].mxu0  ;;  %v3672_v39 = vmul.f32 0.2, %v11753_v48 }
 0x684   :  { %v12210_v16 = vsel %vm3663_vm4, %v11749_v42, %v3671_v60 }
 0x685   :  { %9260 = vmatmul.mubr.msk.bf16.vlgmr.msra.gmra.mrb[228].mxu1 %vm2241_vm3, %v4301_v14  ;;  %v3673_v14 = vmul.f32 0.2, %v11747_v41 }
 0x686   :  { %9268 = vmatpush3.bf16.msra.mxu1 %v11544_v47 }
 0x687   :  { %9982 = vmatprep.subr.msk.bf16.mxu1 %vm2254_vm0, %v10405_v2  ;;  %vm3664_vm0 = vcmp.ge.f32.partialorder %v11753_v48, 0.0 }
 0x688   :  { %v4169_v6 = vpop.f32.mrb[60].mxu0  ;;  %v12206_v13 = vsel %vm3664_vm0, %v11753_v48, %v3672_v39  ;;  %v12220_v48 = vsel %vm3665_vm6, %v11747_v41, %v3673_v14  ;;  %vm10408_vm6 = vmmov 0  }
 0x689   :  { %v4171_v17 = vpop.f32.mrb[61].mxu0  ;;  %v5682_v2 = vsel %vm5680_vm5, %v12206_v13, 0.0 }
 0x68a   :  { %v4172_v44 = vpop.f32.mrb[62].mxu0  ;;  %v5681_v17 = vsel %vm5680_vm5, %v12210_v16, 0.0 }
 0x68b   :  { %v4302_v21 = vpack.c.bf16 %v4172_v44, %v4169_v6  ;;  %v4174_v18 = vpop.f32.mrb[63].mxu0  ;;  %v3674_v6 = vmul.f32 0.2, %v11751_v43  ;;  %v5683_v44 = vadd.f32 %v5682_v2, %v5681_v17 }
 0x68c   :  { %v5684_v18 = vsel %vm5680_vm5, %v12220_v48, 0.0 }
 0x68d   :  { %9263 = vmatprep.mubr.msk.bf16.mxu1 %vm2241_vm3, %v4302_v21  ;;  %v3675_v21 = vmul.f32 0.2, %v11769_v59  ;;  %v12225_v42 = vsel %vm3666_vm7, %v11751_v43, %v3674_v6  ;;  %v3678_v43 = vmul.f32 0.2, %v11771_v61 }
 0x68e   :  { %v5686_v41 = vsel %vm5680_vm5, %v12225_v42, 0.0 }
 0x690   :  { %v4177_v50 = vpop.f32.mrb[64].mxu0 }
 0x691   :  { %v4179_v62 = vpop.f32.mrb[65].mxu0 }
 0x692   :  { %v4180_v55 = vpop.f32.mrb[66].mxu0  ;;  %v5685_v62 = vadd.f32 %v5684_v18, %v5683_v44 }
 0x693   :  { %v4303_v1 = vpack.c.bf16 %v4180_v55, %v4177_v50  ;;  %v4182_v23 = vpop.f32.mrb[67].mxu0  ;;  %v3676_v50 = vmul.f32 0.2, %v11773_v35  ;;  %v12231_v55 = vsel %vm3667_vm8, %v11769_v59, %v3675_v21  ;;  %v10220_v59 = vld [vmem:[%s12915_s6] sm:$0xff]  }
 0x694   :  { %v5688_v23 = vsel %vm5680_vm5, %v12231_v55, 0.0  ;;  %9431 = vmatprep.mubr.msk.bf16.mxu0 %vm5971_vm11, %v10220_v59 }
 0x695   :  { %9264 = vmatmul.mubr.msk.bf16.gmra.mrb[232].mxu1 %vm2241_vm3, %v4303_v1  ;;  %v3677_v1 = vmul.f32 0.2, %v11767_v58 }
 0x698   :  { %v4185_v47 = vpop.f32.mrb[68].mxu0 }
 0x699   :  { %v4187_v9 = vpop.f32.mrb[69].mxu0 }
 0x69a   :  { %v4188_v0 = vpop.f32.mrb[70].mxu0  ;;  %v5687_v9 = vadd.f32 %v5686_v41, %v5685_v62 }
 0x69b   :  { %v4304_v11 = vpack.c.bf16 %v4188_v0, %v4185_v47  ;;  %v4190_v26 = vpop.f32.mrb[71].mxu0  ;;  %v12242_v47 = vsel %vm3668_vm9, %v11773_v35, %v3676_v50 }
 0x69c   :  { %v12251_v26 = vsel %vm3669_vm10, %v11767_v58, %v3677_v1  ;;  %v5690_v35 = vsel %vm5680_vm5, %v12242_v47, 0.0 }
 0x69d   :  { %9269 = vmatprep.mubr.msk.bf16.mxu1 %vm2241_vm3, %v4304_v11 }
 0x6a0   :  { %v4193_v8 = vpop.f32.mrb[72].mxu0 }
 0x6a1   :  { %v4195_v10 = vpop.f32.mrb[73].mxu0 }
 0x6a2   :  { %v4196_v56 = vpop.f32.mrb[74].mxu0 }
 0x6a3   :  { %v4305_v22 = vpack.c.bf16 %v4196_v56, %v4193_v8  ;;  %v4198_v19 = vpop.f32.mrb[75].mxu0  ;;  %v5689_v8 = vadd.f32 %v5688_v23, %v5687_v9  ;;  %v12256_v56 = vsel %vm3670_vm12, %v11771_v61, %v3678_v43 }
 0x6a4   :  { %v5694_v58 = vsel %vm5680_vm5, %v12256_v56, 0.0 }
 0x6a5   :  { %9270 = vmatmul.mubr.msk.bf16.vlgmr.msra.gmra.mrb[228].mxu1 %vm2241_vm3, %v4305_v22 }
 0x6a6   :  { %9278 = vmatpush3.bf16.msra.mxu1 %v11556_v31 }
 0x6a8   :  { %v4201_v4 = vpop.f32.mrb[76].mxu0 }
 0x6a9   :  { %v4203_v28 = vpop.f32.mrb[77].mxu0 }
 0x6aa   :  { %v4204_v63 = vpop.f32.mrb[78].mxu0 }
 0x6ab   :  { %v4306_v15 = vpack.c.bf16 %v4204_v63, %v4201_v4  ;;  %v4206_v12 = vpop.f32.mrb[79].mxu0  ;;  %v5692_v63 = vsel %vm5680_vm5, %v12251_v26, 0.0 }
 0x6ad   :  { %9273 = vmatprep.mubr.msk.bf16.mxu1 %vm2241_vm3, %v4306_v15  ;;  %v5691_v15 = vadd.f32 %v5690_v35, %v5689_v8 }
 0x6b0   :  { %v4209_v34 = vpop.f32.mrb[80].mxu0 }
 0x6b1   :  { %v4211_v36 = vpop.f32.mrb[81].mxu0 }
 0x6b2   :  { %v4212_v37 = vpop.f32.mrb[82].mxu0 }
 0x6b3   :  { %v4307_v32 = vpack.c.bf16 %v4212_v37, %v4209_v34  ;;  %v4214_v33 = vpop.f32.mrb[83].mxu0 }
 0x6b5   :  { %9274 = vmatmul.mubr.msk.bf16.gmra.mrb[232].mxu1 %vm2241_vm3, %v4307_v32 }
 0x6b8   :  { %v4217_v54 = vpop.f32.mrb[84].mxu0 }
 0x6b9   :  { %v4219_v45 = vpop.f32.mrb[85].mxu0 }
 0x6ba   :  { %v4220_v29 = vpop.f32.mrb[86].mxu0 }
 0x6bb   :  { %v4308_v46 = vpack.c.bf16 %v4220_v29, %v4217_v54  ;;  %v4222_v30 = vpop.f32.mrb[87].mxu0  ;;  %v5693_v54 = vadd.f32 %v5692_v63, %v5691_v15 }
 0x6bd   :  { %9279 = vmatprep.mubr.msk.bf16.mxu1 %vm2241_vm3, %v4308_v46  ;;  %v5695_v46 = vadd.f32 %v5694_v58, %v5693_v54 }
 0x6c0   :  { %v4225_v31 = vpop.f32.mrb[88].mxu0 }
 0x6c1   :  { %v4227_v7 = vpop.f32.mrb[89].mxu0 }
 0x6c2   :  { %v4228_v38 = vpop.f32.mrb[90].mxu0 }
 0x6c3   :  { %v4309_v20 = vpack.c.bf16 %v4228_v38, %v4225_v31  ;;  %v4230_v3 = vpop.f32.mrb[91].mxu0 }
 0x6c5   :  { %9280 = vmatmul.mubr.msk.bf16.vlgmr.msra.gmra.mrb[228].mxu1 %vm2241_vm3, %v4309_v20 }
 0x6c8   :  { %v4233_v5 = vpop.f32.mrb[92].mxu0 }
 0x6c9   :  { %v4235_v25 = vpop.f32.mrb[93].mxu0 }
 0x6ca   :  { %v4236_v24 = vpop.f32.mrb[94].mxu0  ;;  %v5696_v25 = vrot.slane %v5695_v46, 4 }
 0x6cb   :  { %v4310_v40 = vpack.c.bf16 %v4236_v24, %v4233_v5  ;;  %v4238_v49 = vpop.f32.mrb[95].mxu0 }
 0x6cc   :  { %v5697_v14 = vadd.f32 %v5696_v25, %v5695_v46 }
 0x6cd   :  { %9283 = vmatprep.mubr.msk.bf16.mxu1 %vm2241_vm3, %v4310_v40 }
 0x6ce   :  { %v5698_v18 = vrot.slane %v5697_v14, 2 }
 0x6d0   :  { %v4241_v27 = vpop.f32.mrb[96].mxu0  ;;  %v5699_v41 = vadd.f32 %v5698_v18, %v5697_v14 }
 0x6d1   :  { %v4243_v51 = vpop.f32.mrb[97].mxu0 }
 0x6d2   :  { %v4244_v52 = vpop.f32.mrb[98].mxu0  ;;  %v5700_v23 = vrot.slane %v5699_v41, 1 }
 0x6d3   :  { %v4311_v53 = vpack.c.bf16 %v4244_v52, %v4241_v27  ;;  %v4246_v57 = vpop.f32.mrb[99].mxu0 }
 0x6d5   :  { %9284 = vmatmul.mubr.msk.bf16.gmra.mrb[232].mxu1 %vm2241_vm3, %v4311_v53 }
 0x6d6   :  { %9295 = vmatprep.mubr.msk.bf16.mxu1 %vm5971_vm11, %v10220_v59 }
 0x798   :  { %v9281_v0 = vpop.f32.mrb[228].mxu1 }
 0x799   :  { %v5617_v11 = vpop.f32.mrb[229].mxu1  ;;  %vm5658_vm13 = vcmp.ge.f32.partialorder %v9281_v0, 0.0  ;;  %v5666_v22 = vmul.f32 0.2, %v9281_v0 }
 0x79a   :  { %v9282_v10 = vpop.f32.mrb[230].mxu1  ;;  %v5664_v19 = vmul.f32 0.2, %v5617_v11  ;;  %vm5656_vm14 = vcmp.ge.f32.partialorder %v5617_v11, 0.0 }
 0x79b   :  { %v5620_v4 = vpop.f32.mrb[231].mxu1  ;;  %v12264_v34 = vsel %vm5658_vm13, %v9281_v0, %v5666_v22  ;;  %vm5659_vm1 = vcmp.ge.f32.partialorder %v9282_v10, 0.0  ;;  %v5667_v37 = vmul.f32 0.2, %v9282_v10  ;;  %v5701_v0 = vadd.f32 %v5700_v23, %v5699_v41 }
 0x79c   :  { %vm5657_vm15 = vcmp.ge.f32.partialorder %v5620_v4, 0.0  ;;  %v5665_v28 = vmul.f32 0.2, %v5620_v4  ;;  %v12266_v61 = vsel %vm5656_vm14, %v5617_v11, %v5664_v19  ;;  %v5706_v32 = vsel %vm5680_vm5, %v12264_v34, 0.0 }
 0x79d   :  { %v5703_v33 = vsel %vm5680_vm5, %v12266_v61, 0.0  ;;  %v12274_v29 = vsel %vm5659_vm1, %v9282_v10, %v5667_v37 }
 0x79e   :  { %v12262_v12 = vsel %vm5657_vm15, %v5620_v4, %v5665_v28  ;;  %v5708_v7 = vsel %vm5680_vm5, %v12274_v29, 0.0 }
 0x79f   :  { %v5704_v36 = vsel %vm5680_vm5, %v12262_v12, 0.0 }
 0x7a0   :  { %v5705_v45 = vadd.f32 %v5704_v36, %v5703_v33 }
 0x7a2   :  { %v5707_v30 = vadd.f32 %v5706_v32, %v5705_v45 }
 0x7a4   :  { %v5709_v24 = vadd.f32 %v5708_v7, %v5707_v30 }
 0x7a8   :  { %v9285_v31 = vpop.f32.mrb[232].mxu1 }
 0x7a9   :  { %v5633_v38 = vpop.f32.mrb[233].mxu1  ;;  %v5670_v20 = vmul.f32 0.2, %v9285_v31  ;;  %vm5662_vm3 = vcmp.ge.f32.partialorder %v9285_v31, 0.0 }
 0x7aa   :  { %vm5660_vm2 = vcmp.ge.f32.partialorder %v5633_v38, 0.0  ;;  %v5668_v3 = vmul.f32 0.2, %v5633_v38  ;;  %v9286_v5 = vpop.f32.mrb[234].mxu1 }
 0x7ab   :  { %v5636_v40 = vpop.f32.mrb[235].mxu1  ;;  %v5671_v27 = vmul.f32 0.2, %v9286_v5  ;;  %vm5663_vm4 = vcmp.ge.f32.partialorder %v9286_v5, 0.0  ;;  %v12282_v53 = vsel %vm5662_vm3, %v9285_v31, %v5670_v20 }
 0x7ac   :  { %v12278_v49 = vsel %vm5660_vm2, %v5633_v38, %v5668_v3  ;;  %vm5661_vm0 = vcmp.ge.f32.partialorder %v5636_v40, 0.0  ;;  %v5669_v51 = vmul.f32 0.2, %v5636_v40  ;;  %v5714_v17 = vsel %vm5680_vm5, %v12282_v53, 0.0 }
 0x7ad   :  { %v5710_v52 = vsel %vm5680_vm5, %v12278_v49, 0.0  ;;  %v12288_v2 = vsel %vm5663_vm4, %v9286_v5, %v5671_v27 }
 0x7ae   :  { %v5711_v57 = vadd.f32 %v5710_v52, %v5709_v24  ;;  %v12284_v39 = vsel %vm5661_vm0, %v5636_v40, %v5669_v51  ;;  %v5716_v21 = vsel %vm5680_vm5, %v12288_v2, 0.0 }
 0x7af   :  { %v5712_v60 = vsel %vm5680_vm5, %v12284_v39, 0.0 }
 0x7b0   :  { %v5713_v6 = vadd.f32 %v5712_v60, %v5711_v57 }
 0x7b2   :  { %v5715_v44 = vadd.f32 %v5714_v17, %v5713_v6 }
 0x7b4   :  { %v5717_v50 = vadd.f32 %v5716_v21, %v5715_v44 }
 0x7b6   :  { %v5718_v62 = vrot.slane %v5717_v50, 4 }
 0x7b8   :  { %v5719_v1 = vadd.f32 %v5718_v62, %v5717_v50 }
 0x7ba   :  { %v5720_v43 = vrot.slane %v5719_v1, 2 }
 0x7bc   :  { %v5721_v59 = vadd.f32 %v5720_v43, %v5719_v1 }
 0x7be   :  { %v5722_v9 = vrot.slane %v5721_v59, 1 }
 0x7c0   :  { %v5723_v11 = vadd.f32 %v5722_v9, %v5721_v59 }
 0x7c2   :  { %v5724_v8 = vadd.f32 %v5723_v11, %v5701_v0 }
 0x7c4   :  { %v12294_v35 = vmul.f32 0.0078125, %v5724_v8 }
 0x7c6   :  { %v5727_v10 = vsub.f32 %v12210_v16, %v12294_v35  ;;  %v5728_v22 = vsub.f32 %v12206_v13, %v12294_v35  ;;  %v5729_v19 = vsub.f32 %v12220_v48, %v12294_v35  ;;  %v5730_v4 = vsub.f32 %v12225_v42, %v12294_v35 }
 0x7c7   :  { %v5731_v28 = vsub.f32 %v12231_v55, %v12294_v35  ;;  %v5732_v36 = vsub.f32 %v12242_v47, %v12294_v35  ;;  %v5733_v54 = vsub.f32 %v12251_v26, %v12294_v35  ;;  %v5765_v31 = vsub.f32 %v12266_v61, %v12294_v35 }
 0x7c8   :  { %v5735_v63 = vmul.f32 %v5727_v10, %v5727_v10  ;;  %v5736_v58 = vmul.f32 %v5728_v22, %v5728_v22  ;;  %v5737_v15 = vmul.f32 %v5729_v19, %v5729_v19  ;;  %v5738_v37 = vmul.f32 %v5730_v4, %v5730_v4 }
 0x7c9   :  { %v5739_v45 = vmul.f32 %v5731_v28, %v5731_v28  ;;  %v5766_v7 = vsub.f32 %v12262_v12, %v12294_v35  ;;  %v5767_v38 = vsub.f32 %v12264_v34, %v12294_v35  ;;  %v5734_v20 = vsub.f32 %v12256_v56, %v12294_v35 }
 0x7ca   :  { %v5743_v32 = vsel %vm5680_vm5, %v5735_v63, 0.0  ;;  %v5744_v33 = vsel %vm5680_vm5, %v5736_v58, 0.0  ;;  %v5746_v30 = vsel %vm5680_vm5, %v5737_v15, 0.0  ;;  %v5768_v5 = vsub.f32 %v12274_v29, %v12294_v35 }
 0x7cb   :  { %v5745_v46 = vadd.f32 %v5744_v33, %v5743_v32  ;;  %v5740_v25 = vmul.f32 %v5732_v36, %v5732_v36  ;;  %v5748_v24 = vsel %vm5680_vm5, %v5738_v37, 0.0  ;;  %v5773_v40 = vmul.f32 %v5765_v31, %v5765_v31 }
 0x7cc   :  { %v5774_v27 = vmul.f32 %v5766_v7, %v5766_v7  ;;  %v5769_v52 = vsub.f32 %v12278_v49, %v12294_v35  ;;  %v5775_v57 = vmul.f32 %v5767_v38, %v5767_v38  ;;  %v5741_v60 = vmul.f32 %v5733_v54, %v5733_v54 }
 0x7cd   :  { %v5747_v3 = vadd.f32 %v5746_v30, %v5745_v46  ;;  %v5750_v14 = vsel %vm5680_vm5, %v5739_v45, 0.0  ;;  %v5781_v6 = vsel %vm5680_vm5, %v5773_v40, 0.0  ;;  %v5770_v44 = vsub.f32 %v12284_v39, %v12294_v35 }
 0x7ce   :  { %v5776_v21 = vmul.f32 %v5768_v5, %v5768_v5  ;;  %v5782_v18 = vsel %vm5680_vm5, %v5774_v27, 0.0  ;;  %v5742_v50 = vmul.f32 %v5734_v20, %v5734_v20  ;;  %v5752_v62 = vsel %vm5680_vm5, %v5740_v25, 0.0 }
 0x7cf   :  { %v5749_v51 = vadd.f32 %v5748_v24, %v5747_v3  ;;  %v5783_v41 = vadd.f32 %v5782_v18, %v5781_v6  ;;  %v5771_v43 = vsub.f32 %v12282_v53, %v12294_v35  ;;  %v5777_v23 = vmul.f32 %v5769_v52, %v5769_v52 }
 0x7d0   :  { %v5784_v59 = vsel %vm5680_vm5, %v5775_v57, 0.0  ;;  %v5754_v9 = vsel %vm5680_vm5, %v5741_v60, 0.0  ;;  %v5772_v8 = vsub.f32 %v12288_v2, %v12294_v35  ;;  %v5778_v10 = vmul.f32 %v5770_v44, %v5770_v44 }
 0x7d1   :  { %v5751_v17 = vadd.f32 %v5750_v14, %v5749_v51  ;;  %v5785_v0 = vadd.f32 %v5784_v59, %v5783_v41  ;;  %v5786_v22 = vsel %vm5680_vm5, %v5776_v21, 0.0  ;;  %v5756_v19 = vsel %vm5680_vm5, %v5742_v50, 0.0  ;;  %v5808_v50 = vld [vmem:[%s12917_s5] sm:$0x1] }
 0x7d2   :  { %v5779_v63 = vmul.f32 %v5771_v43, %v5771_v43  ;;  %v5788_v58 = vsel %vm5680_vm5, %v5777_v23, 0.0  ;;  %v5780_v37 = vmul.f32 %v5772_v8, %v5772_v8  ;;  %v5790_v32 = vsel %vm5680_vm5, %v5778_v10, 0.0 }
 0x7d3   :  { %v5753_v1 = vadd.f32 %v5752_v62, %v5751_v17  ;;  %v5787_v4 = vadd.f32 %v5786_v22, %v5785_v0  ;;  %v5812_v14 = vlaneseq  ;;  %v5804_v17 = vld [vmem:[%s12916_s4] sm:$0x1] }
 0x7d4   :  { %v5792_v45 = vsel %vm5680_vm5, %v5779_v63, 0.0  ;;  %v5794_v31 = vsel %vm5680_vm5, %v5780_v37, 0.0 }
 0x7d5   :  { %v5755_v11 = vadd.f32 %v5754_v9, %v5753_v1  ;;  %v5789_v15 = vadd.f32 %v5788_v58, %v5787_v4  ;;  %v5813_v6 = vshrl.u32 %v5812_v14, 7  ;;  %v10234_v14 = vld [vmem:[%s12915_s6 + $0x70] sm:$0xff]  }
 0x7d7   :  { %v5757_v28 = vadd.f32 %v5756_v19, %v5755_v11  ;;  %v5791_v33 = vadd.f32 %v5790_v32, %v5789_v15  ;;  %v12347_v44 = vsub.s32 0, %v5813_v6  ;;  %v10235_v6 = vld [vmem:[%s12915_s6 + $0x78] sm:$0xff]  }
 0x7d9   :  { %v5758_v36 = vrot.slane %v5757_v28, 4  ;;  %v5793_v46 = vadd.f32 %v5792_v45, %v5791_v33 }
 0x7db   :  { %v5759_v54 = vadd.f32 %v5758_v36, %v5757_v28  ;;  %v5795_v7 = vadd.f32 %v5794_v31, %v5793_v46 }
 0x7dd   :  { %v5760_v30 = vrot.slane %v5759_v54, 2  ;;  %v5796_v20 = vrot.slane %v5795_v7, 4 }
 0x7df   :  { %v5761_v38 = vadd.f32 %v5760_v30, %v5759_v54  ;;  %v5797_v3 = vadd.f32 %v5796_v20, %v5795_v7 }
 0x7e1   :  { %v5762_v5 = vrot.slane %v5761_v38, 1  ;;  %v5798_v25 = vrot.slane %v5797_v3, 2 }
 0x7e3   :  { %v5799_v24 = vadd.f32 %v5798_v25, %v5797_v3  ;;  %v5763_v40 = vadd.f32 %v5762_v5, %v5761_v38  ;;  %v10224_v3 = vld [vmem:[%s12915_s6 + $0x20] sm:$0xff]   ;;  %v10225_v5 = vld [vmem:[%s12915_s6 + $0x28] sm:$0xff]   ;;  %v10226_v25 = vld [vmem:[%s12915_s6 + $0x30] sm:$0xff]  }
 0x7e5   :  { %v5800_v27 = vrot.slane %v5799_v24, 1 }
 0x7e7   :  { %v5801_v51 = vadd.f32 %v5800_v27, %v5799_v24  ;;  %v10227_v24 = vld [vmem:[%s12915_s6 + $0x38] sm:$0xff]   ;;  %v10229_v27 = vld [vmem:[%s12915_s6 + $0x48] sm:$0xff]  }
 0x7e9   :  { %v5802_v52 = vadd.f32 %v5801_v51, %v5763_v40  ;;  %v10228_v40 = vld [vmem:[%s12915_s6 + $0x40] sm:$0xff]   ;;  %v10230_v51 = vld [vmem:[%s12915_s6 + $0x50] sm:$0xff]  }
 0x7eb   :  { %v5803_v57 = vmul.f32 0.0078125, %v5802_v52  ;;  %v10231_v52 = vld [vmem:[%s12915_s6 + $0x58] sm:$0xff]  }
 0x7ed   :  { %v5805_v60 = vadd.f32 1e-05, %v5803_v57  ;;  %v10232_v57 = vld [vmem:[%s12915_s6 + $0x60] sm:$0xff]  }
 0x7ef   :  { %10252 = vrsqrt.f32 %v5805_v60  ;;  %v10233_v60 = vld [vmem:[%s12915_s6 + $0x68] sm:$0xff]  }
 0x7f9   :  { %v10253_v21 = vpop.eup %10252 }
 0x7fa   :  { %v5807_v18 = vmul.f32 %v10253_v21, %v5804_v17  ;;  %v10407_v17 = vmov 0.0   ;;  %v12450_v21 = vld [vmem:[%s12918_s7 + $0x8] sm:$0xff]  }
 0x7fc   :  { %v5809_v62 = vmul.f32 %v5807_v18, %v12294_v35  ;;  %v5815_v41 = vrot.slane %v5807_v18, %v12347_v44 }
 0x7fe   :  { %v5810_v1 = vsub.f32 %v5808_v50, %v5809_v62  ;;  %v5817_v43 = vmul.f32 %v5815_v41, %v12210_v16  ;;  %v5818_v23 = vmul.f32 %v5815_v41, %v12206_v13  ;;  %v5839_v59 = vmul.f32 %v5815_v41, %v12266_v61 }
 0x7ff   :  { %v5840_v0 = vmul.f32 %v5815_v41, %v12262_v12  ;;  %v5819_v11 = vmul.f32 %v5815_v41, %v12220_v48  ;;  %v5820_v8 = vmul.f32 %v5815_v41, %v12225_v42  ;;  %v5841_v10 = vmul.f32 %v5815_v41, %v12264_v34 }
 0x800   :  { %v5829_v9 = vrot.slane %v5810_v1, %v12347_v44  ;;  %v5842_v35 = vmul.f32 %v5815_v41, %v12274_v29  ;;  %v5821_v22 = vmul.f32 %v5815_v41, %v12231_v55  ;;  %v5822_v16 = vmul.f32 %v5815_v41, %v12242_v47 }
 0x801   :  { %v5844_v48 = vmul.f32 %v5815_v41, %v12284_v39  ;;  %v5843_v34 = vmul.f32 %v5815_v41, %v12278_v49  ;;  %v5823_v33 = vmul.f32 %v5815_v41, %v12251_v26  ;;  %v5824_v39 = vmul.f32 %v5815_v41, %v12256_v56  ;;  %v10221_v56 = vld [vmem:[%s12915_s6 + $0x8] sm:$0xff]  }
 0x802   :  { %v5831_v19 = vadd.f32 %v5829_v9, %v5817_v43  ;;  %v5832_v13 = vadd.f32 %v5829_v9, %v5818_v23  ;;  %v5847_v4 = vadd.f32 %v5839_v59, %v5829_v9  ;;  %v5848_v61 = vadd.f32 %v5840_v0, %v5829_v9 }
 0x803   :  { %v5833_v28 = vadd.f32 %v5829_v9, %v5819_v11  ;;  %v5834_v63 = vadd.f32 %v5829_v9, %v5820_v8  ;;  %v5849_v58 = vadd.f32 %v5841_v10, %v5829_v9  ;;  %v5850_v12 = vadd.f32 %v5842_v35, %v5829_v9  ;;  %v12469_v35 = vld [vmem:[%s12918_s7 + $0x10] sm:$0xff]  }
 0x804   :  { %v5887_v15 = vpack.c.bf16 %v5832_v13, %v5831_v19  ;;  %v7078_v42 = vpack.c.bf16 %v5848_v61, %v5847_v4  ;;  %v5835_v29 = vadd.f32 %v5829_v9, %v5821_v22  ;;  %v5836_v37 = vadd.f32 %v5829_v9, %v5822_v16 }
 0x805   :  { %v5888_v36 = vpack.c.bf16 %v5834_v63, %v5833_v28  ;;  %v7079_v55 = vpack.c.bf16 %v5850_v12, %v5849_v58  ;;  %v5851_v47 = vadd.f32 %v5843_v34, %v5829_v9  ;;  %v5852_v32 = vadd.f32 %v5844_v48, %v5829_v9  ;;  %v12481_v58 = vld [vmem:[%s12918_s7 + $0x18] sm:$0xff]  }
 0x806   :  { %9287 = vmatprep.subr.bf16.mxu1 %v5887_v15  ;;  %9423 = vmatprep.subr.bf16.mxu0 %v7078_v42  ;;  %v5845_v54 = vmul.f32 %v5815_v41, %v12282_v53  ;;  %v5846_v49 = vmul.f32 %v5815_v41, %v12288_v2  ;;  %v5889_v45 = vpack.c.bf16 %v5836_v37, %v5835_v29  ;;  %v10222_v53 = vld [vmem:[%s12915_s6 + $0x10] sm:$0xff]   ;;  %v10223_v2 = vld [vmem:[%s12915_s6 + $0x18] sm:$0xff]   ;;  %v12459_v41 = vld [vmem:[%s12918_s7] sm:$0xff]  }
 0x807   :  { %9288 = vmatpush3.bf16.msra.mxu1 %v5887_v15  ;;  %9424 = vmatpush3.bf16.msra.mxu0 %v7078_v42  ;;  %v5837_v46 = vadd.f32 %v5829_v9, %v5823_v33  ;;  %v7080_v30 = vpack.c.bf16 %v5852_v32, %v5851_v47  ;;  %v5838_v31 = vadd.f32 %v5829_v9, %v5824_v39  ;;  %v12501_v32 = vld [vmem:[%s12918_s7 + $0x20] sm:$0xff]  }
 0x808   :  { %9289 = vmatprep.subr.bf16.mxu1 %v5888_v36  ;;  %9425 = vmatprep.subr.bf16.mxu0 %v7079_v55  ;;  %v5853_v7 = vadd.f32 %v5845_v54, %v5829_v9  ;;  %v5854_v38 = vadd.f32 %v5846_v49, %v5829_v9 }
 0x809   :  { %v5890_v20 = vpack.c.bf16 %v5838_v31, %v5837_v46 }
 0x80a   :  { %v7081_v26 = vpack.c.bf16 %v5854_v38, %v5853_v7  ;;  %v12527_v7 = vld [vmem:[%s12918_s7 + $0x28] sm:$0xff]  }
 0x80b   :  { %9290 = vmatpush3.bf16.msra.mxu1 %v5888_v36  ;;  %9426 = vmatpush3.bf16.msra.mxu0 %v7079_v55 }
 0x80c   :  { %9291 = vmatprep.subr.bf16.mxu1 %v5889_v45  ;;  %9427 = vmatprep.subr.bf16.mxu0 %v7080_v30 }
 0x80f   :  { %9292 = vmatpush3.bf16.msra.mxu1 %v5889_v45  ;;  %9428 = vmatpush3.bf16.msra.mxu0 %v7080_v30 }
 0x810   :  { %9293 = vmatprep.subr.bf16.mxu1 %v5890_v20  ;;  %9429 = vmatprep.subr.bf16.mxu0 %v7081_v26 }
 0x813   :  { %9294 = vmatpush3.bf16.msra.mxu1 %v5890_v20  ;;  %9430 = vmatpush3.bf16.msra.mxu0 %v7081_v26 }
 0x814   :  { %9327 = vmatprep.subr.bf16.mxu1 %v10407_v17 }
 0x816   :  { %9296 = vmatmul.mubr.msk.bf16.vlgmr.msra.gmra.mrb[236].mxu1 %vm5971_vm11, %v10221_v56  ;;  %9432 = vmatmul.mubr.msk.bf16.vlgmr.msra.gmra.mrb[100].mxu0 %vm5971_vm11, %v10221_v56 }
 0x817   :  { %9299 = vmatprep.mubr.msk.bf16.mxu1 %vm5971_vm11, %v10222_v53  ;;  %9435 = vmatprep.mubr.msk.bf16.mxu0 %vm5971_vm11, %v10222_v53 }
 0x818   :  { %9328 = vmatpush3.bf16.msra.mxu1 %v12450_v21 }
 0x819   :  { %9333 = vmatprep.subr.bf16.mxu1 %v10407_v17 }
 0x81e   :  { %9300 = vmatmul.mubr.msk.bf16.gmra.mrb[240].mxu1 %vm5971_vm11, %v10223_v2  ;;  %9436 = vmatmul.mubr.msk.bf16.gmra.mrb[104].mxu0 %vm5971_vm11, %v10223_v2 }
 0x81f   :  { %9303 = vmatprep.mubr.msk.bf16.mxu1 %vm5971_vm11, %v10224_v3  ;;  %9439 = vmatprep.mubr.msk.bf16.mxu0 %vm5971_vm11, %v10224_v3 }
 0x826   :  { %9304 = vmatmul.mubr.msk.bf16.gmra.mrb[244].mxu1 %vm5971_vm11, %v10225_v5  ;;  %9440 = vmatmul.mubr.msk.bf16.gmra.mrb[108].mxu0 %vm5971_vm11, %v10225_v5 }
 0x827   :  { %9307 = vmatprep.mubr.msk.bf16.mxu1 %vm5971_vm11, %v10226_v25  ;;  %9443 = vmatprep.mubr.msk.bf16.mxu0 %vm5971_vm11, %v10226_v25 }
 0x82e   :  { %9308 = vmatmul.mubr.msk.bf16.gmra.mrb[248].mxu1 %vm5971_vm11, %v10227_v24  ;;  %9444 = vmatmul.mubr.msk.bf16.gmra.mrb[112].mxu0 %vm5971_vm11, %v10227_v24 }
 0x82f   :  { %9311 = vmatprep.mubr.msk.bf16.mxu1 %vm5971_vm11, %v10228_v40  ;;  %9447 = vmatprep.mubr.msk.bf16.mxu0 %vm5971_vm11, %v10228_v40 }
 0x836   :  { %9312 = vmatmul.mubr.msk.bf16.gmra.mrb[252].mxu1 %vm5971_vm11, %v10229_v27  ;;  %9448 = vmatmul.mubr.msk.bf16.gmra.mrb[116].mxu0 %vm5971_vm11, %v10229_v27 }
 0x837   :  { %9315 = vmatprep.mubr.msk.bf16.mxu1 %vm5971_vm11, %v10230_v51  ;;  %9451 = vmatprep.mubr.msk.bf16.mxu0 %vm5971_vm11, %v10230_v51 }
 0x83e   :  { %9316 = vmatmul.mubr.msk.bf16.gmra.mrb[0].mxu1 %vm5971_vm11, %v10231_v52  ;;  %9452 = vmatmul.mubr.msk.bf16.gmra.mrb[120].mxu0 %vm5971_vm11, %v10231_v52 }
 0x83f   :  { %9319 = vmatprep.mubr.msk.bf16.mxu1 %vm5971_vm11, %v10232_v57  ;;  %9455 = vmatprep.mubr.msk.bf16.mxu0 %vm5971_vm11, %v10232_v57  ;;  %v12565_v57 = vld [vmem:[%s12918_s7 + $0x30] sm:$0xff]  }
 0x846   :  { %9320 = vmatmul.mubr.msk.bf16.gmra.mrb[4].mxu1 %vm5971_vm11, %v10233_v60  ;;  %9456 = vmatmul.mubr.msk.bf16.gmra.mrb[124].mxu0 %vm5971_vm11, %v10233_v60 }
 0x847   :  { %9323 = vmatprep.mubr.msk.bf16.mxu1 %vm5971_vm11, %v10234_v14  ;;  %9459 = vmatprep.mubr.msk.bf16.mxu0 %vm5971_vm11, %v10234_v14 }
 0x84e   :  { %9324 = vmatmul.mubr.msk.bf16.gmra.mrb[8].mxu1 %vm5971_vm11, %v10235_v6  ;;  %9460 = vmatmul.mubr.msk.bf16.gmra.mrb[128].mxu0 %vm5971_vm11, %v10235_v6  ;;  %v12579_v6 = vld [vmem:[%s12918_s7 + $0x38] sm:$0xff]  }
 0x84f   :  { %9329 = vmatprep.mubr.msk.bf16.mxu1 %vm10408_vm6, %v10407_v17 }
 0x8e9   :  { %v9297_v18 = vpop.f32.mrb[236].mxu1  ;;  %v12546_v3 = vpop.f32.mrb[100].mxu0 }
 0x8ea   :  { %v6054_v50 = vpop.f32.mrb[237].mxu1  ;;  %v12550_v25 = vpop.f32.mrb[101].mxu0 }
 0x8eb   :  { %v9298_v62 = vpop.f32.mrb[238].mxu1  ;;  %v12556_v27 = vpop.f32.mrb[102].mxu0 }
 0x8ec   :  { %v6182_v1 = vpack.c.bf16 %v9298_v62, %v9297_v18  ;;  %v6057_v43 = vpop.f32.mrb[239].mxu1  ;;  %v7244_v52 = vpack.c.bf16 %v12556_v27, %v12546_v3  ;;  %v12568_v60 = vpop.f32.mrb[103].mxu0 }
 0x8ed   :  { %v6181_v23 = vpack.c.bf16 %v6057_v43, %v6054_v50  ;;  %v7243_v14 = vpack.c.bf16 %v12568_v60, %v12550_v25 }
 0x8ee   :  { %9330 = vmatmul.mubr.msk.bf16.vlgmr.msra.gmra.mrb[12].mxu1 %vm5680_vm5, %v6182_v1 }
 0x8ef   :  { %9334 = vmatpush3.bf16.msra.mxu1 %v12459_v41  ;;  %9335 = vmatprep.mubr.msk.bf16.mxu1 %vm10408_vm6, %v10407_v17 }
 0x8f0   :  { %9339 = vmatprep.subr.bf16.mxu1 %v10407_v17 }
 0x8f1   :  { %v9301_v59 = vpop.f32.mrb[240].mxu1  ;;  %v12582_v18 = vpop.f32.mrb[104].mxu0 }
 0x8f2   :  { %v6070_v9 = vpop.f32.mrb[241].mxu1  ;;  %v12587_v50 = vpop.f32.mrb[105].mxu0 }
 0x8f3   :  { %v9302_v0 = vpop.f32.mrb[242].mxu1  ;;  %v12590_v62 = vpop.f32.mrb[106].mxu0 }
 0x8f4   :  { %v6184_v11 = vpack.c.bf16 %v9302_v0, %v9301_v59  ;;  %v6073_v8 = vpop.f32.mrb[243].mxu1  ;;  %v7246_v1 = vpack.c.bf16 %v12590_v62, %v12582_v18  ;;  %v12594_v43 = vpop.f32.mrb[107].mxu0  ;;  %v12601_v59 = vld [vmem:[%s12918_s7 + $0x40] sm:$0xff]  }
 0x8f5   :  { %v6183_v10 = vpack.c.bf16 %v6073_v8, %v6070_v9  ;;  %v12614_v9 = vld [vmem:[%s12918_s7 + $0x48] sm:$0xff]  }
 0x8f9   :  { %v9305_v22 = vpop.f32.mrb[244].mxu1  ;;  %v12617_v0 = vpop.f32.mrb[108].mxu0 }
 0x8fa   :  { %9336 = vmatmul.mubr.msk.bf16.vlgmr.msra.gmra.mrb[12].mxu1 %vm5680_vm5, %v6181_v23  ;;  %v6086_v16 = vpop.f32.mrb[245].mxu1  ;;  %v7245_v23 = vpack.c.bf16 %v12594_v43, %v12587_v50 }
 0x8fb   :  { %9340 = vmatpush3.bf16.msra.mxu1 %v12469_v35  ;;  %9341 = vmatprep.mubr.msk.bf16.mxu1 %vm10408_vm6, %v10407_v17  ;;  %v9306_v19 = vpop.f32.mrb[246].mxu1 }
 0x8fc   :  { %9345 = vmatprep.subr.bf16.mxu1 %v10407_v17  ;;  %v6186_v13 = vpack.c.bf16 %v9306_v19, %v9305_v22  ;;  %v6089_v4 = vpop.f32.mrb[247].mxu1  ;;  %v12636_v19 = vld [vmem:[%s12918_s7 + $0x50] sm:$0xff]  }
 0x8fd   :  { %v6185_v61 = vpack.c.bf16 %v6089_v4, %v6086_v16 }
 0x901   :  { %v12476_v28 = vpop.f32.mrb[248].mxu1 }
 0x902   :  { %v6102_v63 = vpop.f32.mrb[249].mxu1 }
 0x903   :  { %v12483_v12 = vpop.f32.mrb[250].mxu1 }
 0x904   :  { %v6188_v48 = vpack.c.bf16 %v12483_v12, %v12476_v28  ;;  %v6105_v15 = vpop.f32.mrb[251].mxu1 }
 0x905   :  { %v6187_v42 = vpack.c.bf16 %v6105_v15, %v6102_v63  ;;  %v12671_v15 = vld [vmem:[%s12918_s7 + $0x60] sm:$0xff]  }
 0x906   :  { %9342 = vmatmul.mubr.msk.bf16.vlgmr.msra.gmra.mrb[12].mxu1 %vm5680_vm5, %v6183_v10 }
 0x907   :  { %9346 = vmatpush3.bf16.msra.mxu1 %v12481_v58  ;;  %9347 = vmatprep.mubr.msk.bf16.mxu1 %vm10408_vm6, %v10407_v17 }
 0x908   :  { %9351 = vmatprep.subr.bf16.mxu1 %v10407_v17 }
 0x909   :  { %v12492_v34 = vpop.f32.mrb[252].mxu1 }
 0x90a   :  { %v6118_v36 = vpop.f32.mrb[253].mxu1 }
 0x90b   :  { %v12494_v29 = vpop.f32.mrb[254].mxu1 }
 0x90c   :  { %v6190_v37 = vpack.c.bf16 %v12494_v29, %v12492_v34  ;;  %v6121_v55 = vpop.f32.mrb[255].mxu1 }
 0x90d   :  { %v6189_v47 = vpack.c.bf16 %v6121_v55, %v6118_v36 }
 0x911   :  { %v12503_v33 = vpop.f32.mrb[0].mxu1 }
 0x912   :  { %9348 = vmatmul.mubr.msk.bf16.vlgmr.msra.gmra.mrb[12].mxu1 %vm5680_vm5, %v6184_v11  ;;  %v12506_v39 = vpop.f32.mrb[1].mxu1  ;;  %v12622_v11 = vpop.f32.mrb[109].mxu0 }
 0x913   :  { %9352 = vmatpush3.bf16.msra.mxu1 %v12501_v32  ;;  %9353 = vmatprep.mubr.msk.bf16.mxu1 %vm10408_vm6, %v10407_v17  ;;  %v12511_v54 = vpop.f32.mrb[2].mxu1  ;;  %v12625_v8 = vpop.f32.mrb[110].mxu0 }
 0x914   :  { %9357 = vmatprep.subr.bf16.mxu1 %v10407_v17  ;;  %v6192_v49 = vpack.c.bf16 %v12511_v54, %v12503_v33  ;;  %v12516_v45 = vpop.f32.mrb[3].mxu1  ;;  %v7248_v10 = vpack.c.bf16 %v12625_v8, %v12617_v0  ;;  %v12629_v22 = vpop.f32.mrb[111].mxu0  ;;  %v12709_v33 = vld [vmem:[%s12918_s7 + $0x70] sm:$0xff]  }
 0x915   :  { %v6191_v46 = vpack.c.bf16 %v12516_v45, %v12506_v39  ;;  %v7247_v16 = vpack.c.bf16 %v12629_v22, %v12622_v11  ;;  %v12652_v4 = vpop.f32.mrb[112].mxu0  ;;  %v12722_v39 = vld [vmem:[%s12918_s7 + $0x78] sm:$0xff]  }
 0x919   :  { %v12520_v30 = vpop.f32.mrb[4].mxu1 }
 0x91a   :  { %v12522_v31 = vpop.f32.mrb[5].mxu1 }
 0x91b   :  { %v12529_v38 = vpop.f32.mrb[6].mxu1 }
 0x91c   :  { %v6194_v20 = vpack.c.bf16 %v12529_v38, %v12520_v30  ;;  %v12533_v26 = vpop.f32.mrb[7].mxu1 }
 0x91d   :  { %v6193_v56 = vpack.c.bf16 %v12533_v26, %v12522_v31 }
 0x91e   :  { %9354 = vmatmul.mubr.msk.bf16.vlgmr.msra.gmra.mrb[12].mxu1 %vm5680_vm5, %v6185_v61  ;;  %v12657_v61 = vpop.f32.mrb[113].mxu0 }
 0x91f   :  { %9358 = vmatpush3.bf16.msra.mxu1 %v12527_v7  ;;  %9359 = vmatprep.mubr.msk.bf16.mxu1 %vm10408_vm6, %v10407_v17  ;;  %v12660_v28 = vpop.f32.mrb[114].mxu0 }
 0x920   :  { %9363 = vmatprep.subr.bf16.mxu1 %v10407_v17  ;;  %v7250_v63 = vpack.c.bf16 %v12660_v28, %v12652_v4  ;;  %v12664_v12 = vpop.f32.mrb[115].mxu0 }
 0x921   :  { %v12542_v53 = vpop.f32.mrb[8].mxu1  ;;  %v12690_v34 = vpop.f32.mrb[116].mxu0 }
 0x922   :  { %v12544_v2 = vpop.f32.mrb[9].mxu1  ;;  %v12695_v36 = vpop.f32.mrb[117].mxu0 }
 0x923   :  { %v12548_v5 = vpop.f32.mrb[10].mxu1  ;;  %v12698_v29 = vpop.f32.mrb[118].mxu0 }
 0x924   :  { %v6196_v24 = vpack.c.bf16 %v12548_v5, %v12542_v53  ;;  %v12554_v40 = vpop.f32.mrb[11].mxu1  ;;  %v12702_v55 = vpop.f32.mrb[119].mxu0 }
 0x925   :  { %v6195_v51 = vpack.c.bf16 %v12554_v40, %v12544_v2  ;;  %v12728_v54 = vpop.f32.mrb[120].mxu0 }
 0x92a   :  { %9360 = vmatmul.mubr.msk.bf16.vlgmr.msra.gmra.mrb[12].mxu1 %vm5680_vm5, %v6186_v13  ;;  %v12649_v13 = vld [vmem:[%s12918_s7 + $0x58] sm:$0xff]  }
 0x92b   :  { %9364 = vmatpush3.bf16.msra.mxu1 %v12565_v57  ;;  %9365 = vmatprep.mubr.msk.bf16.mxu1 %vm10408_vm6, %v10407_v17 }
 0x92c   :  { %9369 = vmatprep.subr.bf16.mxu1 %v10407_v17 }
 0x936   :  { %9366 = vmatmul.mubr.msk.bf16.vlgmr.msra.gmra.mrb[12].mxu1 %vm5680_vm5, %v6187_v42  ;;  %v12684_v42 = vld [vmem:[%s12918_s7 + $0x68] sm:$0xff]  }
 0x937   :  { %9370 = vmatpush3.bf16.msra.mxu1 %v12579_v6  ;;  %9371 = vmatprep.mubr.msk.bf16.mxu1 %vm10408_vm6, %v10407_v17 }
 0x938   :  { %9375 = vmatprep.subr.bf16.mxu1 %v10407_v17 }
 0x942   :  { %9372 = vmatmul.mubr.msk.bf16.vlgmr.msra.gmra.mrb[12].mxu1 %vm5680_vm5, %v6188_v48  ;;  %v7249_v48 = vpack.c.bf16 %v12664_v12, %v12657_v61 }
 0x943   :  { %9376 = vmatpush3.bf16.msra.mxu1 %v12601_v59  ;;  %9377 = vmatprep.mubr.msk.bf16.mxu1 %vm10408_vm6, %v10407_v17 }
 0x944   :  { %9381 = vmatprep.subr.bf16.mxu1 %v10407_v17 }
 0x94e   :  { %9378 = vmatmul.mubr.msk.bf16.vlgmr.msra.gmra.mrb[12].mxu1 %vm5680_vm5, %v6189_v47  ;;  %v7251_v47 = vpack.c.bf16 %v12702_v55, %v12695_v36 }
 0x94f   :  { %9382 = vmatpush3.bf16.msra.mxu1 %v12614_v9  ;;  %9383 = vmatprep.mubr.msk.bf16.mxu1 %vm10408_vm6, %v10407_v17 }
 0x950   :  { %9387 = vmatprep.subr.bf16.mxu1 %v10407_v17 }
 0x95a   :  { %9384 = vmatmul.mubr.msk.bf16.vlgmr.msra.gmra.mrb[12].mxu1 %vm5680_vm5, %v6190_v37  ;;  %v7252_v37 = vpack.c.bf16 %v12698_v29, %v12690_v34 }
 0x95b   :  { %9388 = vmatpush3.bf16.msra.mxu1 %v12636_v19  ;;  %9389 = vmatprep.mubr.msk.bf16.mxu1 %vm10408_vm6, %v10407_v17 }
 0x95c   :  { %9393 = vmatprep.subr.bf16.mxu1 %v10407_v17 }
 0x966   :  { %9390 = vmatmul.mubr.msk.bf16.vlgmr.msra.gmra.mrb[12].mxu1 %vm5680_vm5, %v6191_v46 }
 0x967   :  { %9394 = vmatpush3.bf16.msra.mxu1 %v12649_v13  ;;  %9395 = vmatprep.mubr.msk.bf16.mxu1 %vm10408_vm6, %v10407_v17 }
 0x968   :  { %9399 = vmatprep.subr.bf16.mxu1 %v10407_v17 }
 0x972   :  { %9396 = vmatmul.mubr.msk.bf16.vlgmr.msra.gmra.mrb[12].mxu1 %vm5680_vm5, %v6192_v49  ;;  %v12733_v49 = vpop.f32.mrb[121].mxu0 }
 0x973   :  { %9400 = vmatpush3.bf16.msra.mxu1 %v12671_v15  ;;  %9401 = vmatprep.mubr.msk.bf16.mxu1 %vm10408_vm6, %v10407_v17  ;;  %v12736_v45 = vpop.f32.mrb[122].mxu0 }
 0x974   :  { %9405 = vmatprep.subr.bf16.mxu1 %v10407_v17  ;;  %v7254_v46 = vpack.c.bf16 %v12736_v45, %v12728_v54  ;;  %v7199_v30 = vpop.f32.mrb[123].mxu0 }
 0x975   :  { %v7253_v31 = vpack.c.bf16 %v7199_v30, %v12733_v49  ;;  %v9457_v38 = vpop.f32.mrb[124].mxu0 }
 0x97e   :  { %9402 = vmatmul.mubr.msk.bf16.vlgmr.msra.gmra.mrb[12].mxu1 %vm5680_vm5, %v6193_v56 }
 0x97f   :  { %9406 = vmatpush3.bf16.msra.mxu1 %v12684_v42  ;;  %9407 = vmatprep.mubr.msk.bf16.mxu1 %vm10408_vm6, %v10407_v17 }
 0x980   :  { %9411 = vmatprep.subr.bf16.mxu1 %v10407_v17 }
 0x98a   :  { %9408 = vmatmul.mubr.msk.bf16.vlgmr.msra.gmra.mrb[12].mxu1 %vm5680_vm5, %v6194_v20  ;;  %v7212_v20 = vpop.f32.mrb[125].mxu0 }
 0x98b   :  { %9412 = vmatpush3.bf16.msra.mxu1 %v12709_v33  ;;  %9413 = vmatprep.mubr.msk.bf16.mxu1 %vm10408_vm6, %v10407_v17 }
 0x98c   :  { %9417 = vmatprep.subr.bf16.mxu1 %v10407_v17 }
 0x996   :  { %9414 = vmatmul.mubr.msk.bf16.vlgmr.msra.gmra.mrb[12].mxu1 %vm5680_vm5, %v6195_v51 }
 0x997   :  { %9418 = vmatpush3.bf16.msra.mxu1 %v12722_v39  ;;  %9419 = vmatprep.mubr.msk.bf16.mxu1 %vm10408_vm6, %v10407_v17 }
 0x998   :  { %9463 = vmatprep.subr.bf16.mxu1 %v10407_v17 }
 0x9a2   :  { %9420 = vmatmul.mubr.msk.bf16.vlgmr.msra.gmra.mrb[12].mxu1 %vm5680_vm5, %v6196_v24 }
 0x9a3   :  { %9464 = vmatpush3.bf16.msra.mxu1 %v12450_v21  ;;  %9465 = vmatprep.mubr.msk.bf16.mxu1 %vm10408_vm6, %v10407_v17  ;;  %v9458_v21 = vpop.f32.mrb[126].mxu0 }
 0x9a4   :  { %9469 = vmatprep.subr.bf16.mxu1 %v10407_v17  ;;  %v7256_v26 = vpack.c.bf16 %v9458_v21, %v9457_v38  ;;  %v7215_v56 = vpop.f32.mrb[127].mxu0 }
 0x9a5   :  { %v7255_v53 = vpack.c.bf16 %v7215_v56, %v7212_v20 }
 0x9aa   :  { %9466 = vmatmul.mubr.msk.bf16.vlgmr.msra.gmra.mrb[16].mxu1 %vm5680_vm5, %v7244_v52 }
 0x9ab   :  { %9470 = vmatpush3.bf16.msra.mxu1 %v12459_v41  ;;  %9471 = vmatprep.mubr.msk.bf16.mxu1 %vm10408_vm6, %v10407_v17  ;;  %v9461_v41 = vpop.f32.mrb[128].mxu0 }
 0x9ac   :  { %9475 = vmatprep.subr.bf16.mxu1 %v10407_v17  ;;  %v7228_v2 = vpop.f32.mrb[129].mxu0 }
 0x9b6   :  { %9472 = vmatmul.mubr.msk.bf16.vlgmr.msra.gmra.mrb[16].mxu1 %vm5680_vm5, %v7243_v14  ;;  %v17_v14 = vstv %s12919_s11 }
 0x9b7   :  { %9476 = vmatpush3.bf16.msra.mxu1 %v12469_v35  ;;  %9477 = vmatprep.mubr.msk.bf16.mxu1 %vm10408_vm6, %v10407_v17  ;;  %v9462_v35 = vpop.f32.mrb[130].mxu0  ;;  %18 = vst [vmem:[#allocation2] sm:$0x1] %v17_v14 }
 0x9b8   :  { %9481 = vmatprep.subr.bf16.mxu1 %v10407_v17  ;;  %v7258_v3 = vpack.c.bf16 %v9462_v35, %v9461_v41  ;;  %v7231_v5 = vpop.f32.mrb[131].mxu0 }
 0x9b9   :  { %v7257_v25 = vpack.c.bf16 %v7231_v5, %v7228_v2 }
 0x9c2   :  { %9478 = vmatmul.mubr.msk.bf16.vlgmr.msra.gmra.mrb[16].mxu1 %vm5680_vm5, %v7245_v23 }
 0x9c3   :  { %9482 = vmatpush3.bf16.msra.mxu1 %v12481_v58  ;;  %9483 = vmatprep.mubr.msk.bf16.mxu1 %vm10408_vm6, %v10407_v17 }
 0x9c4   :  { %9487 = vmatprep.subr.bf16.mxu1 %v10407_v17 }
 0x9ce   :  { %9484 = vmatmul.mubr.msk.bf16.vlgmr.msra.gmra.mrb[16].mxu1 %vm5680_vm5, %v7246_v1 }
 0x9cf   :  { %9488 = vmatpush3.bf16.msra.mxu1 %v12501_v32  ;;  %9489 = vmatprep.mubr.msk.bf16.mxu1 %vm10408_vm6, %v10407_v17 }
 0x9d0   :  { %9493 = vmatprep.subr.bf16.mxu1 %v10407_v17 }
 0x9da   :  { %9490 = vmatmul.mubr.msk.bf16.vlgmr.msra.gmra.mrb[16].mxu1 %vm5680_vm5, %v7247_v16 }
 0x9db   :  { %9494 = vmatpush3.bf16.msra.mxu1 %v12527_v7  ;;  %9495 = vmatprep.mubr.msk.bf16.mxu1 %vm10408_vm6, %v10407_v17 }
 0x9dc   :  { %9499 = vmatprep.subr.bf16.mxu1 %v10407_v17 }
 0x9e6   :  { %9496 = vmatmul.mubr.msk.bf16.vlgmr.msra.gmra.mrb[16].mxu1 %vm5680_vm5, %v7248_v10 }
 0x9e7   :  { %9500 = vmatpush3.bf16.msra.mxu1 %v12565_v57  ;;  %9501 = vmatprep.mubr.msk.bf16.mxu1 %vm10408_vm6, %v10407_v17 }
 0x9e8   :  { %9505 = vmatprep.subr.bf16.mxu1 %v10407_v17 }
 0x9f2   :  { %9502 = vmatmul.mubr.msk.bf16.vlgmr.msra.gmra.mrb[16].mxu1 %vm5680_vm5, %v7249_v48 }
 0x9f3   :  { %9506 = vmatpush3.bf16.msra.mxu1 %v12579_v6  ;;  %9507 = vmatprep.mubr.msk.bf16.mxu1 %vm10408_vm6, %v10407_v17 }
 0x9f4   :  { %9511 = vmatprep.subr.bf16.mxu1 %v10407_v17 }
 0x9fe   :  { %9508 = vmatmul.mubr.msk.bf16.vlgmr.msra.gmra.mrb[16].mxu1 %vm5680_vm5, %v7250_v63 }
 0x9ff   :  { %9512 = vmatpush3.bf16.msra.mxu1 %v12601_v59  ;;  %9513 = vmatprep.mubr.msk.bf16.mxu1 %vm10408_vm6, %v10407_v17 }
 0xa00   :  { %9517 = vmatprep.subr.bf16.mxu1 %v10407_v17 }
 0xa0a   :  { %9514 = vmatmul.mubr.msk.bf16.vlgmr.msra.gmra.mrb[16].mxu1 %vm5680_vm5, %v7251_v47 }
 0xa0b   :  { %9518 = vmatpush3.bf16.msra.mxu1 %v12614_v9  ;;  %9519 = vmatprep.mubr.msk.bf16.mxu1 %vm10408_vm6, %v10407_v17 }
 0xa0c   :  { %9523 = vmatprep.subr.bf16.mxu1 %v10407_v17 }
 0xa16   :  { %9520 = vmatmul.mubr.msk.bf16.vlgmr.msra.gmra.mrb[16].mxu1 %vm5680_vm5, %v7252_v37 }
 0xa17   :  { %9524 = vmatpush3.bf16.msra.mxu1 %v12636_v19  ;;  %9525 = vmatprep.mubr.msk.bf16.mxu1 %vm10408_vm6, %v10407_v17 }
 0xa18   :  { %9529 = vmatprep.subr.bf16.mxu1 %v10407_v17 }
 0xa22   :  { %9526 = vmatmul.mubr.msk.bf16.vlgmr.msra.gmra.mrb[16].mxu1 %vm5680_vm5, %v7253_v31 }
 0xa23   :  { %9530 = vmatpush3.bf16.msra.mxu1 %v12649_v13  ;;  %9531 = vmatprep.mubr.msk.bf16.mxu1 %vm10408_vm6, %v10407_v17 }
 0xa24   :  { %9535 = vmatprep.subr.bf16.mxu1 %v10407_v17 }
 0xa2e   :  { %9532 = vmatmul.mubr.msk.bf16.vlgmr.msra.gmra.mrb[16].mxu1 %vm5680_vm5, %v7254_v46 }
 0xa2f   :  { %9536 = vmatpush3.bf16.msra.mxu1 %v12671_v15  ;;  %9537 = vmatprep.mubr.msk.bf16.mxu1 %vm10408_vm6, %v10407_v17 }
 0xa30   :  { %9541 = vmatprep.subr.bf16.mxu1 %v10407_v17 }
 0xa3a   :  { %9538 = vmatmul.mubr.msk.bf16.vlgmr.msra.gmra.mrb[16].mxu1 %vm5680_vm5, %v7255_v53 }
 0xa3b   :  { %9542 = vmatpush3.bf16.msra.mxu1 %v12684_v42  ;;  %9543 = vmatprep.mubr.msk.bf16.mxu1 %vm10408_vm6, %v10407_v17 }
 0xa3c   :  { %9547 = vmatprep.subr.bf16.mxu1 %v10407_v17 }
 0xa46   :  { %9544 = vmatmul.mubr.msk.bf16.vlgmr.msra.gmra.mrb[16].mxu1 %vm5680_vm5, %v7256_v26 }
 0xa47   :  { %9548 = vmatpush3.bf16.msra.mxu1 %v12709_v33  ;;  %9549 = vmatprep.mubr.msk.bf16.mxu1 %vm10408_vm6, %v10407_v17 }
 0xa48   :  { %9553 = vmatprep.subr.bf16.mxu1 %v10407_v17 }
 0xa52   :  { %9550 = vmatmul.mubr.msk.bf16.vlgmr.msra.gmra.mrb[16].mxu1 %vm5680_vm5, %v7257_v25 }
 0xa53   :  { %9554 = vmatpush3.bf16.msra.mxu1 %v12722_v39  ;;  %9555 = vmatprep.mubr.msk.bf16.mxu1 %vm10408_vm6, %v10407_v17 }
 0xa5e   :  { %9556 = vmatmul.mubr.msk.bf16.vlgmr.msra.gmra.mrb[16].mxu1 %vm5680_vm5, %v7258_v3 }
 0xa75   :  { %v7063_v58 = vpop.f32.mrb[12].mxu1 }
 0xa76   :  { %vm7072_vm7 = vcmp.ge.f32.partialorder %v7063_v58, 0.0  ;;  %v7074_v32 = vmul.f32 0.2, %v7063_v58  ;;  %v9421_v7 = vpop.f32.mrb[13].mxu1 }
 0xa77   :  { %v7066_v24 = vpop.f32.mrb[14].mxu1 }
 0xa78   :  { %v12857_v40 = vsel %vm7072_vm7, %v7063_v58, %v7074_v32  ;;  %vm7073_vm8 = vcmp.ge.f32.partialorder %v7066_v24, 0.0  ;;  %v7075_v27 = vmul.f32 0.2, %v7066_v24  ;;  %v9422_v51 = vpop.f32.mrb[15].mxu1 }
 0xa79   :  { %v7997_v57 = vsel %vm5971_vm11, %v12857_v40, 0.0 }
 0xa7a   :  { %v12859_v52 = vsel %vm7073_vm8, %v7066_v24, %v7075_v27  ;;  %v8048_v24 = vld [vmem:[%s12920_s8] sm:$0x1] }
 0xa7b   :  { %v7998_v17 = vsel %vm5971_vm11, %v12859_v52, 0.0 }
 0xa7c   :  { %v7999_v60 = vadd.f32 %v7998_v17, %v7997_v57  ;;  %v8052_v57 = vld [vmem:[%s12921_s9] sm:$0x1] }
 0xa7e   :  { %v8000_v6 = vrot.slane %v7999_v60, 4 }
 0xa80   :  { %v8001_v43 = vadd.f32 %v8000_v6, %v7999_v60 }
 0xa82   :  { %v8002_v10 = vrot.slane %v8001_v43, 2 }
 0xa84   :  { %v8003_v19 = vadd.f32 %v8002_v10, %v8001_v43  ;;  %v8076_v43 = vld [vmem:[%s12922_s10 + $0x8] sm:$0xff] }
 0xa86   :  { %v8004_v61 = vrot.slane %v8003_v19, 1 }
 0xa88   :  { %v8005_v12 = vadd.f32 %v8004_v61, %v8003_v19 }
 0xb31   :  { %v7982_v18 = vpop.f32.mrb[16].mxu1 }
 0xb32   :  { %vm7991_vm5 = vcmp.ge.f32.partialorder %v7982_v18, 0.0  ;;  %v7993_v50 = vmul.f32 0.2, %v7982_v18  ;;  %v9557_v62 = vpop.f32.mrb[17].mxu1 }
 0xb33   :  { %v7985_v1 = vpop.f32.mrb[18].mxu1 }
 0xb34   :  { %v12868_v23 = vsel %vm7991_vm5, %v7982_v18, %v7993_v50  ;;  %vm7992_vm9 = vcmp.ge.f32.partialorder %v7985_v1, 0.0  ;;  %v7994_v59 = vmul.f32 0.2, %v7985_v1  ;;  %v9558_v9 = vpop.f32.mrb[19].mxu1 }
 0xb35   :  { %v8007_v11 = vsel %vm5971_vm11, %v12868_v23, 0.0 }
 0xb36   :  { %v7996_v0 = vsel %vm7992_vm9, %v7985_v1, %v7994_v59  ;;  %v8075_v59 = vld [vmem:[%s12922_s10] sm:$0xff] }
 0xb37   :  { %v8008_v8 = vsel %vm5971_vm11, %v7996_v0, 0.0 }
 0xb38   :  { %v8009_v22 = vadd.f32 %v8008_v8, %v8007_v11 }
 0xb3a   :  { %v8010_v16 = vrot.slane %v8009_v22, 4 }
 0xb3c   :  { %v8011_v13 = vadd.f32 %v8010_v16, %v8009_v22 }
 0xb3e   :  { %v8012_v4 = vrot.slane %v8011_v13, 2 }
 0xb40   :  { %v8013_v28 = vadd.f32 %v8012_v4, %v8011_v13 }
 0xb42   :  { %v8014_v63 = vrot.slane %v8013_v28, 1 }
 0xb44   :  { %v8015_v48 = vadd.f32 %v8014_v63, %v8013_v28 }
 0xb46   :  { %v8016_v15 = vadd.f32 %v8015_v48, %v8005_v12 }
 0xb48   :  { %v8018_v42 = vmul.f32 0.03125, %v8016_v15 }
 0xb4a   :  { %v8019_v34 = vsub.f32 %v12857_v40, %v8018_v42  ;;  %v8020_v36 = vsub.f32 %v12859_v52, %v8018_v42  ;;  %v8033_v29 = vsub.f32 %v12868_v23, %v8018_v42  ;;  %v8034_v37 = vsub.f32 %v7996_v0, %v8018_v42 }
 0xb4c   :  { %v8021_v55 = vmul.f32 %v8019_v34, %v8019_v34  ;;  %v8022_v47 = vmul.f32 %v8020_v36, %v8020_v36  ;;  %v8035_v33 = vmul.f32 %v8033_v29, %v8033_v29  ;;  %v8036_v39 = vmul.f32 %v8034_v37, %v8034_v37 }
 0xb4e   :  { %v8023_v54 = vsel %vm5971_vm11, %v8021_v55, 0.0  ;;  %v8024_v49 = vsel %vm5971_vm11, %v8022_v47, 0.0  ;;  %v8037_v45 = vsel %vm5971_vm11, %v8035_v33, 0.0  ;;  %v8038_v46 = vsel %vm5971_vm11, %v8036_v39, 0.0 }
 0xb4f   :  { %v8025_v30 = vadd.f32 %v8024_v49, %v8023_v54  ;;  %v8039_v31 = vadd.f32 %v8038_v46, %v8037_v45  ;;  %v8077_v54 = vld [vmem:[#allocation2] sm:$0x1] }
 0xb51   :  { %v8026_v38 = vrot.slane %v8025_v30, 4  ;;  %v8040_v20 = vrot.slane %v8039_v31, 4 }
 0xb53   :  { %v8027_v21 = vadd.f32 %v8026_v38, %v8025_v30  ;;  %v8041_v26 = vadd.f32 %v8040_v20, %v8039_v31 }
 0xb55   :  { %v8028_v56 = vrot.slane %v8027_v21, 2  ;;  %v8042_v53 = vrot.slane %v8041_v26, 2 }
 0xb57   :  { %v8029_v41 = vadd.f32 %v8028_v56, %v8027_v21  ;;  %v8043_v2 = vadd.f32 %v8042_v53, %v8041_v26 }
 0xb59   :  { %v8030_v35 = vrot.slane %v8029_v41, 1  ;;  %v8044_v3 = vrot.slane %v8043_v2, 1 }
 0xb5b   :  { %v8031_v5 = vadd.f32 %v8030_v35, %v8029_v41  ;;  %v8045_v25 = vadd.f32 %v8044_v3, %v8043_v2 }
 0xb5d   :  { %v8046_v58 = vadd.f32 %v8045_v25, %v8031_v5 }
 0xb5f   :  { %v8047_v32 = vmul.f32 0.03125, %v8046_v58 }
 0xb61   :  { %v8049_v7 = vadd.f32 1e-05, %v8047_v32 }
 0xb63   :  { %10254 = vrsqrt.f32 %v8049_v7 }
 0xb6d   :  { %v10255_v27 = vpop.eup %10254 }
 0xb6e   :  { %v8051_v51 = vmul.f32 %v10255_v27, %v8048_v24 }
 0xb70   :  { %v8053_v17 = vmul.f32 %v8051_v51, %v8018_v42  ;;  %v8059_v60 = vrot.slane %v8051_v51, %v12347_v44 }
 0xb72   :  { %v8054_v14 = vsub.f32 %v8052_v57, %v8053_v17  ;;  %v8072_v6 = vmul.f32 %v8059_v60, %v7996_v0  ;;  %v8061_v18 = vmul.f32 %v8059_v60, %v12857_v40  ;;  %v8062_v50 = vmul.f32 %v8059_v60, %v12859_v52 }
 0xb73   :  { %v8071_v62 = vmul.f32 %v8059_v60, %v12868_v23 }
 0xb74   :  { %v8067_v1 = vrot.slane %v8054_v14, %v12347_v44 }
 0xb76   :  { %v8074_v9 = vadd.f32 %v8072_v6, %v8067_v1  ;;  %v8069_v11 = vadd.f32 %v8067_v1, %v8061_v18  ;;  %v8070_v8 = vadd.f32 %v8067_v1, %v8062_v50  ;;  %v8073_v0 = vadd.f32 %v8071_v62, %v8067_v1 }
 0xb78   :  { %v8110_v10 = vmul.f32 %v8076_v43, %v8074_v9  ;;  %v8078_v40 = vmul.f32 %v8075_v59, %v8069_v11  ;;  %v8079_v22 = vmul.f32 %v8076_v43, %v8070_v8  ;;  %v8109_v52 = vmul.f32 %v8075_v59, %v8073_v0 }
 0xb7a   :  { %v8080_v23 = vsel %vm5971_vm11, %v8078_v40, 0.0  ;;  %v8081_v16 = vsel %vm5971_vm11, %v8079_v22, 0.0  ;;  %v8111_v19 = vsel %vm5971_vm11, %v8109_v52, 0.0  ;;  %v8112_v13 = vsel %vm5971_vm11, %v8110_v10, 0.0 }
 0xb7b   :  { %v8082_v4 = vadd.f32 %v8081_v16, %v8080_v23  ;;  %v8113_v61 = vadd.f32 %v8112_v13, %v8111_v19 }
 0xb7d   :  { %v8083_v28 = vrot.slane %v8082_v4, 4  ;;  %v8114_v63 = vrot.slane %v8113_v61, 4 }
 0xb7f   :  { %v8084_v12 = vadd.f32 %v8083_v28, %v8082_v4  ;;  %v8115_v48 = vadd.f32 %v8114_v63, %v8113_v61 }
 0xb81   :  { %v8085_v15 = vrot.slane %v8084_v12, 2  ;;  %v8116_v42 = vrot.slane %v8115_v48, 2 }
 0xb83   :  { %v8086_v34 = vadd.f32 %v8085_v15, %v8084_v12  ;;  %v8117_v36 = vadd.f32 %v8116_v42, %v8115_v48 }
 0xb85   :  { %v8087_v29 = vrot.slane %v8086_v34, 1  ;;  %v8118_v37 = vrot.slane %v8117_v36, 1 }
 0xb87   :  { %v8088_v55 = vadd.f32 %v8087_v29, %v8086_v34  ;;  %v8119_v33 = vadd.f32 %v8118_v37, %v8117_v36 }
 0xb89   :  { %v8089_v47 = vsel %vm5971_vm11, %v8088_v55, 0.0  ;;  %v8120_v39 = vsel %vm5971_vm11, %v8119_v33, 0.0 }
 0xb8a   :  { %8090 = vadd.xlane.f32.xlu0 %v8089_v47 }
 0xb8e   :  { %8121 = vadd.xlane.f32.xlu0 %v8120_v39 }
 0xc17   :  { %v8091_v49 = vpop.xlane.xlu0 %8090 }
 0xc18   :  { %v8092_v45 = vadd.f32 %v8091_v49, %v8077_v54 }
 0xc1a   :  { %8095 = vperm.xlu1 %9986, %v8092_v45  }
 0xc1b   :  { %v8122_v46 = vpop.xlane.xlu0 %8121 }
 0xc1c   :  { %v8123_v30 = vadd.f32 %v8122_v46, %v8077_v54 }
 0xc1e   :  { %8126 = vperm.xlu1 %9986, %v8123_v30  }
 0xc99   :  { %v8096_v31 = vpop.permute.xlu1 %8095 }
 0xc9a   :  { %v8101_v38 = vrot.slane %v8096_v31, %v12347_v44 }
 0xc9c   :  { %v8581_v20 = vmul.f32 -1.442695, %v8101_v38 }
 0xc9d   :  { %v8127_v21 = vpop.permute.xlu1 %8126 }
 0xc9e   :  { %10256 = vpow2.f32 %v8581_v20  ;;  %v8132_v26 = vrot.slane %v8127_v21, %v12347_v44 }
 0xca0   :  { %v8582_v56 = vmul.f32 -1.442695, %v8132_v26 }
 0xca2   :  { %10258 = vpow2.f32 %v8582_v56 }
 0xca8   :  { %v10257_v53 = vpop.eup %10256 }
 0xca9   :  { %v8105_v41 = vadd.f32 1.0, %v10257_v53 }
 0xcab   :  { %10260 = vrcp.f32 %v8105_v41 }
 0xcac   :  { %v10259_v2 = vpop.eup %10258 }
 0xcad   :  { %v8136_v35 = vadd.f32 1.0, %v10259_v2 }
 0xcaf   :  { %10262 = vrcp.f32 %v8136_v35 }
 0xcb5   :  { %v10261_v3 = vpop.eup %10260 }
 0xcb6   :  { %8108 = vst [vmem:[%s12923_s12] sm:$0x1] %v10261_v3 }
 0xcb9   :  { %v10263_v5 = vpop.eup %10262 }
 0xcba   :  { %8139 = vst [vmem:[%s12923_s12 + $0x1] sm:$0x1] %v10263_v5 }

</bundles_post_ra>
